<compile_context>
chip_gen: v6e
topology: v6e:2x2x1
jax: 0.10.0
libtpu: 0.0.40
codegen_flags: <defaults>
</compile_context>

<pallas_src>
import math
import functools

import jax
import jax.numpy as jnp
from jax.experimental import pallas as pl
from jax.experimental.pallas import tpu as pltpu

SQRT_HALF = math.sqrt(0.5)


def _round_up(x, m):
    return ((x + m - 1) // m) * m


def _vmem_limit_bytes():
    # Per-generation VMEM budget: ~3/4 of physical VMEM (v7x: 64 MiB -> 48 MiB,
    # v5e/v6e: 128 MiB -> 96 MiB), falling back to a v7x-safe 48 MiB.
    try:
        cap = int(pltpu.get_tpu_info().vmem_capacity_bytes)
        if cap > 0:
            return min(cap * 3 // 4, 100 * 1024 * 1024)
    except Exception:
        pass
    return 48 * 1024 * 1024


_VMEM_LIMIT = _vmem_limit_bytes()


# ------------------------------ tiled linear ---------------------------------

def _linear_kernel(x_ref, w_ref, b_ref, o_ref):
    acc = jnp.dot(x_ref[...], w_ref[...], preferred_element_type=jnp.float32)
    o_ref[...] = (acc + b_ref[...].astype(jnp.float32)).astype(o_ref.dtype)


def pallas_linear(x2d, w, b, *, compute_dtype=jnp.bfloat16, out_dtype=jnp.float32):
    """y = x2d @ w + b, tiled over rows and output columns."""
    N, Cin = x2d.shape
    Cout = w.shape[1]
    if compute_dtype is not None:
        x2d = x2d.astype(compute_dtype)
        w = w.astype(compute_dtype)
    bpe = x2d.dtype.itemsize
    out_bpe = jnp.dtype(out_dtype).itemsize

    # Column tile: MXU-shaped fixed width; ragged last column block is masked on
    # writeback, so a non-multiple-of-128 vocab never pulls the whole weight in.
    tc = min(512, _round_up(Cout, 128))
    if tc >= Cout:
        tc = Cout

    # Row tile sized against the per-generation VMEM budget (the weight column
    # block is grid-invariant along the row axis; everything double-buffered).
    db = 2
    budget = _VMEM_LIMIT - db * (Cin * tc * bpe + tc * 4) - (4 << 20)
    per_row = db * (Cin * bpe + tc * out_bpe) + tc * 4
    tn = max(8, min((budget // max(per_row, 1)) // 8 * 8, 4096))
    if tn >= N:
        tn = N

    # columns outer, rows inner -> the weight column block stays resident while
    # row blocks stream through the pipeline.
    grid = (pl.cdiv(Cout, tc), pl.cdiv(N, tn))
    return pl.pallas_call(
        _linear_kernel,
        out_shape=jax.ShapeDtypeStruct((N, Cout), out_dtype),
        grid=grid,
        in_specs=[pl.BlockSpec((tn, Cin), lambda j, i: (i, 0)),
                  pl.BlockSpec((Cin, tc), lambda j, i: (0, j)),
                  pl.BlockSpec((1, tc), lambda j, i: (0, j))],
        out_specs=pl.BlockSpec((tn, tc), lambda j, i: (i, j)),
        compiler_params=pltpu.CompilerParams(
            dimension_semantics=("parallel", "parallel"),
            vmem_limit_bytes=_VMEM_LIMIT),
    )(x2d, w, b.reshape(1, Cout))


# ----------------- fused conv + GLU + attention layer kernel -----------------

def _fconv_layer_kernel(*refs, K, c_out, e_dim, scale, has_proj, has_attn):
    it = iter(refs)
    x_ref = next(it)
    w_ref = next(it)          # (K, Cin, 2*Cout)
    cb_ref = next(it)         # (1, 2*Cout)
    if has_proj:
        pw_ref = next(it)
        pb_ref = next(it)
    if has_attn:
        tgt_ref = next(it)
        enca_ref = next(it)
        encb_ref = next(it)
        aw_ref = next(it)
        ab_ref = next(it)
        ow_ref = next(it)
        ob_ref = next(it)
        acc_in_ref = next(it)  # running attention-score sum (aliased to output)
    x_out_ref = next(it)
    if has_attn:
        attn_ref = next(it)

    def mm(a, b):  # MXU matmul in the weights' dtype, f32 accumulation
        return jnp.dot(a.astype(b.dtype), b, preferred_element_type=jnp.float32)

    x = x_ref[...]                                   # (BB, T, Cin), activation dtype
    BB, T, Cin = x.shape
    x2 = x.reshape(BB * T, Cin)

    # residual = x or proj(x), fused here (no separate kernel / HBM round trip)
    if has_proj:
        res = mm(x2, pw_ref[...]) + pb_ref[...].astype(jnp.float32)
    else:
        res = x2.astype(jnp.float32)

    # Causal ConvTBC (LinearizedConv1d, padding=K-1, future taps removed):
    # zero left halo + K tap matmuls accumulated in f32.  Peak VMEM ~2x the x
    # block (halo + one shifted tap) instead of the (K+1)x of a full im2col.
    # TODO(synk): build the shifted taps with pltpu.roll (XLU) + iota mask to
    # avoid the sliced VMEM copies entirely.
    conv = cb_ref[...].astype(jnp.float32)           # (1, 2*Cout), broadcasts
    if K > 1:
        xp = jnp.concatenate([jnp.zeros((BB, K - 1, Cin), x.dtype), x], axis=1)
        for k in range(K):
            tap = xp[:, k:k + T, :].reshape(BB * T, Cin)
            conv = conv + mm(tap, w_ref[k])
    else:
        conv = conv + mm(x2, w_ref[0])

    # GLU along the channel dim
    g = conv[:, :c_out] * jax.nn.sigmoid(conv[:, c_out:])       # (BB*T, Cout) f32

    if has_attn:
        # single-head encoder-decoder attention:
        #   q = (attproj(g) + target_embedding) * embed_dim**-0.5
        # TODO(synk): for long source lengths, block over S with an online
        # softmax instead of holding the full (BB, T, S) score block in VMEM,
        # and pad the score output's last dim to 128 for lane-dense stores.
        q = mm(g, aw_ref[...]) + ab_ref[...].astype(jnp.float32)
        q = (q.reshape(BB, T, e_dim) + tgt_ref[...].astype(jnp.float32)) * scale
        enc_a = enca_ref[...]
        enc_b = encb_ref[...]
        s = jnp.einsum('bte,bse->bts', q.astype(enc_a.dtype), enc_a,
                       preferred_element_type=jnp.float32)       # (BB, T, S)
        s_max = jnp.max(s, axis=-1, keepdims=True)
        p = jnp.exp(s - s_max)
        attn_w = p * pl.reciprocal(jnp.sum(p, axis=-1, keepdims=True), approx=True)
        a = jnp.einsum('bts,bse->bte', attn_w.astype(enc_b.dtype), enc_b,
                       preferred_element_type=jnp.float32)       # (BB, T, E)
        o = mm(a.reshape(BB * T, e_dim), ow_ref[...]) + ob_ref[...].astype(jnp.float32)
        x_att = o + g                                            # x = attn_out + r
        # avg_attn_scores accumulated in-kernel (input aliased to this output)
        attn_ref[...] = (acc_in_ref[...] + attn_w).astype(attn_ref.dtype)
    else:
        x_att = g

    x_out_ref[...] = ((x_att + res) * SQRT_HALF).reshape(BB, T, c_out).astype(x_out_ref.dtype)


def _fused_layer_batch_block(B, T, S, Cin, Cout, E, K, act_bytes, out_bytes,
                             has_proj, has_attn):
    """Batch rows per grid step, sized against the per-generation VMEM budget."""
    db = 2  # BlockSpec double-buffering
    # grid-invariant weight/bias blocks (charged at 2x: the pipeline still
    # double-buffers them; see TODO about pl.Buffered(1) in the header).
    w_elems = K * Cin * 2 * Cout + (Cin * Cout if has_proj else 0)
    if has_attn:
        w_elems += 2 * Cout * E
    w_bytes = db * (w_elems * act_bytes + (4 * Cout + E) * 4)
    # per-batch-row streamed blocks + in-kernel f32 temporaries
    per_b = db * (T * Cin * act_bytes + T * Cout * out_bytes)            # x in / x out
    per_b += 4 * ((T + K) * Cin + T * Cin + 4 * T * Cout)                # halo, tap, conv, glu, res
    if has_attn:
        per_b += db * ((T * E + 2 * S * E) * act_bytes + 2 * T * S * 4)  # tgt, enc_a/b, attn in+out
        per_b += 4 * (2 * T * E + 3 * T * S)                             # q, ctx, scores/probs/weights
    budget = _VMEM_LIMIT - w_bytes - (6 << 20)
    bb = max(1, budget // max(per_b, 1))
    # keep >= 2 grid steps: lets the parallel batch axis shard across v7x's two
    # TensorCores and gives the input/output pipeline something to overlap.
    return int(min(bb, max(1, -(-B // 2)), B))


def pallas_fconv_layer(x, target_emb, enc_a, enc_b, attn_acc, layer, *, kernel_size,
                       compute_dtype=jnp.bfloat16, out_dtype=jnp.float32):
    B, T, Cin = x.shape
    K = kernel_size
    Cout = layer["conv_w"].shape[2] // 2
    has_proj = layer["proj_w"] is not None
    has_attn = layer["attproj_w"] is not None
    S, E = enc_a.shape[1], enc_a.shape[2]
    scale = float(E) ** -0.5   # attention_nheads == 1  ->  head_dim == embed_dim

    def cast(a):
        return a if compute_dtype is None else a.astype(compute_dtype)

    act_bytes = 4 if compute_dtype is None else jnp.dtype(compute_dtype).itemsize
    out_bytes = jnp.dtype(out_dtype).itemsize
    BB = _fused_layer_batch_block(B, T, S, Cin, Cout, E, K, act_bytes, out_bytes,
                                  has_proj, has_attn)

    args = [cast(x), cast(layer["conv_w"]), layer["conv_b"].reshape(1, 2 * Cout)]
    in_specs = [pl.BlockSpec((BB, T, Cin), lambda i: (i, 0, 0)),
                pl.BlockSpec((K, Cin, 2 * Cout), lambda i: (0, 0, 0)),
                pl.BlockSpec((1, 2 * Cout), lambda i: (0, 0))]
    if has_proj:
        args += [cast(layer["proj_w"]), layer["proj_b"].reshape(1, Cout)]
        in_specs += [pl.BlockSpec((Cin, Cout), lambda i: (0, 0)),
                     pl.BlockSpec((1, Cout), lambda i: (0, 0))]
    if has_attn:
        args += [cast(target_emb), cast(enc_a), cast(enc_b),
                 cast(layer["attproj_w"]), layer["attproj_b"].reshape(1, E),
                 cast(layer["outproj_w"]), layer["outproj_b"].reshape(1, Cout),
                 attn_acc]
        in_specs += [pl.BlockSpec((BB, T, E), lambda i: (i, 0, 0)),
                     pl.BlockSpec((BB, S, E), lambda i: (i, 0, 0)),
                     pl.BlockSpec((BB, S, E), lambda i: (i, 0, 0)),
                     pl.BlockSpec((Cout, E), lambda i: (0, 0)),
                     pl.BlockSpec((1, E), lambda i: (0, 0)),
                     pl.BlockSpec((E, Cout), lambda i: (0, 0)),
                     pl.BlockSpec((1, Cout), lambda i: (0, 0)),
                     pl.BlockSpec((BB, T, S), lambda i: (i, 0, 0))]

    out_shape = [jax.ShapeDtypeStruct((B, T, Cout), out_dtype)]
    out_specs = [pl.BlockSpec((BB, T, Cout), lambda i: (i, 0, 0))]
    io_aliases = {}
    if has_attn:
        out_shape.append(jax.ShapeDtypeStruct((B, T, S), jnp.float32))
        out_specs.append(pl.BlockSpec((BB, T, S), lambda i: (i, 0, 0)))
        io_aliases = {len(args) - 1: 1}   # alias attn accumulator input -> output

    kern = functools.partial(_fconv_layer_kernel, K=K, c_out=Cout, e_dim=E,
                             scale=scale, has_proj=has_proj, has_attn=has_attn)
    outs = pl.pallas_call(
        kern,
        out_shape=tuple(out_shape),
        grid=(pl.cdiv(B, BB),),
        in_specs=in_specs,
        out_specs=tuple(out_specs),
        input_output_aliases=io_aliases,
        compiler_params=pltpu.CompilerParams(
            dimension_semantics=("parallel",),
            vmem_limit_bytes=_VMEM_LIMIT),
    )(*args)
    if has_attn:
        return outs[0], outs[1]
    return outs[0], None


# ------------------------ parameters & forward (glue) ------------------------

def init_params(key, *, vocab, embed_dim, out_embed_dim, max_positions, padding_idx,
                convolutions, attention, dropout):
    n_layers = len(convolutions)
    keys = jax.random.split(key, 5 + 4 * n_layers)
    ki = iter(keys)
    p = {}
    emb = 0.1 * jax.random.normal(next(ki), (vocab, embed_dim), jnp.float32)
    p["embed_tokens"] = emb.at[padding_idx].set(0.0)
    n_pos = max_positions + padding_idx + 1
    pos = 0.1 * jax.random.normal(next(ki), (n_pos, embed_dim), jnp.float32)
    p["embed_positions"] = pos.at[padding_idx].set(0.0)

    in_channels = convolutions[0][0]
    p["fc1_w"] = math.sqrt((1.0 - dropout) / embed_dim) * jax.random.normal(
        next(ki), (embed_dim, in_channels), jnp.float32)
    p["fc1_b"] = jnp.zeros((in_channels,), jnp.float32)

    layers = []
    for i, (out_channels, ksz) in enumerate(convolutions):
        layer = {}
        if in_channels != out_channels:
            layer["proj_w"] = math.sqrt(1.0 / in_channels) * jax.random.normal(
                next(ki), (in_channels, out_channels), jnp.float32)
            layer["proj_b"] = jnp.zeros((out_channels,), jnp.float32)
        else:
            layer["proj_w"] = None
            layer["proj_b"] = None
        cstd = math.sqrt((4.0 * (1.0 - dropout)) / (ksz * in_channels))
        layer["conv_w"] = cstd * jax.random.normal(
            next(ki), (ksz, in_channels, 2 * out_channels), jnp.float32)
        layer["conv_b"] = jnp.zeros((2 * out_channels,), jnp.float32)
        if attention[i]:
            layer["attproj_w"] = math.sqrt((1.0 - dropout) / out_channels) * jax.random.normal(
                next(ki), (out_channels, embed_dim), jnp.float32)
            layer["attproj_b"] = jnp.zeros((embed_dim,), jnp.float32)
            layer["outproj_w"] = math.sqrt(1.0 / embed_dim) * jax.random.normal(
                next(ki), (embed_dim, out_channels), jnp.float32)
            layer["outproj_b"] = jnp.zeros((out_channels,), jnp.float32)
        else:
            layer["attproj_w"] = None
            layer["attproj_b"] = None
            layer["outproj_w"] = None
            layer["outproj_b"] = None
        layers.append(layer)
        in_channels = out_channels
    p["layers"] = layers

    p["fc2_w"] = math.sqrt(1.0 / in_channels) * jax.random.normal(
        next(ki), (in_channels, out_embed_dim), jnp.float32)
    p["fc2_b"] = jnp.zeros((out_embed_dim,), jnp.float32)
    p["fc3_w"] = math.sqrt((1.0 - dropout) / out_embed_dim) * jax.random.normal(
        next(ki), (out_embed_dim, vocab), jnp.float32)
    p["fc3_b"] = jnp.zeros((vocab,), jnp.float32)
    return p


def make_positions(tokens, padding_idx, left_pad):
    # fairseq utils.make_positions for LearnedPositionalEmbedding
    B, T = tokens.shape
    mask = tokens != padding_idx
    positions = jnp.broadcast_to(
        jnp.arange(padding_idx + 1, padding_idx + 1 + T, dtype=jnp.int32)[None, :], (B, T))
    if left_pad:
        positions = positions - T + jnp.sum(mask, axis=1, keepdims=True).astype(jnp.int32)
    return jnp.where(mask, positions, padding_idx)


def conv_decoder_forward(params, prev_output_tokens, encoder_a, encoder_b, *,
                         kernel_sizes, padding_idx, left_pad=False,
                         compute_dtype=jnp.bfloat16):
    """Eval-mode forward of the ConvDecoder (non-pretrained, no selfattention)."""
    # TODO(synk): selfattention layers, the `pretrained` gated-fusion path, and
    # multi-head / downsampled / gated / project_input attention variants are not
    # implemented (all disabled by the module defaults used here).
    B, T = prev_output_tokens.shape
    E = params["embed_tokens"].shape[1]
    S = encoder_a.shape[1]
    act_dtype = jnp.float32 if compute_dtype is None else compute_dtype

    positions = make_positions(prev_output_tokens, padding_idx, left_pad)
    x_emb = params["embed_tokens"][prev_output_tokens] + params["embed_positions"][positions]
    target_embedding = x_emb.astype(act_dtype)       # dropout = identity (eval)
    enc_a = encoder_a.astype(act_dtype)
    enc_b = encoder_b.astype(act_dtype)

    C0 = params["fc1_w"].shape[1]
    x = pallas_linear(x_emb.reshape(B * T, E), params["fc1_w"], params["fc1_b"],
                      compute_dtype=compute_dtype, out_dtype=act_dtype).reshape(B, T, C0)

    avg_attn = jnp.zeros((B, T, S), jnp.float32)
    got_attn = False
    for layer, ksz in zip(params["layers"], kernel_sizes):
        x, new_attn = pallas_fconv_layer(x, target_embedding, enc_a, enc_b, avg_attn,
                                         layer, kernel_size=ksz,
                                         compute_dtype=compute_dtype, out_dtype=act_dtype)
        if new_attn is not None:   # eval + need_attn: accumulated in-kernel (aliased)
            avg_attn = new_attn
            got_attn = True

    C_last = x.shape[-1]
    h = pallas_linear(x.reshape(B * T, C_last), params["fc2_w"], params["fc2_b"],
                      compute_dtype=compute_dtype, out_dtype=act_dtype)
    logits = pallas_linear(h, params["fc3_w"], params["fc3_b"],
                           compute_dtype=compute_dtype, out_dtype=jnp.float32)
    vocab = params["fc3_w"].shape[1]
    return logits.reshape(B, T, vocab), (avg_attn if got_attn else None)


# pure-JAX reference mirroring the kernels' dtype strategy (for the correctness check)
def conv_decoder_forward_ref(params, prev_output_tokens, encoder_a, encoder_b, *,
                             kernel_sizes, padding_idx, left_pad=False, compute_dtype=None):
    cd = compute_dtype

    def c(a):
        return a if cd is None else a.astype(cd)

    B, T = prev_output_tokens.shape
    E = params["embed_tokens"].shape[1]
    positions = make_positions(prev_output_tokens, padding_idx, left_pad)
    x_emb = params["embed_tokens"][prev_output_tokens] + params["embed_positions"][positions]
    tgt = c(x_emb)
    x = c(jnp.einsum('bte,ec->btc', c(x_emb), c(params["fc1_w"]),
                     preferred_element_type=jnp.float32) + params["fc1_b"])
    avg = None
    for layer, K in zip(params["layers"], kernel_sizes):
        Cout = layer["conv_w"].shape[2] // 2
        if layer["proj_w"] is None:
            res = x.astype(jnp.float32)
        else:
            res = jnp.einsum('btc,cd->btd', x, c(layer["proj_w"]),
                             preferred_element_type=jnp.float32) + layer["proj_b"]
        xp = jnp.pad(x, ((0, 0), (K - 1, 0), (0, 0)))
        conv = layer["conv_b"].astype(jnp.float32)
        for k in range(K):
            conv = conv + jnp.einsum('btc,cd->btd', xp[:, k:k + T], c(layer["conv_w"][k]),
                                     preferred_element_type=jnp.float32)
        g = conv[..., :Cout] * jax.nn.sigmoid(conv[..., Cout:])
        if layer["attproj_w"] is not None:
            q = jnp.einsum('btc,ce->bte', c(g), c(layer["attproj_w"]),
                           preferred_element_type=jnp.float32) + layer["attproj_b"]
            q = (q + tgt.astype(jnp.float32)) * (float(E) ** -0.5)
            s = jnp.einsum('bte,bse->bts', c(q), c(encoder_a),
                           preferred_element_type=jnp.float32)
            w = jax.nn.softmax(s, axis=-1)
            a = jnp.einsum('bts,bse->bte', c(w), c(encoder_b),
                           preferred_element_type=jnp.float32)
            o = jnp.einsum('bte,ec->btc', c(a), c(layer["outproj_w"]),
                           preferred_element_type=jnp.float32) + layer["outproj_b"]
            x_att = o + g
            avg = w if avg is None else avg + w
        else:
            x_att = g
        x = c((x_att + res) * SQRT_HALF)
    h = c(jnp.einsum('btc,cd->btd', c(x), c(params["fc2_w"]),
                     preferred_element_type=jnp.float32) + params["fc2_b"])
    logits = jnp.einsum('btd,dv->btv', c(h), c(params["fc3_w"]),
                        preferred_element_type=jnp.float32) + params["fc3_b"]
    return logits, avg


# ---------------------------------- main --------------------------------------

if __name__ == "__main__":
    vocab = 200               # not a multiple of 128: exercises non-128 output width in fc3
    padding_idx = 1
    embed_dim = 128           # lane-dense channel counts (multiples of 128)
    out_embed_dim = 128
    max_positions = 64
    convolutions = ((128, 3), (256, 3), (256, 3))   # exercises proj=None and proj paths
    attention = (True, True, True)                   # module default: attention everywhere
    dropout = 0.1
    B, T_tgt, S_src = 2, 16, 16

    key = jax.random.PRNGKey(0)
    k_par, k_tok, k_ea, k_eb = jax.random.split(key, 4)
    params = init_params(k_par, vocab=vocab, embed_dim=embed_dim,
                         out_embed_dim=out_embed_dim, max_positions=max_positions,
                         padding_idx=padding_idx, convolutions=convolutions,
                         attention=attention, dropout=dropout)

    prev_output_tokens = jax.random.randint(k_tok, (B, T_tgt), 2, vocab, dtype=jnp.int32)
    # stand-in for the companion ConvEncoder's (encoder_a, encoder_b), already in
    # batch-major (B, S, E) layout (the decoder's _split_encoder_out is a transpose).
    encoder_a = 0.1 * jax.random.normal(k_ea, (B, S_src, embed_dim), jnp.float32)
    encoder_b = 0.1 * jax.random.normal(k_eb, (B, S_src, embed_dim), jnp.float32)

    kernel_sizes = tuple(k for _, k in convolutions)

    # default path: bf16 MXU inputs, f32 accumulation, bf16 inter-layer activations
    fwd = jax.jit(functools.partial(conv_decoder_forward,
                                    kernel_sizes=kernel_sizes,
                                    padding_idx=padding_idx,
                                    left_pad=False,
                                    compute_dtype=jnp.bfloat16))
    logits, attn_scores = fwd(params, prev_output_tokens, encoder_a, encoder_b)
    jax.block_until_ready(logits)
    jax.block_until_ready(attn_scores)
    assert logits.shape == (B, T_tgt, vocab)
    assert attn_scores.shape == (B, T_tgt, S_src)

    ref_logits, ref_attn = conv_decoder_forward_ref(
        params, prev_output_tokens, encoder_a, encoder_b,
        kernel_sizes=kernel_sizes, padding_idx=padding_idx, left_pad=False,
        compute_dtype=jnp.bfloat16)
    assert jnp.allclose(logits, ref_logits, atol=2e-2, rtol=2e-2), \
        float(jnp.max(jnp.abs(logits - ref_logits)))
    assert jnp.allclose(attn_scores, ref_attn, atol=2e-2, rtol=2e-2), \
        float(jnp.max(jnp.abs(attn_scores - ref_attn)))

    # exact-f32 path sanity check against a pure-f32 reference
    fwd32 = jax.jit(functools.partial(conv_decoder_forward,
                                      kernel_sizes=kernel_sizes,
                                      padding_idx=padding_idx,
                                      left_pad=False,
                                      compute_dtype=None))
    logits32, attn32 = fwd32(params, prev_output_tokens, encoder_a, encoder_b)
    jax.block_until_ready(logits32)
    with jax.default_matmul_precision("float32"):
        ref32_logits, ref32_attn = conv_decoder_forward_ref(
            params, prev_output_tokens, encoder_a, encoder_b,
            kernel_sizes=kernel_sizes, padding_idx=padding_idx, left_pad=False,
            compute_dtype=None)
    assert jnp.allclose(logits32, ref32_logits, atol=1e-2, rtol=1e-2), \
        float(jnp.max(jnp.abs(logits32 - ref32_logits)))
    assert jnp.allclose(attn32, ref32_attn, atol=1e-2, rtol=1e-2), \
        float(jnp.max(jnp.abs(attn32 - ref32_attn)))

    print("KERNEL_OK")
</pallas_src>

<mosaic_0001>
module attributes {stable_mosaic.version = 11 : i64} {
  func.func @_linear_kernel(%arg0: i32, %arg1: i32, %arg2: memref<32x128xbf16, #tpu.memory_space<vmem>>, %arg3: memref<128x128xbf16, #tpu.memory_space<vmem>>, %arg4: memref<1x128xf32, #tpu.memory_space<vmem>>, %arg5: memref<32x128xbf16, #tpu.memory_space<vmem>>) attributes {dimension_semantics = [#tpu.dimension_semantics<parallel>, #tpu.dimension_semantics<parallel>], iteration_bounds = array<i64: 1, 1>, scalar_prefetch = 0 : i64, scratch_operands = 0 : i64, tpu.core_type = #tpu.core_type<tc>, window_params = [{transform_indices = @transform_0, window_bounds = array<i64: 32, 128>}, {transform_indices = @transform_1, window_bounds = array<i64: 128, 128>}, {transform_indices = @transform_2, window_bounds = array<i64: 1, 128>}, {transform_indices = @transform_3, window_bounds = array<i64: 32, 128>}]} {
    %c0 = arith.constant 0 : index
    %c0_0 = arith.constant 0 : index
    %0 = vector.load %arg2[%c0, %c0_0] : memref<32x128xbf16, #tpu.memory_space<vmem>>, vector<32x128xbf16>
    %c0_1 = arith.constant 0 : index
    %c0_2 = arith.constant 0 : index
    %1 = vector.load %arg3[%c0_1, %c0_2] : memref<128x128xbf16, #tpu.memory_space<vmem>>, vector<128x128xbf16>
    %cst = arith.constant dense<0.000000e+00> : vector<32x128xf32>
    %2 = tpu.matmul %0, %1, %cst {dimension_numbers = #tpu.dot_dimension_numbers<[1], [0], [0], [1], [0, 0, 1, 1], [], []>} : vector<32x128xbf16>, vector<128x128xbf16>, vector<32x128xf32> -> vector<32x128xf32>
    %c0_3 = arith.constant 0 : index
    %c0_4 = arith.constant 0 : index
    %3 = vector.load %arg4[%c0_3, %c0_4] : memref<1x128xf32, #tpu.memory_space<vmem>>, vector<1x128xf32>
    %4 = vector.broadcast %3 : vector<1x128xf32> to vector<32x128xf32>
    %5 = arith.addf %2, %4 : vector<32x128xf32>
    %6 = arith.truncf %5 : vector<32x128xf32> to vector<32x128xbf16>
    %c0_5 = arith.constant 0 : index
    %c0_6 = arith.constant 0 : index
    %7 = vector.load %arg5[%c0_5, %c0_6] : memref<32x128xbf16, #tpu.memory_space<vmem>>, vector<32x128xbf16>
    tpu.vector_store %arg5[%c0_5, %c0_6], %6 {strides = array<i32>} : memref<32x128xbf16, #tpu.memory_space<vmem>>, vector<32x128xbf16>,
    return
  }
  func.func @transform_0(%arg0: i32, %arg1: i32) -> (i32, i32) {
    %c0_i32 = arith.constant 0 : i32
    %c0_i32_0 = arith.constant 0 : i32
    return %arg1, %c0_i32 : i32, i32
  }
  func.func @transform_1(%arg0: i32, %arg1: i32) -> (i32, i32) {
    %c0_i32 = arith.constant 0 : i32
    %c0_i32_0 = arith.constant 0 : i32
    return %c0_i32, %arg0 : i32, i32
  }
  func.func @transform_2(%arg0: i32, %arg1: i32) -> (i32, i32) {
    %c0_i32 = arith.constant 0 : i32
    %c0_i32_0 = arith.constant 0 : i32
    return %c0_i32, %arg0 : i32, i32
  }
  func.func @transform_3(%arg0: i32, %arg1: i32) -> (i32, i32) {
    %c0_i32 = arith.constant 0 : i32
    return %arg1, %arg0 : i32, i32
  }
}

module attributes {stable_mosaic.version = 11 : i64} {
  func.func @_fconv_layer_kernel(%arg0: i32, %arg1: memref<1x16x128xbf16, #tpu.memory_space<vmem>>, %arg2: memref<3x128x256xbf16, #tpu.memory_space<vmem>>, %arg3: memref<1x256xf32, #tpu.memory_space<vmem>>, %arg4: memref<1x16x128xbf16, #tpu.memory_space<vmem>>, %arg5: memref<1x16x128xbf16, #tpu.memory_space<vmem>>, %arg6: memref<1x16x128xbf16, #tpu.memory_space<vmem>>, %arg7: memref<128x128xbf16, #tpu.memory_space<vmem>>, %arg8: memref<1x128xf32, #tpu.memory_space<vmem>>, %arg9: memref<128x128xbf16, #tpu.memory_space<vmem>>, %arg10: memref<1x128xf32, #tpu.memory_space<vmem>>, %arg11: memref<1x16x16xf32, #tpu.memory_space<vmem>>, %arg12: memref<1x16x128xbf16, #tpu.memory_space<vmem>>, %arg13: memref<1x16x16xf32, #tpu.memory_space<vmem>>) attributes {dimension_semantics = [#tpu.dimension_semantics<parallel>], iteration_bounds = array<i64: 2>, scalar_prefetch = 0 : i64, scratch_operands = 0 : i64, tpu.core_type = #tpu.core_type<tc>, window_params = [{transform_indices = @transform_0, window_bounds = array<i64: 1, 16, 128>}, {pipeline_mode = #tpu.pipeline_mode<synchronous>, transform_indices = @transform_1, window_bounds = array<i64: 3, 128, 256>}, {pipeline_mode = #tpu.pipeline_mode<synchronous>, transform_indices = @transform_2, window_bounds = array<i64: 1, 256>}, {transform_indices = @transform_3, window_bounds = array<i64: 1, 16, 128>}, {transform_indices = @transform_4, window_bounds = array<i64: 1, 16, 128>}, {transform_indices = @transform_5, window_bounds = array<i64: 1, 16, 128>}, {pipeline_mode = #tpu.pipeline_mode<synchronous>, transform_indices = @transform_6, window_bounds = array<i64: 128, 128>}, {pipeline_mode = #tpu.pipeline_mode<synchronous>, transform_indices = @transform_7, window_bounds = array<i64: 1, 128>}, {pipeline_mode = #tpu.pipeline_mode<synchronous>, transform_indices = @transform_8, window_bounds = array<i64: 128, 128>}, {pipeline_mode = #tpu.pipeline_mode<synchronous>, transform_indices = @transform_9, window_bounds = array<i64: 1, 128>}, {transform_indices = @transform_10, window_bounds = array<i64: 1, 16, 16>}, {transform_indices = @transform_11, window_bounds = array<i64: 1, 16, 128>}, {transform_indices = @transform_12, window_bounds = array<i64: 1, 16, 16>}]} {
    %c0 = arith.constant 0 : index
    %c0_0 = arith.constant 0 : index
    %c0_1 = arith.constant 0 : index
    %0 = vector.load %arg1[%c0, %c0_0, %c0_1] : memref<1x16x128xbf16, #tpu.memory_space<vmem>>, vector<1x16x128xbf16>
    %1 = vector.shape_cast %0 : vector<1x16x128xbf16> to vector<16x128xbf16>
    %2 = arith.extf %1 : vector<16x128xbf16> to vector<16x128xf32>
    %c0_2 = arith.constant 0 : index
    %c0_3 = arith.constant 0 : index
    %3 = vector.load %arg3[%c0_2, %c0_3] : memref<1x256xf32, #tpu.memory_space<vmem>>, vector<1x256xf32>
    %cst = arith.constant 0.000000e+00 : bf16
    %4 = vector.broadcast %cst : bf16 to vector<1x2x128xbf16>
    %5 = tpu.concatenate %4, %0 in 1 : vector<1x2x128xbf16>, vector<1x16x128xbf16> -> vector<1x18x128xbf16>
    %6 = vector.extract_strided_slice %5 {offsets = [0, 0, 0], sizes = [1, 16, 128], strides = [1, 1, 1]} : vector<1x18x128xbf16> to vector<1x16x128xbf16>
    %7 = vector.shape_cast %6 : vector<1x16x128xbf16> to vector<16x128xbf16>
    %c0_4 = arith.constant 0 : index
    %c0_5 = arith.constant 0 : index
    %c0_6 = arith.constant 0 : index
    %8 = vector.load %arg2[%c0_4, %c0_5, %c0_6] : memref<3x128x256xbf16, #tpu.memory_space<vmem>>, vector<1x128x256xbf16>
    %9 = vector.shape_cast %8 : vector<1x128x256xbf16> to vector<128x256xbf16>
    %cst_7 = arith.constant dense<0.000000e+00> : vector<16x256xf32>
    %10 = tpu.matmul %7, %9, %cst_7 {dimension_numbers = #tpu.dot_dimension_numbers<[1], [0], [0], [1], [0, 0, 1, 1], [], []>} : vector<16x128xbf16>, vector<128x256xbf16>, vector<16x256xf32> -> vector<16x256xf32>
    %11 = vector.broadcast %3 : vector<1x256xf32> to vector<16x256xf32>
    %12 = arith.addf %11, %10 : vector<16x256xf32>
    %13 = vector.extract_strided_slice %5 {offsets = [0, 1, 0], sizes = [1, 16, 128], strides = [1, 1, 1]} : vector<1x18x128xbf16> to vector<1x16x128xbf16>
    %14 = vector.shape_cast %13 : vector<1x16x128xbf16> to vector<16x128xbf16>
    %c1 = arith.constant 1 : index
    %c0_8 = arith.constant 0 : index
    %c0_9 = arith.constant 0 : index
    %15 = vector.load %arg2[%c1, %c0_8, %c0_9] : memref<3x128x256xbf16, #tpu.memory_space<vmem>>, vector<1x128x256xbf16>
    %16 = vector.shape_cast %15 : vector<1x128x256xbf16> to vector<128x256xbf16>
    %cst_10 = arith.constant dense<0.000000e+00> : vector<16x256xf32>
    %17 = tpu.matmul %14, %16, %cst_10 {dimension_numbers = #tpu.dot_dimension_numbers<[1], [0], [0], [1], [0, 0, 1, 1], [], []>} : vector<16x128xbf16>, vector<128x256xbf16>, vector<16x256xf32> -> vector<16x256xf32>
    %18 = arith.addf %12, %17 : vector<16x256xf32>
    %19 = vector.extract_strided_slice %5 {offsets = [0, 2, 0], sizes = [1, 16, 128], strides = [1, 1, 1]} : vector<1x18x128xbf16> to vector<1x16x128xbf16>
    %20 = vector.shape_cast %19 : vector<1x16x128xbf16> to vector<16x128xbf16>
    %c2 = arith.constant 2 : index
    %c0_11 = arith.constant 0 : index
    %c0_12 = arith.constant 0 : index
    %21 = vector.load %arg2[%c2, %c0_11, %c0_12] : memref<3x128x256xbf16, #tpu.memory_space<vmem>>, vector<1x128x256xbf16>
    %22 = vector.shape_cast %21 : vector<1x128x256xbf16> to vector<128x256xbf16>
    %cst_13 = arith.constant dense<0.000000e+00> : vector<16x256xf32>
    %23 = tpu.matmul %20, %22, %cst_13 {dimension_numbers = #tpu.dot_dimension_numbers<[1], [0], [0], [1], [0, 0, 1, 1], [], []>} : vector<16x128xbf16>, vector<128x256xbf16>, vector<16x256xf32> -> vector<16x256xf32>
    %24 = arith.addf %18, %23 : vector<16x256xf32>
    %25 = vector.extract_strided_slice %24 {offsets = [0, 0], sizes = [16, 128], strides = [1, 1]} : vector<16x256xf32> to vector<16x128xf32>
    %26 = vector.extract_strided_slice %24 {offsets = [0, 128], sizes = [16, 128], strides = [1, 1]} : vector<16x256xf32> to vector<16x128xf32>
    %27 = arith.negf %26 : vector<16x128xf32>
    %28 = math.exp %27 : vector<16x128xf32>
    %cst_14 = arith.constant 1.000000e+00 : f32
    %29 = vector.broadcast %cst_14 : f32 to vector<16x128xf32>
    %30 = arith.addf %29, %28 : vector<16x128xf32>
    %31 = arith.divf %29, %30 : vector<16x128xf32>
    %32 = arith.mulf %25, %31 : vector<16x128xf32>
    %c0_15 = arith.constant 0 : index
    %c0_16 = arith.constant 0 : index
    %33 = vector.load %arg7[%c0_15, %c0_16] : memref<128x128xbf16, #tpu.memory_space<vmem>>, vector<128x128xbf16>
    %34 = arith.truncf %32 : vector<16x128xf32> to vector<16x128xbf16>
    %cst_17 = arith.constant dense<0.000000e+00> : vector<16x128xf32>
    %35 = tpu.matmul %34, %33, %cst_17 {dimension_numbers = #tpu.dot_dimension_numbers<[1], [0], [0], [1], [0, 0, 1, 1], [], []>} : vector<16x128xbf16>, vector<128x128xbf16>, vector<16x128xf32> -> vector<16x128xf32>
    %c0_18 = arith.constant 0 : index
    %c0_19 = arith.constant 0 : index
    %36 = vector.load %arg8[%c0_18, %c0_19] : memref<1x128xf32, #tpu.memory_space<vmem>>, vector<1x128xf32>
    %37 = vector.broadcast %36 : vector<1x128xf32> to vector<16x128xf32>
    %38 = arith.addf %35, %37 : vector<16x128xf32>
    %39 = vector.shape_cast %38 : vector<16x128xf32> to vector<1x16x128xf32>
    %c0_20 = arith.constant 0 : index
    %c0_21 = arith.constant 0 : index
    %c0_22 = arith.constant 0 : index
    %40 = vector.load %arg4[%c0_20, %c0_21, %c0_22] : memref<1x16x128xbf16, #tpu.memory_space<vmem>>, vector<1x16x128xbf16>
    %41 = arith.extf %40 : vector<1x16x128xbf16> to vector<1x16x128xf32>
    %42 = arith.addf %39, %41 : vector<1x16x128xf32>
    %cst_23 = arith.constant 0.0883883461 : f32
    %43 = vector.broadcast %cst_23 : f32 to vector<1x16x128xf32>
    %44 = arith.mulf %42, %43 : vector<1x16x128xf32>
    %c0_24 = arith.constant 0 : index
    %c0_25 = arith.constant 0 : index
    %c0_26 = arith.constant 0 : index
    %45 = vector.load %arg5[%c0_24, %c0_25, %c0_26] : memref<1x16x128xbf16, #tpu.memory_space<vmem>>, vector<1x16x128xbf16>
    %c0_27 = arith.constant 0 : index
    %c0_28 = arith.constant 0 : index
    %c0_29 = arith.constant 0 : index
    %46 = vector.load %arg6[%c0_27, %c0_28, %c0_29] : memref<1x16x128xbf16, #tpu.memory_space<vmem>>, vector<1x16x128xbf16>
    %47 = arith.truncf %44 : vector<1x16x128xf32> to vector<1x16x128xbf16>
    "tpu.trace_start"() <{level = 10 : i32, message = "bte,bse->bts"}> : () -> ()
    %cst_30 = arith.constant dense<0.000000e+00> : vector<1x16x16xf32>
    %48 = tpu.matmul %47, %45, %cst_30 {dimension_numbers = #tpu.dot_dimension_numbers<[2], [2], [1], [1], [0, 0, 0, 1, 1, 1], [0], [0]>} : vector<1x16x128xbf16>, vector<1x16x128xbf16>, vector<1x16x16xf32> -> vector<1x16x16xf32>
    "tpu.trace_stop"() : () -> ()
    %cst_31 = arith.constant dense<0xFF800000> : vector<1x16xf32>
    %49 = vector.multi_reduction <maximumf>, %48, %cst_31 [2] : vector<1x16x16xf32> to vector<1x16xf32>
    %50 = vector.shape_cast %49 : vector<1x16xf32> to vector<1x16x1xf32>
    %51 = vector.broadcast %50 : vector<1x16x1xf32> to vector<1x16x16xf32>
    %52 = arith.subf %48, %51 : vector<1x16x16xf32>
    %53 = math.exp %52 : vector<1x16x16xf32>
    %cst_32 = arith.constant dense<0.000000e+00> : vector<1x16xf32>
    %54 = vector.multi_reduction <add>, %53, %cst_32 [2] : vector<1x16x16xf32> to vector<1x16xf32>
    %55 = vector.shape_cast %54 : vector<1x16xf32> to vector<1x16x1xf32>
    %56 = tpu.reciprocal %55 {approx = true} : vector<1x16x1xf32> -> vector<1x16x1xf32>
    %57 = vector.broadcast %56 : vector<1x16x1xf32> to vector<1x16x16xf32>
    %58 = arith.mulf %53, %57 : vector<1x16x16xf32>
    %59 = arith.truncf %58 : vector<1x16x16xf32> to vector<1x16x16xbf16>
    "tpu.trace_start"() <{level = 10 : i32, message = "bts,bse->bte"}> : () -> ()
    %cst_33 = arith.constant dense<0.000000e+00> : vector<1x16x128xf32>
    %60 = tpu.matmul %59, %46, %cst_33 {dimension_numbers = #tpu.dot_dimension_numbers<[2], [1], [1], [2], [0, 0, 0, 1, 1, 2], [0], [0]>} : vector<1x16x16xbf16>, vector<1x16x128xbf16>, vector<1x16x128xf32> -> vector<1x16x128xf32>
    "tpu.trace_stop"() : () -> ()
    %61 = vector.shape_cast %60 : vector<1x16x128xf32> to vector<16x128xf32>
    %c0_34 = arith.constant 0 : index
    %c0_35 = arith.constant 0 : index
    %62 = vector.load %arg9[%c0_34, %c0_35] : memref<128x128xbf16, #tpu.memory_space<vmem>>, vector<128x128xbf16>
    %63 = arith.truncf %61 : vector<16x128xf32> to vector<16x128xbf16>
    %cst_36 = arith.constant dense<0.000000e+00> : vector<16x128xf32>
    %64 = tpu.matmul %63, %62, %cst_36 {dimension_numbers = #tpu.dot_dimension_numbers<[1], [0], [0], [1], [0, 0, 1, 1], [], []>} : vector<16x128xbf16>, vector<128x128xbf16>, vector<16x128xf32> -> vector<16x128xf32>
    %c0_37 = arith.constant 0 : index
    %c0_38 = arith.constant 0 : index
    %65 = vector.load %arg10[%c0_37, %c0_38] : memref<1x128xf32, #tpu.memory_space<vmem>>, vector<1x128xf32>
    %66 = vector.broadcast %65 : vector<1x128xf32> to vector<16x128xf32>
    %67 = arith.addf %64, %66 : vector<16x128xf32>
    %68 = arith.addf %67, %32 : vector<16x128xf32>
    %c0_39 = arith.constant 0 : index
    %c0_40 = arith.constant 0 : index
    %c0_41 = arith.constant 0 : index
    %69 = vector.load %arg11[%c0_39, %c0_40, %c0_41] : memref<1x16x16xf32, #tpu.memory_space<vmem>>, vector<1x16x16xf32>
    %70 = arith.addf %69, %58 : vector<1x16x16xf32>
    %c0_42 = arith.constant 0 : index
    %c0_43 = arith.constant 0 : index
    %c0_44 = arith.constant 0 : index
    %71 = vector.load %arg13[%c0_42, %c0_43, %c0_44] : memref<1x16x16xf32, #tpu.memory_space<vmem>>, vector<1x16x16xf32>
    tpu.vector_store %arg13[%c0_42, %c0_43, %c0_44], %70 {strides = array<i32>} : memref<1x16x16xf32, #tpu.memory_space<vmem>>, vector<1x16x16xf32>,
    %72 = arith.addf %68, %2 : vector<16x128xf32>
    %cst_45 = arith.constant 0.707106769 : f32
    %73 = vector.broadcast %cst_45 : f32 to vector<16x128xf32>
    %74 = arith.mulf %72, %73 : vector<16x128xf32>
    %75 = vector.shape_cast %74 : vector<16x128xf32> to vector<1x16x128xf32>
    %76 = arith.truncf %75 : vector<1x16x128xf32> to vector<1x16x128xbf16>
    %c0_46 = arith.constant 0 : index
    %c0_47 = arith.constant 0 : index
    %c0_48 = arith.constant 0 : index
    %77 = vector.load %arg12[%c0_46, %c0_47, %c0_48] : memref<1x16x128xbf16, #tpu.memory_space<vmem>>, vector<1x16x128xbf16>
    tpu.vector_store %arg12[%c0_46, %c0_47, %c0_48], %76 {strides = array<i32>} : memref<1x16x128xbf16, #tpu.memory_space<vmem>>, vector<1x16x128xbf16>,
    return
  }
  func.func @transform_0(%arg0: i32) -> (i32, i32, i32) {
    %c0_i32 = arith.constant 0 : i32
    %c0_i32_0 = arith.constant 0 : i32
    %c0_i32_1 = arith.constant 0 : i32
    return %arg0, %c0_i32, %c0_i32_0 : i32, i32, i32
  }
  func.func @transform_1(%arg0: i32) -> (i32, i32, i32) {
    %c0_i32 = arith.constant 0 : i32
    %c0_i32_0 = arith.constant 0 : i32
    %c0_i32_1 = arith.constant 0 : i32
    %c0_i32_2 = arith.constant 0 : i32
    return %c0_i32, %c0_i32_0, %c0_i32_1 : i32, i32, i32
  }
  func.func @transform_2(%arg0: i32) -> (i32, i32) {
    %c0_i32 = arith.constant 0 : i32
    %c0_i32_0 = arith.constant 0 : i32
    %c0_i32_1 = arith.constant 0 : i32
    return %c0_i32, %c0_i32_0 : i32, i32
  }
  func.func @transform_3(%arg0: i32) -> (i32, i32, i32) {
    %c0_i32 = arith.constant 0 : i32
    %c0_i32_0 = arith.constant 0 : i32
    %c0_i32_1 = arith.constant 0 : i32
    return %arg0, %c0_i32, %c0_i32_0 : i32, i32, i32
  }
  func.func @transform_4(%arg0: i32) -> (i32, i32, i32) {
    %c0_i32 = arith.constant 0 : i32
    %c0_i32_0 = arith.constant 0 : i32
    %c0_i32_1 = arith.constant 0 : i32
    return %arg0, %c0_i32, %c0_i32_0 : i32, i32, i32
  }
  func.func @transform_5(%arg0: i32) -> (i32, i32, i32) {
    %c0_i32 = arith.constant 0 : i32
    %c0_i32_0 = arith.constant 0 : i32
    %c0_i32_1 = arith.constant 0 : i32
    return %arg0, %c0_i32, %c0_i32_0 : i32, i32, i32
  }
  func.func @transform_6(%arg0: i32) -> (i32, i32) {
    %c0_i32 = arith.constant 0 : i32
    %c0_i32_0 = arith.constant 0 : i32
    %c0_i32_1 = arith.constant 0 : i32
    return %c0_i32, %c0_i32_0 : i32, i32
  }
  func.func @transform_7(%arg0: i32) -> (i32, i32) {
    %c0_i32 = arith.constant 0 : i32
    %c0_i32_0 = arith.constant 0 : i32
    %c0_i32_1 = arith.constant 0 : i32
    return %c0_i32, %c0_i32_0 : i32, i32
  }
  func.func @transform_8(%arg0: i32) -> (i32, i32) {
    %c0_i32 = arith.constant 0 : i32
    %c0_i32_0 = arith.constant 0 : i32
    %c0_i32_1 = arith.constant 0 : i32
    return %c0_i32, %c0_i32_0 : i32, i32
  }
  func.func @transform_9(%arg0: i32) -> (i32, i32) {
    %c0_i32 = arith.constant 0 : i32
    %c0_i32_0 = arith.constant 0 : i32
    %c0_i32_1 = arith.constant 0 : i32
    return %c0_i32, %c0_i32_0 : i32, i32
  }
  func.func @transform_10(%arg0: i32) -> (i32, i32, i32) {
    %c0_i32 = arith.constant 0 : i32
    %c0_i32_0 = arith.constant 0 : i32
    %c0_i32_1 = arith.constant 0 : i32
    return %arg0, %c0_i32, %c0_i32_0 : i32, i32, i32
  }
  func.func @transform_11(%arg0: i32) -> (i32, i32, i32) {
    %c0_i32 = arith.constant 0 : i32
    %c0_i32_0 = arith.constant 0 : i32
    %c0_i32_1 = arith.constant 0 : i32
    return %arg0, %c0_i32, %c0_i32_0 : i32, i32, i32
  }
  func.func @transform_12(%arg0: i32) -> (i32, i32, i32) {
    %c0_i32 = arith.constant 0 : i32
    %c0_i32_0 = arith.constant 0 : i32
    %c0_i32_1 = arith.constant 0 : i32
    return %arg0, %c0_i32, %c0_i32_0 : i32, i32, i32
  }
}

module attributes {stable_mosaic.version = 11 : i64} {
  func.func @_fconv_layer_kernel(%arg0: i32, %arg1: memref<1x16x128xbf16, #tpu.memory_space<vmem>>, %arg2: memref<3x128x512xbf16, #tpu.memory_space<vmem>>, %arg3: memref<1x512xf32, #tpu.memory_space<vmem>>, %arg4: memref<128x256xbf16, #tpu.memory_space<vmem>>, %arg5: memref<1x256xf32, #tpu.memory_space<vmem>>, %arg6: memref<1x16x128xbf16, #tpu.memory_space<vmem>>, %arg7: memref<1x16x128xbf16, #tpu.memory_space<vmem>>, %arg8: memref<1x16x128xbf16, #tpu.memory_space<vmem>>, %arg9: memref<256x128xbf16, #tpu.memory_space<vmem>>, %arg10: memref<1x128xf32, #tpu.memory_space<vmem>>, %arg11: memref<128x256xbf16, #tpu.memory_space<vmem>>, %arg12: memref<1x256xf32, #tpu.memory_space<vmem>>, %arg13: memref<1x16x16xf32, #tpu.memory_space<vmem>>, %arg14: memref<1x16x256xbf16, #tpu.memory_space<vmem>>, %arg15: memref<1x16x16xf32, #tpu.memory_space<vmem>>) attributes {dimension_semantics = [#tpu.dimension_semantics<parallel>], iteration_bounds = array<i64: 2>, scalar_prefetch = 0 : i64, scratch_operands = 0 : i64, tpu.core_type = #tpu.core_type<tc>, window_params = [{transform_indices = @transform_0, window_bounds = array<i64: 1, 16, 128>}, {pipeline_mode = #tpu.pipeline_mode<synchronous>, transform_indices = @transform_1, window_bounds = array<i64: 3, 128, 512>}, {pipeline_mode = #tpu.pipeline_mode<synchronous>, transform_indices = @transform_2, window_bounds = array<i64: 1, 512>}, {pipeline_mode = #tpu.pipeline_mode<synchronous>, transform_indices = @transform_3, window_bounds = array<i64: 128, 256>}, {pipeline_mode = #tpu.pipeline_mode<synchronous>, transform_indices = @transform_4, window_bounds = array<i64: 1, 256>}, {transform_indices = @transform_5, window_bounds = array<i64: 1, 16, 128>}, {transform_indices = @transform_6, window_bounds = array<i64: 1, 16, 128>}, {transform_indices = @transform_7, window_bounds = array<i64: 1, 16, 128>}, {pipeline_mode = #tpu.pipeline_mode<synchronous>, transform_indices = @transform_8, window_bounds = array<i64: 256, 128>}, {pipeline_mode = #tpu.pipeline_mode<synchronous>, transform_indices = @transform_9, window_bounds = array<i64: 1, 128>}, {pipeline_mode = #tpu.pipeline_mode<synchronous>, transform_indices = @transform_10, window_bounds = array<i64: 128, 256>}, {pipeline_mode = #tpu.pipeline_mode<synchronous>, transform_indices = @transform_11, window_bounds = array<i64: 1, 256>}, {transform_indices = @transform_12, window_bounds = array<i64: 1, 16, 16>}, {transform_indices = @transform_13, window_bounds = array<i64: 1, 16, 256>}, {transform_indices = @transform_14, window_bounds = array<i64: 1, 16, 16>}]} {
    %c0 = arith.constant 0 : index
    %c0_0 = arith.constant 0 : index
    %c0_1 = arith.constant 0 : index
    %0 = vector.load %arg1[%c0, %c0_0, %c0_1] : memref<1x16x128xbf16, #tpu.memory_space<vmem>>, vector<1x16x128xbf16>
    %1 = vector.shape_cast %0 : vector<1x16x128xbf16> to vector<16x128xbf16>
    %c0_2 = arith.constant 0 : index
    %c0_3 = arith.constant 0 : index
    %2 = vector.load %arg4[%c0_2, %c0_3] : memref<128x256xbf16, #tpu.memory_space<vmem>>, vector<128x256xbf16>
    %cst = arith.constant dense<0.000000e+00> : vector<16x256xf32>
    %3 = tpu.matmul %1, %2, %cst {dimension_numbers = #tpu.dot_dimension_numbers<[1], [0], [0], [1], [0, 0, 1, 1], [], []>} : vector<16x128xbf16>, vector<128x256xbf16>, vector<16x256xf32> -> vector<16x256xf32>
    %c0_4 = arith.constant 0 : index
    %c0_5 = arith.constant 0 : index
    %4 = vector.load %arg5[%c0_4, %c0_5] : memref<1x256xf32, #tpu.memory_space<vmem>>, vector<1x256xf32>
    %5 = vector.broadcast %4 : vector<1x256xf32> to vector<16x256xf32>
    %6 = arith.addf %3, %5 : vector<16x256xf32>
    %c0_6 = arith.constant 0 : index
    %c0_7 = arith.constant 0 : index
    %7 = vector.load %arg3[%c0_6, %c0_7] : memref<1x512xf32, #tpu.memory_space<vmem>>, vector<1x512xf32>
    %cst_8 = arith.constant 0.000000e+00 : bf16
    %8 = vector.broadcast %cst_8 : bf16 to vector<1x2x128xbf16>
    %9 = tpu.concatenate %8, %0 in 1 : vector<1x2x128xbf16>, vector<1x16x128xbf16> -> vector<1x18x128xbf16>
    %10 = vector.extract_strided_slice %9 {offsets = [0, 0, 0], sizes = [1, 16, 128], strides = [1, 1, 1]} : vector<1x18x128xbf16> to vector<1x16x128xbf16>
    %11 = vector.shape_cast %10 : vector<1x16x128xbf16> to vector<16x128xbf16>
    %c0_9 = arith.constant 0 : index
    %c0_10 = arith.constant 0 : index
    %c0_11 = arith.constant 0 : index
    %12 = vector.load %arg2[%c0_9, %c0_10, %c0_11] : memref<3x128x512xbf16, #tpu.memory_space<vmem>>, vector<1x128x512xbf16>
    %13 = vector.shape_cast %12 : vector<1x128x512xbf16> to vector<128x512xbf16>
    %cst_12 = arith.constant dense<0.000000e+00> : vector<16x512xf32>
    %14 = tpu.matmul %11, %13, %cst_12 {dimension_numbers = #tpu.dot_dimension_numbers<[1], [0], [0], [1], [0, 0, 1, 1], [], []>} : vector<16x128xbf16>, vector<128x512xbf16>, vector<16x512xf32> -> vector<16x512xf32>
    %15 = vector.broadcast %7 : vector<1x512xf32> to vector<16x512xf32>
    %16 = arith.addf %15, %14 : vector<16x512xf32>
    %17 = vector.extract_strided_slice %9 {offsets = [0, 1, 0], sizes = [1, 16, 128], strides = [1, 1, 1]} : vector<1x18x128xbf16> to vector<1x16x128xbf16>
    %18 = vector.shape_cast %17 : vector<1x16x128xbf16> to vector<16x128xbf16>
    %c1 = arith.constant 1 : index
    %c0_13 = arith.constant 0 : index
    %c0_14 = arith.constant 0 : index
    %19 = vector.load %arg2[%c1, %c0_13, %c0_14] : memref<3x128x512xbf16, #tpu.memory_space<vmem>>, vector<1x128x512xbf16>
    %20 = vector.shape_cast %19 : vector<1x128x512xbf16> to vector<128x512xbf16>
    %cst_15 = arith.constant dense<0.000000e+00> : vector<16x512xf32>
    %21 = tpu.matmul %18, %20, %cst_15 {dimension_numbers = #tpu.dot_dimension_numbers<[1], [0], [0], [1], [0, 0, 1, 1], [], []>} : vector<16x128xbf16>, vector<128x512xbf16>, vector<16x512xf32> -> vector<16x512xf32>
    %22 = arith.addf %16, %21 : vector<16x512xf32>
    %23 = vector.extract_strided_slice %9 {offsets = [0, 2, 0], sizes = [1, 16, 128], strides = [1, 1, 1]} : vector<1x18x128xbf16> to vector<1x16x128xbf16>
    %24 = vector.shape_cast %23 : vector<1x16x128xbf16> to vector<16x128xbf16>
    %c2 = arith.constant 2 : index
    %c0_16 = arith.constant 0 : index
    %c0_17 = arith.constant 0 : index
    %25 = vector.load %arg2[%c2, %c0_16, %c0_17] : memref<3x128x512xbf16, #tpu.memory_space<vmem>>, vector<1x128x512xbf16>
    %26 = vector.shape_cast %25 : vector<1x128x512xbf16> to vector<128x512xbf16>
    %cst_18 = arith.constant dense<0.000000e+00> : vector<16x512xf32>
    %27 = tpu.matmul %24, %26, %cst_18 {dimension_numbers = #tpu.dot_dimension_numbers<[1], [0], [0], [1], [0, 0, 1, 1], [], []>} : vector<16x128xbf16>, vector<128x512xbf16>, vector<16x512xf32> -> vector<16x512xf32>
    %28 = arith.addf %22, %27 : vector<16x512xf32>
    %29 = vector.extract_strided_slice %28 {offsets = [0, 0], sizes = [16, 256], strides = [1, 1]} : vector<16x512xf32> to vector<16x256xf32>
    %30 = vector.extract_strided_slice %28 {offsets = [0, 256], sizes = [16, 256], strides = [1, 1]} : vector<16x512xf32> to vector<16x256xf32>
    %31 = arith.negf %30 : vector<16x256xf32>
    %32 = math.exp %31 : vector<16x256xf32>
    %cst_19 = arith.constant 1.000000e+00 : f32
    %33 = vector.broadcast %cst_19 : f32 to vector<16x256xf32>
    %34 = arith.addf %33, %32 : vector<16x256xf32>
    %35 = arith.divf %33, %34 : vector<16x256xf32>
    %36 = arith.mulf %29, %35 : vector<16x256xf32>
    %c0_20 = arith.constant 0 : index
    %c0_21 = arith.constant 0 : index
    %37 = vector.load %arg9[%c0_20, %c0_21] : memref<256x128xbf16, #tpu.memory_space<vmem>>, vector<256x128xbf16>
    %38 = arith.truncf %36 : vector<16x256xf32> to vector<16x256xbf16>
    %cst_22 = arith.constant dense<0.000000e+00> : vector<16x128xf32>
    %39 = tpu.matmul %38, %37, %cst_22 {dimension_numbers = #tpu.dot_dimension_numbers<[1], [0], [0], [1], [0, 0, 1, 1], [], []>} : vector<16x256xbf16>, vector<256x128xbf16>, vector<16x128xf32> -> vector<16x128xf32>
    %c0_23 = arith.constant 0 : index
    %c0_24 = arith.constant 0 : index
    %40 = vector.load %arg10[%c0_23, %c0_24] : memref<1x128xf32, #tpu.memory_space<vmem>>, vector<1x128xf32>
    %41 = vector.broadcast %40 : vector<1x128xf32> to vector<16x128xf32>
    %42 = arith.addf %39, %41 : vector<16x128xf32>
    %43 = vector.shape_cast %42 : vector<16x128xf32> to vector<1x16x128xf32>
    %c0_25 = arith.constant 0 : index
    %c0_26 = arith.constant 0 : index
    %c0_27 = arith.constant 0 : index
    %44 = vector.load %arg6[%c0_25, %c0_26, %c0_27] : memref<1x16x128xbf16, #tpu.memory_space<vmem>>, vector<1x16x128xbf16>
    %45 = arith.extf %44 : vector<1x16x128xbf16> to vector<1x16x128xf32>
    %46 = arith.addf %43, %45 : vector<1x16x128xf32>
    %cst_28 = arith.constant 0.0883883461 : f32
    %47 = vector.broadcast %cst_28 : f32 to vector<1x16x128xf32>
    %48 = arith.mulf %46, %47 : vector<1x16x128xf32>
    %c0_29 = arith.constant 0 : index
    %c0_30 = arith.constant 0 : index
    %c0_31 = arith.constant 0 : index
    %49 = vector.load %arg7[%c0_29, %c0_30, %c0_31] : memref<1x16x128xbf16, #tpu.memory_space<vmem>>, vector<1x16x128xbf16>
    %c0_32 = arith.constant 0 : index
    %c0_33 = arith.constant 0 : index
    %c0_34 = arith.constant 0 : index
    %50 = vector.load %arg8[%c0_32, %c0_33, %c0_34] : memref<1x16x128xbf16, #tpu.memory_space<vmem>>, vector<1x16x128xbf16>
    %51 = arith.truncf %48 : vector<1x16x128xf32> to vector<1x16x128xbf16>
    "tpu.trace_start"() <{level = 10 : i32, message = "bte,bse->bts"}> : () -> ()
    %cst_35 = arith.constant dense<0.000000e+00> : vector<1x16x16xf32>
    %52 = tpu.matmul %51, %49, %cst_35 {dimension_numbers = #tpu.dot_dimension_numbers<[2], [2], [1], [1], [0, 0, 0, 1, 1, 1], [0], [0]>} : vector<1x16x128xbf16>, vector<1x16x128xbf16>, vector<1x16x16xf32> -> vector<1x16x16xf32>
    "tpu.trace_stop"() : () -> ()
    %cst_36 = arith.constant dense<0xFF800000> : vector<1x16xf32>
    %53 = vector.multi_reduction <maximumf>, %52, %cst_36 [2] : vector<1x16x16xf32> to vector<1x16xf32>
    %54 = vector.shape_cast %53 : vector<1x16xf32> to vector<1x16x1xf32>
    %55 = vector.broadcast %54 : vector<1x16x1xf32> to vector<1x16x16xf32>
    %56 = arith.subf %52, %55 : vector<1x16x16xf32>
    %57 = math.exp %56 : vector<1x16x16xf32>
    %cst_37 = arith.constant dense<0.000000e+00> : vector<1x16xf32>
    %58 = vector.multi_reduction <add>, %57, %cst_37 [2] : vector<1x16x16xf32> to vector<1x16xf32>
    %59 = vector.shape_cast %58 : vector<1x16xf32> to vector<1x16x1xf32>
    %60 = tpu.reciprocal %59 {approx = true} : vector<1x16x1xf32> -> vector<1x16x1xf32>
    %61 = vector.broadcast %60 : vector<1x16x1xf32> to vector<1x16x16xf32>
    %62 = arith.mulf %57, %61 : vector<1x16x16xf32>
    %63 = arith.truncf %62 : vector<1x16x16xf32> to vector<1x16x16xbf16>
    "tpu.trace_start"() <{level = 10 : i32, message = "bts,bse->bte"}> : () -> ()
    %cst_38 = arith.constant dense<0.000000e+00> : vector<1x16x128xf32>
    %64 = tpu.matmul %63, %50, %cst_38 {dimension_numbers = #tpu.dot_dimension_numbers<[2], [1], [1], [2], [0, 0, 0, 1, 1, 2], [0], [0]>} : vector<1x16x16xbf16>, vector<1x16x128xbf16>, vector<1x16x128xf32> -> vector<1x16x128xf32>
    "tpu.trace_stop"() : () -> ()
    %65 = vector.shape_cast %64 : vector<1x16x128xf32> to vector<16x128xf32>
    %c0_39 = arith.constant 0 : index
    %c0_40 = arith.constant 0 : index
    %66 = vector.load %arg11[%c0_39, %c0_40] : memref<128x256xbf16, #tpu.memory_space<vmem>>, vector<128x256xbf16>
    %67 = arith.truncf %65 : vector<16x128xf32> to vector<16x128xbf16>
    %cst_41 = arith.constant dense<0.000000e+00> : vector<16x256xf32>
    %68 = tpu.matmul %67, %66, %cst_41 {dimension_numbers = #tpu.dot_dimension_numbers<[1], [0], [0], [1], [0, 0, 1, 1], [], []>} : vector<16x128xbf16>, vector<128x256xbf16>, vector<16x256xf32> -> vector<16x256xf32>
    %c0_42 = arith.constant 0 : index
    %c0_43 = arith.constant 0 : index
    %69 = vector.load %arg12[%c0_42, %c0_43] : memref<1x256xf32, #tpu.memory_space<vmem>>, vector<1x256xf32>
    %70 = vector.broadcast %69 : vector<1x256xf32> to vector<16x256xf32>
    %71 = arith.addf %68, %70 : vector<16x256xf32>
    %72 = arith.addf %71, %36 : vector<16x256xf32>
    %c0_44 = arith.constant 0 : index
    %c0_45 = arith.constant 0 : index
    %c0_46 = arith.constant 0 : index
    %73 = vector.load %arg13[%c0_44, %c0_45, %c0_46] : memref<1x16x16xf32, #tpu.memory_space<vmem>>, vector<1x16x16xf32>
    %74 = arith.addf %73, %62 : vector<1x16x16xf32>
    %c0_47 = arith.constant 0 : index
    %c0_48 = arith.constant 0 : index
    %c0_49 = arith.constant 0 : index
    %75 = vector.load %arg15[%c0_47, %c0_48, %c0_49] : memref<1x16x16xf32, #tpu.memory_space<vmem>>, vector<1x16x16xf32>
    tpu.vector_store %arg15[%c0_47, %c0_48, %c0_49], %74 {strides = array<i32>} : memref<1x16x16xf32, #tpu.memory_space<vmem>>, vector<1x16x16xf32>,
    %76 = arith.addf %72, %6 : vector<16x256xf32>
    %cst_50 = arith.constant 0.707106769 : f32
    %77 = vector.broadcast %cst_50 : f32 to vector<16x256xf32>
    %78 = arith.mulf %76, %77 : vector<16x256xf32>
    %79 = vector.shape_cast %78 : vector<16x256xf32> to vector<1x16x256xf32>
    %80 = arith.truncf %79 : vector<1x16x256xf32> to vector<1x16x256xbf16>
    %c0_51 = arith.constant 0 : index
    %c0_52 = arith.constant 0 : index
    %c0_53 = arith.constant 0 : index
    %81 = vector.load %arg14[%c0_51, %c0_52, %c0_53] : memref<1x16x256xbf16, #tpu.memory_space<vmem>>, vector<1x16x256xbf16>
    tpu.vector_store %arg14[%c0_51, %c0_52, %c0_53], %80 {strides = array<i32>} : memref<1x16x256xbf16, #tpu.memory_space<vmem>>, vector<1x16x256xbf16>,
    return
  }
  func.func @transform_0(%arg0: i32) -> (i32, i32, i32) {
    %c0_i32 = arith.constant 0 : i32
    %c0_i32_0 = arith.constant 0 : i32
    %c0_i32_1 = arith.constant 0 : i32
    return %arg0, %c0_i32, %c0_i32_0 : i32, i32, i32
  }
  func.func @transform_1(%arg0: i32) -> (i32, i32, i32) {
    %c0_i32 = arith.constant 0 : i32
    %c0_i32_0 = arith.constant 0 : i32
    %c0_i32_1 = arith.constant 0 : i32
    %c0_i32_2 = arith.constant 0 : i32
    return %c0_i32, %c0_i32_0, %c0_i32_1 : i32, i32, i32
  }
  func.func @transform_2(%arg0: i32) -> (i32, i32) {
    %c0_i32 = arith.constant 0 : i32
    %c0_i32_0 = arith.constant 0 : i32
    %c0_i32_1 = arith.constant 0 : i32
    return %c0_i32, %c0_i32_0 : i32, i32
  }
  func.func @transform_3(%arg0: i32) -> (i32, i32) {
    %c0_i32 = arith.constant 0 : i32
    %c0_i32_0 = arith.constant 0 : i32
    %c0_i32_1 = arith.constant 0 : i32
    return %c0_i32, %c0_i32_0 : i32, i32
  }
  func.func @transform_4(%arg0: i32) -> (i32, i32) {
    %c0_i32 = arith.constant 0 : i32
    %c0_i32_0 = arith.constant 0 : i32
    %c0_i32_1 = arith.constant 0 : i32
    return %c0_i32, %c0_i32_0 : i32, i32
  }
  func.func @transform_5(%arg0: i32) -> (i32, i32, i32) {
    %c0_i32 = arith.constant 0 : i32
    %c0_i32_0 = arith.constant 0 : i32
    %c0_i32_1 = arith.constant 0 : i32
    return %arg0, %c0_i32, %c0_i32_0 : i32, i32, i32
  }
  func.func @transform_6(%arg0: i32) -> (i32, i32, i32) {
    %c0_i32 = arith.constant 0 : i32
    %c0_i32_0 = arith.constant 0 : i32
    %c0_i32_1 = arith.constant 0 : i32
    return %arg0, %c0_i32, %c0_i32_0 : i32, i32, i32
  }
  func.func @transform_7(%arg0: i32) -> (i32, i32, i32) {
    %c0_i32 = arith.constant 0 : i32
    %c0_i32_0 = arith.constant 0 : i32
    %c0_i32_1 = arith.constant 0 : i32
    return %arg0, %c0_i32, %c0_i32_0 : i32, i32, i32
  }
  func.func @transform_8(%arg0: i32) -> (i32, i32) {
    %c0_i32 = arith.constant 0 : i32
    %c0_i32_0 = arith.constant 0 : i32
    %c0_i32_1 = arith.constant 0 : i32
    return %c0_i32, %c0_i32_0 : i32, i32
  }
  func.func @transform_9(%arg0: i32) -> (i32, i32) {
    %c0_i32 = arith.constant 0 : i32
    %c0_i32_0 = arith.constant 0 : i32
    %c0_i32_1 = arith.constant 0 : i32
    return %c0_i32, %c0_i32_0 : i32, i32
  }
  func.func @transform_10(%arg0: i32) -> (i32, i32) {
    %c0_i32 = arith.constant 0 : i32
    %c0_i32_0 = arith.constant 0 : i32
    %c0_i32_1 = arith.constant 0 : i32
    return %c0_i32, %c0_i32_0 : i32, i32
  }
  func.func @transform_11(%arg0: i32) -> (i32, i32) {
    %c0_i32 = arith.constant 0 : i32
    %c0_i32_0 = arith.constant 0 : i32
    %c0_i32_1 = arith.constant 0 : i32
    return %c0_i32, %c0_i32_0 : i32, i32
  }
  func.func @transform_12(%arg0: i32) -> (i32, i32, i32) {
    %c0_i32 = arith.constant 0 : i32
    %c0_i32_0 = arith.constant 0 : i32
    %c0_i32_1 = arith.constant 0 : i32
    return %arg0, %c0_i32, %c0_i32_0 : i32, i32, i32
  }
  func.func @transform_13(%arg0: i32) -> (i32, i32, i32) {
    %c0_i32 = arith.constant 0 : i32
    %c0_i32_0 = arith.constant 0 : i32
    %c0_i32_1 = arith.constant 0 : i32
    return %arg0, %c0_i32, %c0_i32_0 : i32, i32, i32
  }
  func.func @transform_14(%arg0: i32) -> (i32, i32, i32) {
    %c0_i32 = arith.constant 0 : i32
    %c0_i32_0 = arith.constant 0 : i32
    %c0_i32_1 = arith.constant 0 : i32
    return %arg0, %c0_i32, %c0_i32_0 : i32, i32, i32
  }
}

module attributes {stable_mosaic.version = 11 : i64} {
  func.func @_fconv_layer_kernel(%arg0: i32, %arg1: memref<1x16x256xbf16, #tpu.memory_space<vmem>>, %arg2: memref<3x256x512xbf16, #tpu.memory_space<vmem>>, %arg3: memref<1x512xf32, #tpu.memory_space<vmem>>, %arg4: memref<1x16x128xbf16, #tpu.memory_space<vmem>>, %arg5: memref<1x16x128xbf16, #tpu.memory_space<vmem>>, %arg6: memref<1x16x128xbf16, #tpu.memory_space<vmem>>, %arg7: memref<256x128xbf16, #tpu.memory_space<vmem>>, %arg8: memref<1x128xf32, #tpu.memory_space<vmem>>, %arg9: memref<128x256xbf16, #tpu.memory_space<vmem>>, %arg10: memref<1x256xf32, #tpu.memory_space<vmem>>, %arg11: memref<1x16x16xf32, #tpu.memory_space<vmem>>, %arg12: memref<1x16x256xbf16, #tpu.memory_space<vmem>>, %arg13: memref<1x16x16xf32, #tpu.memory_space<vmem>>) attributes {dimension_semantics = [#tpu.dimension_semantics<parallel>], iteration_bounds = array<i64: 2>, scalar_prefetch = 0 : i64, scratch_operands = 0 : i64, tpu.core_type = #tpu.core_type<tc>, window_params = [{transform_indices = @transform_0, window_bounds = array<i64: 1, 16, 256>}, {pipeline_mode = #tpu.pipeline_mode<synchronous>, transform_indices = @transform_1, window_bounds = array<i64: 3, 256, 512>}, {pipeline_mode = #tpu.pipeline_mode<synchronous>, transform_indices = @transform_2, window_bounds = array<i64: 1, 512>}, {transform_indices = @transform_3, window_bounds = array<i64: 1, 16, 128>}, {transform_indices = @transform_4, window_bounds = array<i64: 1, 16, 128>}, {transform_indices = @transform_5, window_bounds = array<i64: 1, 16, 128>}, {pipeline_mode = #tpu.pipeline_mode<synchronous>, transform_indices = @transform_6, window_bounds = array<i64: 256, 128>}, {pipeline_mode = #tpu.pipeline_mode<synchronous>, transform_indices = @transform_7, window_bounds = array<i64: 1, 128>}, {pipeline_mode = #tpu.pipeline_mode<synchronous>, transform_indices = @transform_8, window_bounds = array<i64: 128, 256>}, {pipeline_mode = #tpu.pipeline_mode<synchronous>, transform_indices = @transform_9, window_bounds = array<i64: 1, 256>}, {transform_indices = @transform_10, window_bounds = array<i64: 1, 16, 16>}, {transform_indices = @transform_11, window_bounds = array<i64: 1, 16, 256>}, {transform_indices = @transform_12, window_bounds = array<i64: 1, 16, 16>}]} {
    %c0 = arith.constant 0 : index
    %c0_0 = arith.constant 0 : index
    %c0_1 = arith.constant 0 : index
    %0 = vector.load %arg1[%c0, %c0_0, %c0_1] : memref<1x16x256xbf16, #tpu.memory_space<vmem>>, vector<1x16x256xbf16>
    %1 = vector.shape_cast %0 : vector<1x16x256xbf16> to vector<16x256xbf16>
    %2 = arith.extf %1 : vector<16x256xbf16> to vector<16x256xf32>
    %c0_2 = arith.constant 0 : index
    %c0_3 = arith.constant 0 : index
    %3 = vector.load %arg3[%c0_2, %c0_3] : memref<1x512xf32, #tpu.memory_space<vmem>>, vector<1x512xf32>
    %cst = arith.constant 0.000000e+00 : bf16
    %4 = vector.broadcast %cst : bf16 to vector<1x2x256xbf16>
    %5 = tpu.concatenate %4, %0 in 1 : vector<1x2x256xbf16>, vector<1x16x256xbf16> -> vector<1x18x256xbf16>
    %6 = vector.extract_strided_slice %5 {offsets = [0, 0, 0], sizes = [1, 16, 256], strides = [1, 1, 1]} : vector<1x18x256xbf16> to vector<1x16x256xbf16>
    %7 = vector.shape_cast %6 : vector<1x16x256xbf16> to vector<16x256xbf16>
    %c0_4 = arith.constant 0 : index
    %c0_5 = arith.constant 0 : index
    %c0_6 = arith.constant 0 : index
    %8 = vector.load %arg2[%c0_4, %c0_5, %c0_6] : memref<3x256x512xbf16, #tpu.memory_space<vmem>>, vector<1x256x512xbf16>
    %9 = vector.shape_cast %8 : vector<1x256x512xbf16> to vector<256x512xbf16>
    %cst_7 = arith.constant dense<0.000000e+00> : vector<16x512xf32>
    %10 = tpu.matmul %7, %9, %cst_7 {dimension_numbers = #tpu.dot_dimension_numbers<[1], [0], [0], [1], [0, 0, 1, 1], [], []>} : vector<16x256xbf16>, vector<256x512xbf16>, vector<16x512xf32> -> vector<16x512xf32>
    %11 = vector.broadcast %3 : vector<1x512xf32> to vector<16x512xf32>
    %12 = arith.addf %11, %10 : vector<16x512xf32>
    %13 = vector.extract_strided_slice %5 {offsets = [0, 1, 0], sizes = [1, 16, 256], strides = [1, 1, 1]} : vector<1x18x256xbf16> to vector<1x16x256xbf16>
    %14 = vector.shape_cast %13 : vector<1x16x256xbf16> to vector<16x256xbf16>
    %c1 = arith.constant 1 : index
    %c0_8 = arith.constant 0 : index
    %c0_9 = arith.constant 0 : index
    %15 = vector.load %arg2[%c1, %c0_8, %c0_9] : memref<3x256x512xbf16, #tpu.memory_space<vmem>>, vector<1x256x512xbf16>
    %16 = vector.shape_cast %15 : vector<1x256x512xbf16> to vector<256x512xbf16>
    %cst_10 = arith.constant dense<0.000000e+00> : vector<16x512xf32>
    %17 = tpu.matmul %14, %16, %cst_10 {dimension_numbers = #tpu.dot_dimension_numbers<[1], [0], [0], [1], [0, 0, 1, 1], [], []>} : vector<16x256xbf16>, vector<256x512xbf16>, vector<16x512xf32> -> vector<16x512xf32>
    %18 = arith.addf %12, %17 : vector<16x512xf32>
    %19 = vector.extract_strided_slice %5 {offsets = [0, 2, 0], sizes = [1, 16, 256], strides = [1, 1, 1]} : vector<1x18x256xbf16> to vector<1x16x256xbf16>
    %20 = vector.shape_cast %19 : vector<1x16x256xbf16> to vector<16x256xbf16>
    %c2 = arith.constant 2 : index
    %c0_11 = arith.constant 0 : index
    %c0_12 = arith.constant 0 : index
    %21 = vector.load %arg2[%c2, %c0_11, %c0_12] : memref<3x256x512xbf16, #tpu.memory_space<vmem>>, vector<1x256x512xbf16>
    %22 = vector.shape_cast %21 : vector<1x256x512xbf16> to vector<256x512xbf16>
    %cst_13 = arith.constant dense<0.000000e+00> : vector<16x512xf32>
    %23 = tpu.matmul %20, %22, %cst_13 {dimension_numbers = #tpu.dot_dimension_numbers<[1], [0], [0], [1], [0, 0, 1, 1], [], []>} : vector<16x256xbf16>, vector<256x512xbf16>, vector<16x512xf32> -> vector<16x512xf32>
    %24 = arith.addf %18, %23 : vector<16x512xf32>
    %25 = vector.extract_strided_slice %24 {offsets = [0, 0], sizes = [16, 256], strides = [1, 1]} : vector<16x512xf32> to vector<16x256xf32>
    %26 = vector.extract_strided_slice %24 {offsets = [0, 256], sizes = [16, 256], strides = [1, 1]} : vector<16x512xf32> to vector<16x256xf32>
    %27 = arith.negf %26 : vector<16x256xf32>
    %28 = math.exp %27 : vector<16x256xf32>
    %cst_14 = arith.constant 1.000000e+00 : f32
    %29 = vector.broadcast %cst_14 : f32 to vector<16x256xf32>
    %30 = arith.addf %29, %28 : vector<16x256xf32>
    %31 = arith.divf %29, %30 : vector<16x256xf32>
    %32 = arith.mulf %25, %31 : vector<16x256xf32>
    %c0_15 = arith.constant 0 : index
    %c0_16 = arith.constant 0 : index
    %33 = vector.load %arg7[%c0_15, %c0_16] : memref<256x128xbf16, #tpu.memory_space<vmem>>, vector<256x128xbf16>
    %34 = arith.truncf %32 : vector<16x256xf32> to vector<16x256xbf16>
    %cst_17 = arith.constant dense<0.000000e+00> : vector<16x128xf32>
    %35 = tpu.matmul %34, %33, %cst_17 {dimension_numbers = #tpu.dot_dimension_numbers<[1], [0], [0], [1], [0, 0, 1, 1], [], []>} : vector<16x256xbf16>, vector<256x128xbf16>, vector<16x128xf32> -> vector<16x128xf32>
    %c0_18 = arith.constant 0 : index
    %c0_19 = arith.constant 0 : index
    %36 = vector.load %arg8[%c0_18, %c0_19] : memref<1x128xf32, #tpu.memory_space<vmem>>, vector<1x128xf32>
    %37 = vector.broadcast %36 : vector<1x128xf32> to vector<16x128xf32>
    %38 = arith.addf %35, %37 : vector<16x128xf32>
    %39 = vector.shape_cast %38 : vector<16x128xf32> to vector<1x16x128xf32>
    %c0_20 = arith.constant 0 : index
    %c0_21 = arith.constant 0 : index
    %c0_22 = arith.constant 0 : index
    %40 = vector.load %arg4[%c0_20, %c0_21, %c0_22] : memref<1x16x128xbf16, #tpu.memory_space<vmem>>, vector<1x16x128xbf16>
    %41 = arith.extf %40 : vector<1x16x128xbf16> to vector<1x16x128xf32>
    %42 = arith.addf %39, %41 : vector<1x16x128xf32>
    %cst_23 = arith.constant 0.0883883461 : f32
    %43 = vector.broadcast %cst_23 : f32 to vector<1x16x128xf32>
    %44 = arith.mulf %42, %43 : vector<1x16x128xf32>
    %c0_24 = arith.constant 0 : index
    %c0_25 = arith.constant 0 : index
    %c0_26 = arith.constant 0 : index
    %45 = vector.load %arg5[%c0_24, %c0_25, %c0_26] : memref<1x16x128xbf16, #tpu.memory_space<vmem>>, vector<1x16x128xbf16>
    %c0_27 = arith.constant 0 : index
    %c0_28 = arith.constant 0 : index
    %c0_29 = arith.constant 0 : index
    %46 = vector.load %arg6[%c0_27, %c0_28, %c0_29] : memref<1x16x128xbf16, #tpu.memory_space<vmem>>, vector<1x16x128xbf16>
    %47 = arith.truncf %44 : vector<1x16x128xf32> to vector<1x16x128xbf16>
    "tpu.trace_start"() <{level = 10 : i32, message = "bte,bse->bts"}> : () -> ()
    %cst_30 = arith.constant dense<0.000000e+00> : vector<1x16x16xf32>
    %48 = tpu.matmul %47, %45, %cst_30 {dimension_numbers = #tpu.dot_dimension_numbers<[2], [2], [1], [1], [0, 0, 0, 1, 1, 1], [0], [0]>} : vector<1x16x128xbf16>, vector<1x16x128xbf16>, vector<1x16x16xf32> -> vector<1x16x16xf32>
    "tpu.trace_stop"() : () -> ()
    %cst_31 = arith.constant dense<0xFF800000> : vector<1x16xf32>
    %49 = vector.multi_reduction <maximumf>, %48, %cst_31 [2] : vector<1x16x16xf32> to vector<1x16xf32>
    %50 = vector.shape_cast %49 : vector<1x16xf32> to vector<1x16x1xf32>
    %51 = vector.broadcast %50 : vector<1x16x1xf32> to vector<1x16x16xf32>
    %52 = arith.subf %48, %51 : vector<1x16x16xf32>
    %53 = math.exp %52 : vector<1x16x16xf32>
    %cst_32 = arith.constant dense<0.000000e+00> : vector<1x16xf32>
    %54 = vector.multi_reduction <add>, %53, %cst_32 [2] : vector<1x16x16xf32> to vector<1x16xf32>
    %55 = vector.shape_cast %54 : vector<1x16xf32> to vector<1x16x1xf32>
    %56 = tpu.reciprocal %55 {approx = true} : vector<1x16x1xf32> -> vector<1x16x1xf32>
    %57 = vector.broadcast %56 : vector<1x16x1xf32> to vector<1x16x16xf32>
    %58 = arith.mulf %53, %57 : vector<1x16x16xf32>
    %59 = arith.truncf %58 : vector<1x16x16xf32> to vector<1x16x16xbf16>
    "tpu.trace_start"() <{level = 10 : i32, message = "bts,bse->bte"}> : () -> ()
    %cst_33 = arith.constant dense<0.000000e+00> : vector<1x16x128xf32>
    %60 = tpu.matmul %59, %46, %cst_33 {dimension_numbers = #tpu.dot_dimension_numbers<[2], [1], [1], [2], [0, 0, 0, 1, 1, 2], [0], [0]>} : vector<1x16x16xbf16>, vector<1x16x128xbf16>, vector<1x16x128xf32> -> vector<1x16x128xf32>
    "tpu.trace_stop"() : () -> ()
    %61 = vector.shape_cast %60 : vector<1x16x128xf32> to vector<16x128xf32>
    %c0_34 = arith.constant 0 : index
    %c0_35 = arith.constant 0 : index
    %62 = vector.load %arg9[%c0_34, %c0_35] : memref<128x256xbf16, #tpu.memory_space<vmem>>, vector<128x256xbf16>
    %63 = arith.truncf %61 : vector<16x128xf32> to vector<16x128xbf16>
    %cst_36 = arith.constant dense<0.000000e+00> : vector<16x256xf32>
    %64 = tpu.matmul %63, %62, %cst_36 {dimension_numbers = #tpu.dot_dimension_numbers<[1], [0], [0], [1], [0, 0, 1, 1], [], []>} : vector<16x128xbf16>, vector<128x256xbf16>, vector<16x256xf32> -> vector<16x256xf32>
    %c0_37 = arith.constant 0 : index
    %c0_38 = arith.constant 0 : index
    %65 = vector.load %arg10[%c0_37, %c0_38] : memref<1x256xf32, #tpu.memory_space<vmem>>, vector<1x256xf32>
    %66 = vector.broadcast %65 : vector<1x256xf32> to vector<16x256xf32>
    %67 = arith.addf %64, %66 : vector<16x256xf32>
    %68 = arith.addf %67, %32 : vector<16x256xf32>
    %c0_39 = arith.constant 0 : index
    %c0_40 = arith.constant 0 : index
    %c0_41 = arith.constant 0 : index
    %69 = vector.load %arg11[%c0_39, %c0_40, %c0_41] : memref<1x16x16xf32, #tpu.memory_space<vmem>>, vector<1x16x16xf32>
    %70 = arith.addf %69, %58 : vector<1x16x16xf32>
    %c0_42 = arith.constant 0 : index
    %c0_43 = arith.constant 0 : index
    %c0_44 = arith.constant 0 : index
    %71 = vector.load %arg13[%c0_42, %c0_43, %c0_44] : memref<1x16x16xf32, #tpu.memory_space<vmem>>, vector<1x16x16xf32>
    tpu.vector_store %arg13[%c0_42, %c0_43, %c0_44], %70 {strides = array<i32>} : memref<1x16x16xf32, #tpu.memory_space<vmem>>, vector<1x16x16xf32>,
    %72 = arith.addf %68, %2 : vector<16x256xf32>
    %cst_45 = arith.constant 0.707106769 : f32
    %73 = vector.broadcast %cst_45 : f32 to vector<16x256xf32>
    %74 = arith.mulf %72, %73 : vector<16x256xf32>
    %75 = vector.shape_cast %74 : vector<16x256xf32> to vector<1x16x256xf32>
    %76 = arith.truncf %75 : vector<1x16x256xf32> to vector<1x16x256xbf16>
    %c0_46 = arith.constant 0 : index
    %c0_47 = arith.constant 0 : index
    %c0_48 = arith.constant 0 : index
    %77 = vector.load %arg12[%c0_46, %c0_47, %c0_48] : memref<1x16x256xbf16, #tpu.memory_space<vmem>>, vector<1x16x256xbf16>
    tpu.vector_store %arg12[%c0_46, %c0_47, %c0_48], %76 {strides = array<i32>} : memref<1x16x256xbf16, #tpu.memory_space<vmem>>, vector<1x16x256xbf16>,
    return
  }
  func.func @transform_0(%arg0: i32) -> (i32, i32, i32) {
    %c0_i32 = arith.constant 0 : i32
    %c0_i32_0 = arith.constant 0 : i32
    %c0_i32_1 = arith.constant 0 : i32
    return %arg0, %c0_i32, %c0_i32_0 : i32, i32, i32
  }
  func.func @transform_1(%arg0: i32) -> (i32, i32, i32) {
    %c0_i32 = arith.constant 0 : i32
    %c0_i32_0 = arith.constant 0 : i32
    %c0_i32_1 = arith.constant 0 : i32
    %c0_i32_2 = arith.constant 0 : i32
    return %c0_i32, %c0_i32_0, %c0_i32_1 : i32, i32, i32
  }
  func.func @transform_2(%arg0: i32) -> (i32, i32) {
    %c0_i32 = arith.constant 0 : i32
    %c0_i32_0 = arith.constant 0 : i32
    %c0_i32_1 = arith.constant 0 : i32
    return %c0_i32, %c0_i32_0 : i32, i32
  }
  func.func @transform_3(%arg0: i32) -> (i32, i32, i32) {
    %c0_i32 = arith.constant 0 : i32
    %c0_i32_0 = arith.constant 0 : i32
    %c0_i32_1 = arith.constant 0 : i32
    return %arg0, %c0_i32, %c0_i32_0 : i32, i32, i32
  }
  func.func @transform_4(%arg0: i32) -> (i32, i32, i32) {
    %c0_i32 = arith.constant 0 : i32
    %c0_i32_0 = arith.constant 0 : i32
    %c0_i32_1 = arith.constant 0 : i32
    return %arg0, %c0_i32, %c0_i32_0 : i32, i32, i32
  }
  func.func @transform_5(%arg0: i32) -> (i32, i32, i32) {
    %c0_i32 = arith.constant 0 : i32
    %c0_i32_0 = arith.constant 0 : i32
    %c0_i32_1 = arith.constant 0 : i32
    return %arg0, %c0_i32, %c0_i32_0 : i32, i32, i32
  }
  func.func @transform_6(%arg0: i32) -> (i32, i32) {
    %c0_i32 = arith.constant 0 : i32
    %c0_i32_0 = arith.constant 0 : i32
    %c0_i32_1 = arith.constant 0 : i32
    return %c0_i32, %c0_i32_0 : i32, i32
  }
  func.func @transform_7(%arg0: i32) -> (i32, i32) {
    %c0_i32 = arith.constant 0 : i32
    %c0_i32_0 = arith.constant 0 : i32
    %c0_i32_1 = arith.constant 0 : i32
    return %c0_i32, %c0_i32_0 : i32, i32
  }
  func.func @transform_8(%arg0: i32) -> (i32, i32) {
    %c0_i32 = arith.constant 0 : i32
    %c0_i32_0 = arith.constant 0 : i32
    %c0_i32_1 = arith.constant 0 : i32
    return %c0_i32, %c0_i32_0 : i32, i32
  }
  func.func @transform_9(%arg0: i32) -> (i32, i32) {
    %c0_i32 = arith.constant 0 : i32
    %c0_i32_0 = arith.constant 0 : i32
    %c0_i32_1 = arith.constant 0 : i32
    return %c0_i32, %c0_i32_0 : i32, i32
  }
  func.func @transform_10(%arg0: i32) -> (i32, i32, i32) {
    %c0_i32 = arith.constant 0 : i32
    %c0_i32_0 = arith.constant 0 : i32
    %c0_i32_1 = arith.constant 0 : i32
    return %arg0, %c0_i32, %c0_i32_0 : i32, i32, i32
  }
  func.func @transform_11(%arg0: i32) -> (i32, i32, i32) {
    %c0_i32 = arith.constant 0 : i32
    %c0_i32_0 = arith.constant 0 : i32
    %c0_i32_1 = arith.constant 0 : i32
    return %arg0, %c0_i32, %c0_i32_0 : i32, i32, i32
  }
  func.func @transform_12(%arg0: i32) -> (i32, i32, i32) {
    %c0_i32 = arith.constant 0 : i32
    %c0_i32_0 = arith.constant 0 : i32
    %c0_i32_1 = arith.constant 0 : i32
    return %arg0, %c0_i32, %c0_i32_0 : i32, i32, i32
  }
}

module attributes {stable_mosaic.version = 11 : i64} {
  func.func @_linear_kernel(%arg0: i32, %arg1: i32, %arg2: memref<32x256xbf16, #tpu.memory_space<vmem>>, %arg3: memref<256x128xbf16, #tpu.memory_space<vmem>>, %arg4: memref<1x128xf32, #tpu.memory_space<vmem>>, %arg5: memref<32x128xbf16, #tpu.memory_space<vmem>>) attributes {dimension_semantics = [#tpu.dimension_semantics<parallel>, #tpu.dimension_semantics<parallel>], iteration_bounds = array<i64: 1, 1>, scalar_prefetch = 0 : i64, scratch_operands = 0 : i64, tpu.core_type = #tpu.core_type<tc>, window_params = [{transform_indices = @transform_0, window_bounds = array<i64: 32, 256>}, {transform_indices = @transform_1, window_bounds = array<i64: 256, 128>}, {transform_indices = @transform_2, window_bounds = array<i64: 1, 128>}, {transform_indices = @transform_3, window_bounds = array<i64: 32, 128>}]} {
    %c0 = arith.constant 0 : index
    %c0_0 = arith.constant 0 : index
    %0 = vector.load %arg2[%c0, %c0_0] : memref<32x256xbf16, #tpu.memory_space<vmem>>, vector<32x256xbf16>
    %c0_1 = arith.constant 0 : index
    %c0_2 = arith.constant 0 : index
    %1 = vector.load %arg3[%c0_1, %c0_2] : memref<256x128xbf16, #tpu.memory_space<vmem>>, vector<256x128xbf16>
    %cst = arith.constant dense<0.000000e+00> : vector<32x128xf32>
    %2 = tpu.matmul %0, %1, %cst {dimension_numbers = #tpu.dot_dimension_numbers<[1], [0], [0], [1], [0, 0, 1, 1], [], []>} : vector<32x256xbf16>, vector<256x128xbf16>, vector<32x128xf32> -> vector<32x128xf32>
    %c0_3 = arith.constant 0 : index
    %c0_4 = arith.constant 0 : index
    %3 = vector.load %arg4[%c0_3, %c0_4] : memref<1x128xf32, #tpu.memory_space<vmem>>, vector<1x128xf32>
    %4 = vector.broadcast %3 : vector<1x128xf32> to vector<32x128xf32>
    %5 = arith.addf %2, %4 : vector<32x128xf32>
    %6 = arith.truncf %5 : vector<32x128xf32> to vector<32x128xbf16>
    %c0_5 = arith.constant 0 : index
    %c0_6 = arith.constant 0 : index
    %7 = vector.load %arg5[%c0_5, %c0_6] : memref<32x128xbf16, #tpu.memory_space<vmem>>, vector<32x128xbf16>
    tpu.vector_store %arg5[%c0_5, %c0_6], %6 {strides = array<i32>} : memref<32x128xbf16, #tpu.memory_space<vmem>>, vector<32x128xbf16>,
    return
  }
  func.func @transform_0(%arg0: i32, %arg1: i32) -> (i32, i32) {
    %c0_i32 = arith.constant 0 : i32
    %c0_i32_0 = arith.constant 0 : i32
    return %arg1, %c0_i32 : i32, i32
  }
  func.func @transform_1(%arg0: i32, %arg1: i32) -> (i32, i32) {
    %c0_i32 = arith.constant 0 : i32
    %c0_i32_0 = arith.constant 0 : i32
    return %c0_i32, %arg0 : i32, i32
  }
  func.func @transform_2(%arg0: i32, %arg1: i32) -> (i32, i32) {
    %c0_i32 = arith.constant 0 : i32
    %c0_i32_0 = arith.constant 0 : i32
    return %c0_i32, %arg0 : i32, i32
  }
  func.func @transform_3(%arg0: i32, %arg1: i32) -> (i32, i32) {
    %c0_i32 = arith.constant 0 : i32
    return %arg1, %arg0 : i32, i32
  }
}

module attributes {stable_mosaic.version = 11 : i64} {
  func.func @_linear_kernel(%arg0: i32, %arg1: i32, %arg2: memref<32x128xbf16, #tpu.memory_space<vmem>>, %arg3: memref<128x200xbf16, #tpu.memory_space<vmem>>, %arg4: memref<1x200xf32, #tpu.memory_space<vmem>>, %arg5: memref<32x200xf32, #tpu.memory_space<vmem>>) attributes {dimension_semantics = [#tpu.dimension_semantics<parallel>, #tpu.dimension_semantics<parallel>], iteration_bounds = array<i64: 1, 1>, scalar_prefetch = 0 : i64, scratch_operands = 0 : i64, tpu.core_type = #tpu.core_type<tc>, window_params = [{transform_indices = @transform_0, window_bounds = array<i64: 32, 128>}, {transform_indices = @transform_1, window_bounds = array<i64: 128, 200>}, {transform_indices = @transform_2, window_bounds = array<i64: 1, 200>}, {transform_indices = @transform_3, window_bounds = array<i64: 32, 200>}]} {
    %c0 = arith.constant 0 : index
    %c0_0 = arith.constant 0 : index
    %0 = vector.load %arg2[%c0, %c0_0] : memref<32x128xbf16, #tpu.memory_space<vmem>>, vector<32x128xbf16>
    %c0_1 = arith.constant 0 : index
    %c0_2 = arith.constant 0 : index
    %1 = vector.load %arg3[%c0_1, %c0_2] : memref<128x200xbf16, #tpu.memory_space<vmem>>, vector<128x200xbf16>
    %cst = arith.constant dense<0.000000e+00> : vector<32x200xf32>
    %2 = tpu.matmul %0, %1, %cst {dimension_numbers = #tpu.dot_dimension_numbers<[1], [0], [0], [1], [0, 0, 1, 1], [], []>} : vector<32x128xbf16>, vector<128x200xbf16>, vector<32x200xf32> -> vector<32x200xf32>
    %c0_3 = arith.constant 0 : index
    %c0_4 = arith.constant 0 : index
    %3 = vector.load %arg4[%c0_3, %c0_4] : memref<1x200xf32, #tpu.memory_space<vmem>>, vector<1x200xf32>
    %4 = vector.broadcast %3 : vector<1x200xf32> to vector<32x200xf32>
    %5 = arith.addf %2, %4 : vector<32x200xf32>
    %c0_5 = arith.constant 0 : index
    %c0_6 = arith.constant 0 : index
    %6 = vector.load %arg5[%c0_5, %c0_6] : memref<32x200xf32, #tpu.memory_space<vmem>>, vector<32x200xf32>
    tpu.vector_store %arg5[%c0_5, %c0_6], %5 {strides = array<i32>} : memref<32x200xf32, #tpu.memory_space<vmem>>, vector<32x200xf32>,
    return
  }
  func.func @transform_0(%arg0: i32, %arg1: i32) -> (i32, i32) {
    %c0_i32 = arith.constant 0 : i32
    %c0_i32_0 = arith.constant 0 : i32
    return %arg1, %c0_i32 : i32, i32
  }
  func.func @transform_1(%arg0: i32, %arg1: i32) -> (i32, i32) {
    %c0_i32 = arith.constant 0 : i32
    %c0_i32_0 = arith.constant 0 : i32
    return %c0_i32, %arg0 : i32, i32
  }
  func.func @transform_2(%arg0: i32, %arg1: i32) -> (i32, i32) {
    %c0_i32 = arith.constant 0 : i32
    %c0_i32_0 = arith.constant 0 : i32
    return %c0_i32, %arg0 : i32, i32
  }
  func.func @transform_3(%arg0: i32, %arg1: i32) -> (i32, i32) {
    %c0_i32 = arith.constant 0 : i32
    return %arg1, %arg0 : i32, i32
  }
}

</mosaic_0001>

<bundles_post_ra>
// kernel: conv_decoder_forward.6
= control target key start
LH: loop header
LB: loop body
LE: loop exit
PB: predicated region body
PF: predicated region fallthrough
CT: control target
= control target key end

     0   :  { %8 = vsyncpa [#allocation3], 0  ;;  %s281_s12 = smov [#allocation2]   ;;  %s341_s0 = inlined_call_operand.vmem [shape: bf16[32,128], index: 0, kind: input, shape index: {}]   ;;  %s342_s1 = inlined_call_operand.vmem [shape: bf16[128,128], index: 1, kind: input, shape index: {}]   ;;  %s343_s2 = inlined_call_operand.hbm [shape: f32[1,128], index: 2, kind: input, shape index: {}]   ;;  %s344_s3 = inlined_call_operand.vmem [shape: bf16[32,128], index: 3, kind: output, shape index: {}]  }
   0x1   :  { %s19_s13 = sshll.u32 %s281_s12, 4  ;;  %s20_s13 = int_to_ptr.vmem [resolvable:$true] %s19_s13 }
   0x2   :  { %s267_s14 = scalar_lea.vmem %s20_s13, 16  ;;  %s271_s15 = scalar_lea.vmem %s20_s13, 32 }
   0x3   :  { %p268_p0 = scmp.ne.s32.totalorder %s20_s13, %s267_s14  ;;  %p272_p1 = scmp.lt.s32.totalorder %s20_s13, %s20_s13 }
   0x4   :  { %p273_p2 = scmp.lt.s32.totalorder %s271_s15, %s267_s14 }
   0x6   :  { %p274_p3 = por %p273_p2, %p272_p1 }
   0x8   :  { %p275_p4 = pnand %p274_p3, %p268_p0 }
   0xa   :  { %278 = shalt.err (!%p275_p4)
}
   0xb   :  { %22 = dma.hbm_to_vmem [thread:$0]  %s343_s2, 16, %s20_s13, [#allocation3]  }
   0xc   :  { %279 = dma.done.wait [#allocation3], 16  }
   0xd   :  { %280 = vsyncadd [#allocation3], 4294967280  ;;  %v249_v0 = vld [vmem:[%s342_s1 + $0x38] sm:$0xff]   ;;  %v250_v1 = vld [vmem:[%s342_s1 + $0x30] sm:$0xff]  }
   0xe   :  { %228 = vmatprep.subr.bf16.mxu0 %v249_v0  ;;  %v251_v2 = vld [vmem:[%s342_s1 + $0x28] sm:$0xff]   ;;  %v252_v3 = vld [vmem:[%s342_s1 + $0x20] sm:$0xff]   ;;  %v253_v5 = vld [vmem:[%s342_s1 + $0x18] sm:$0xff]  }
   0xf   :  { %229 = vmatpush3.bf16.msra.mxu0 %v249_v0  ;;  %v257_v4 = vld [vmem:[%s341_s0] sm:$0xff]   ;;  %v254_v6 = vld [vmem:[%s342_s1 + $0x10] sm:$0xff]   ;;  %v255_v7 = vld [vmem:[%s342_s1 + $0x8] sm:$0xff]  }
  0x10   :  { %230 = vmatprep.subr.bf16.mxu0 %v250_v1  ;;  %244 = vmatprep.mubr.bf16.mxu0 %v257_v4  ;;  %v256_v8 = vld [vmem:[%s342_s1] sm:$0xff]   ;;  %v258_v9 = vld [vmem:[%s341_s0 + $0x8] sm:$0xff]  }
  0x11   :  { %v188_v11 = vld [vmem:[#allocation2] ss:$0 sm:$0xff] }
  0x13   :  { %231 = vmatpush3.bf16.msra.mxu0 %v250_v1 }
  0x14   :  { %232 = vmatprep.subr.bf16.mxu0 %v251_v2 }
  0x17   :  { %233 = vmatpush3.bf16.msra.mxu0 %v251_v2 }
  0x18   :  { %234 = vmatprep.subr.bf16.mxu0 %v252_v3 }
  0x1b   :  { %235 = vmatpush3.bf16.msra.mxu0 %v252_v3 }
  0x1c   :  { %236 = vmatprep.subr.bf16.mxu0 %v253_v5 }
  0x1f   :  { %237 = vmatpush3.bf16.msra.mxu0 %v253_v5 }
  0x20   :  { %238 = vmatprep.subr.bf16.mxu0 %v254_v6 }
  0x23   :  { %239 = vmatpush3.bf16.msra.mxu0 %v254_v6 }
  0x24   :  { %240 = vmatprep.subr.bf16.mxu0 %v255_v7 }
  0x27   :  { %241 = vmatpush3.bf16.msra.mxu0 %v255_v7 }
  0x28   :  { %242 = vmatprep.subr.bf16.mxu0 %v256_v8 }
  0x2b   :  { %243 = vmatpush3.bf16.msra.mxu0 %v256_v8 }
  0x2e   :  { %245 = vmatmul.mubr.bf16.vlgmr.msra.gmra.mxu0 %v258_v9 }
  0xee   :  { %v246_v10 = vpop.f32.mrf.mxu0 }
  0xef   :  { %v157_v14 = vadd.f32 %v246_v10, %v188_v11 }
  0xf0   :  { %v148_v12 = vpop.f32.mrf.mxu0 }
  0xf1   :  { %v149_v17 = vadd.f32 %v188_v11, %v148_v12 }
  0xf2   :  { %v247_v13 = vpop.f32.mrf.mxu0 }
  0xf3   :  { %v160_v15 = vadd.f32 %v247_v13, %v188_v11 }
  0xf4   :  { %v151_v16 = vpop.f32.mrf.mxu0 }
  0xf5   :  { %v215_v18 = vpack.c.bf16 %v160_v15, %v157_v14  ;;  %v152_v19 = vadd.f32 %v188_v11, %v151_v16 }
  0xf7   :  { %217 = vst [vmem:[%s344_s3 + $0x8] sm:$0xff] %v215_v18   ;;  %v210_v20 = vpack.c.bf16 %v152_v19, %v149_v17 }
  0xf9   :  { %211 = vst [vmem:[%s344_s3] sm:$0xff] %v210_v20  }
  0xfa   :  { %187 = vsyncpa [#allocation3], 1 }

// kernel: conv_decoder_forward.7
= control target key start
LH: loop header
LB: loop body
LE: loop exit
PB: predicated region body
PF: predicated region fallthrough
CT: control target
= control target key end

     0   :  { %18 = vsyncpa [#allocation3], 0  ;;  %s2480_s0 = inlined_call_operand.vmem [shape: bf16[2,16,128], index: 0, kind: input, shape index: {}]   ;;  %s2481_s1 = inlined_call_operand.vmem [shape: bf16[3,128,256], index: 1, kind: input, shape index: {}]   ;;  %s2482_s2 = inlined_call_operand.hbm [shape: f32[1,256], index: 2, kind: input, shape index: {}]   ;;  %s2483_s3 = inlined_call_operand.vmem [shape: bf16[2,16,128], index: 3, kind: input, shape index: {}]   ;;  %s2484_s4 = inlined_call_operand.vmem [shape: bf16[2,16,128], index: 4, kind: input, shape index: {}]   ;;  %s2485_s5 = inlined_call_operand.vmem [shape: bf16[2,16,128], index: 5, kind: input, shape index: {}]   ;;  %s2486_s6 = inlined_call_operand.vmem [shape: bf16[128,128], index: 6, kind: input, shape index: {}]   ;;  %s2487_s7 = inlined_call_operand.hbm [shape: f32[1,128], index: 7, kind: input, shape index: {}]   ;;  %s2488_s8 = inlined_call_operand.vmem [shape: bf16[128,128], index: 8, kind: input, shape index: {}]   ;;  %s2489_s9 = inlined_call_operand.hbm [shape: f32[1,128], index: 9, kind: input, shape index: {}]   ;;  %s2490_s10 = inlined_call_operand.vmem [shape: f32[2,16,16], index: 10, kind: input, shape index: {}, may-alias: {10,12}]   ;;  %s2491_s11 = inlined_call_operand.vmem [shape: bf16[2,16,128], index: 11, kind: output, shape index: {0}]   ;;  %s2492_s12 = inlined_call_operand.vmem [shape: f32[2,16,16], index: 12, kind: output, shape index: {1}, may-alias: {10,12}]  }
   0x1   :  { %19 = vsyncpa [#allocation5], 0  ;;  %s2127_s21 = smov 0  }
   0x2 LB: > { %s2133_s22 = sadd.s32 4294967295, %s2054_s21   ;;  %p1587_p0 = scmp.ge.s32.totalorder %s2054_s21, 1  ;;  %s2054_s21 = sphi %s2127_s21, %s25_s21  }
   0x3   : > { %p338_p1 = scmp.lt.s32.totalorder %s2054_s21, 3  ;;  %p2493_p2 = scmp.eq.s32.totalorder %s2133_s22, 0 }
   0x4   : > { %s2056_s24 = smov [#allocation4]   ;;  %s2057_s26 = smov [#allocation2]  }
   0x5   : > { %p2138_p3 = pnand %p1587_p0, %p338_p1  ;;  %s368_s25 = sshll.u32 %s2056_s24, 4  ;;  %s369_s25 = int_to_ptr.vmem [resolvable:$true] %s368_s25 }
   0x6   : > { %s354_s27 = sshll.u32 %s2057_s26, 4  ;;  %s2058_s28 = smov [#allocation6]   ;;  %s355_s27 = int_to_ptr.vmem [resolvable:$true] %s354_s27 }
   0x7   : > { %s2495_s23 = scalar_select %p2138_p3, 1, 0 }
   0x8   : > { %p1824_p4 = pneg %p2138_p3  ;;  %s382_s29 = sshll.u32 %s2058_s28, 4  ;;  %s2150_s29 = int_to_ptr.vmem [resolvable:$true] %s382_s29 }
   0x9   : > { %s1973_s13 = scalar_lea.vmem %s369_s25, 16  ;;  %s1980_s14 = scalar_lea.vmem %s369_s25, 32 }
   0xa   : > { %p2146_p5 = pnand %p2493_p2, %p1824_p4  ;;  %p1974_p7 = scmp.ne.s32.totalorder %s369_s25, %s1973_s13 }
   0xb   : > { %p1981_p10 = scmp.lt.s32.totalorder %s369_s25, %s369_s25  ;;  %p1982_p11 = scmp.lt.s32.totalorder %s1980_s14, %s1973_s13 }
   0xc   : > { %p1964_p6 = pneg %p2146_p5 }
   0xd   : > { %p1983_p12 = por %p1982_p11, %p1981_p10 }
   0xe   : > { %p1976_p8 = pnand %p1974_p7, %p1964_p6 }
  0x10   : > { %p1977_p9 = pneg %p1976_p8 }
  0x12   : > { %p1984_p13 = pnand %p1983_p12, %p1977_p9 }
  0x14   : > { %1987 = shalt.err (!%p1984_p13)
}
  0x15   : > { %1830 = dma.hbm_to_vmem [thread:$0]  (!%p2146_p5), %s2487_s7, 16, %s369_s25, [#allocation5]  }
  0x16   : > { %s1999_s17 = scalar_lea.vmem %s355_s27, 32  ;;  %p2007_p7 = scmp.lt.s32.totalorder %s355_s27, %s355_s27 }
  0x17   : > { %p2000_p0 = scmp.ne.s32.totalorder %s355_s27, %s1999_s17  ;;  %p2008_p8 = scmp.lt.s32.totalorder %s1999_s17, %s1999_s17 }
  0x19   : > { %p2002_p1 = pnand %p2000_p0, %p1964_p6  ;;  %p2009_p2 = por %p2008_p8, %p2007_p7 }
  0x1b   : > { %p2003_p4 = pneg %p2002_p1 }
  0x1d   : > { %p2010_p3 = pnand %p2009_p2, %p2003_p4 }
  0x1f   : > { %2013 = shalt.err (!%p2010_p3)
}
  0x20   : > { %1827 = dma.hbm_to_vmem [thread:$0]  (!%p2146_p5), %s2482_s2, 32, %s355_s27, [#allocation3]  }
  0x21   : > { %s2025_s20 = scalar_lea.vmem %s2150_s29, 16  ;;  %s2032_s24 = scalar_lea.vmem %s2150_s29, 32 }
  0x22   : > { %p2026_p9 = scmp.ne.s32.totalorder %s2150_s29, %s2025_s20  ;;  %p2033_p2 = scmp.lt.s32.totalorder %s2150_s29, %s2150_s29 }
  0x23   : > { %p2034_p3 = scmp.lt.s32.totalorder %s2032_s24, %s2025_s20 }
  0x24   : > { %p2028_p10 = pnand %p2026_p9, %p1964_p6 }
  0x25   : > { %p2035_p12 = por %p2034_p3, %p2033_p2 }
  0x26   : > { %p2029_p11 = pneg %p2028_p10 }
  0x28   : > { %p2036_p13 = pnand %p2035_p12, %p2029_p11 }
  0x2a   : > { %2039 = shalt.err (!%p2036_p13)
}
  0x2b   : > { %1833 = dma.hbm_to_vmem [thread:$0]  (!%p2146_p5), %s2489_s9, 16, %s2150_s29, [#allocation5]  }
  0x2c   : > { %p2497_p0 = scmp.ne.s32.totalorder %s2495_s23, 0 }
  0x2d   : > { %p2498_p6 = scmp.eq.s32.totalorder (!%p2497_p0), %s2133_s22, 0 }
  0x2e   : > { %435 = sbr.rel (%p2497_p0) target bundleno = 1482 (0x5ca), region = 64 }
  0x33   : > { %2045 = dma.done.wait (%p2498_p6), [#allocation3], 32   ;;  %p2499_p1 = pmov %p2498_p6 }
  0x35   : > { %2047 = vsyncadd (%p2499_p1), [#allocation3], 4294967264  ;;  %p2500_p4 = pmov %p2499_p1 }
  0x36   : > { %p2501_p7 = pmov %p2499_p1 }
  0x37   : > { %2049 = dma.done.wait (%p2500_p4), [#allocation5], 32  }
  0x38   : > { %2051 = vsyncadd (%p2501_p7), [#allocation5], 4294967264  ;;  %v2059_v0 = vmov 0   ;;  %v1854_v1 = vld [vmem:[%s2481_s1 + $0x74] ss:$8 sps:$4 sm:$0xff]   ;;  %p510_p5 = scmp.lt.s32.totalorder %s2133_s22, 1 }
  0x39   : > { %690 = vmatprep.mubr.bf16.mxu0 %v2059_v0  ;;  %857 = vmatprep.mubr.bf16.mxu1 %v2059_v0  ;;  %v1856_v2 = vld [vmem:[%s2481_s1 + $0x70] ss:$8 sps:$4 sm:$0xff]   ;;  %v1857_v3 = vld [vmem:[%s2481_s1 + $0xf4] ss:$8 sps:$4 sm:$0xff]   ;;  %v1860_v5 = vld [vmem:[%s2481_s1 + $0x64] ss:$8 sps:$4 sm:$0xff]  }
  0x3a   : > { %658 = vmatprep.subr.bf16.mxu0 %v1854_v1  ;;  %v1859_v4 = vld [vmem:[%s2481_s1 + $0xf0] ss:$8 sps:$4 sm:$0xff]   ;;  %v1862_v6 = vld [vmem:[%s2481_s1 + $0x60] ss:$8 sps:$4 sm:$0xff]   ;;  %825 = vmatprep.subr.bf16.mxu1 %v1857_v3  ;;  %v1863_v7 = vld [vmem:[%s2481_s1 + $0xe4] ss:$8 sps:$4 sm:$0xff]  }
  0x3b   : > { %659 = vmatpush1.bf16.msra.mxu0 %v1856_v2  ;;  %826 = vmatpush1.bf16.msra.mxu1 %v1859_v4  ;;  %v1865_v8 = vld [vmem:[%s2481_s1 + $0xe0] ss:$8 sps:$4 sm:$0xff]   ;;  %v1866_v9 = vld [vmem:[%s2481_s1 + $0x54] ss:$8 sps:$4 sm:$0xff]   ;;  %v1868_v10 = vld [vmem:[%s2481_s1 + $0x50] ss:$8 sps:$4 sm:$0xff]  }
  0x3c   : > { %660 = vmatprep.subr.bf16.mxu0 %v1860_v5  ;;  %827 = vmatprep.subr.bf16.mxu1 %v1863_v7  ;;  %v1869_v11 = vld [vmem:[%s2481_s1 + $0xd4] ss:$8 sps:$4 sm:$0xff]   ;;  %v1872_v12 = vld [vmem:[%s2481_s1 + $0x44] ss:$8 sps:$4 sm:$0xff]   ;;  %v1871_v13 = vld [vmem:[%s2481_s1 + $0xd0] ss:$8 sps:$4 sm:$0xff]   ;;  %v702_v7 = vlaneseq }
  0x3d   : > { %v1875_v14 = vld [vmem:[%s2481_s1 + $0xc4] ss:$8 sps:$4 sm:$0xff]   ;;  %v1874_v15 = vld [vmem:[%s2481_s1 + $0x40] ss:$8 sps:$4 sm:$0xff]   ;;  %s2503_s22 = smov (!%p510_p5, %s2133_s22), 1  ;;  %vm557_vm0 = vcmask 1040384  }
  0x3e   : > { %v1878_v16 = vld [vmem:[%s2481_s1 + $0x34] ss:$8 sps:$4 sm:$0xff]   ;;  %v1877_v17 = vld [vmem:[%s2481_s1 + $0xc0] ss:$8 sps:$4 sm:$0xff]   ;;  %v1880_v19 = vld [vmem:[%s2481_s1 + $0x30] ss:$8 sps:$4 sm:$0xff]  }
  0x3f   : > { %661 = vmatpush1.bf16.msra.mxu0 %v1862_v6  ;;  %828 = vmatpush1.bf16.msra.mxu1 %v1865_v8  ;;  %v1881_v18 = vld [vmem:[%s2481_s1 + $0xb4] ss:$8 sps:$4 sm:$0xff]   ;;  %s2258_s14 = sshll.u32 %s2503_s22, 3  ;;  %v1884_v20 = vld [vmem:[%s2481_s1 + $0x24] ss:$8 sps:$4 sm:$0xff]   ;;  %vm1627_vm1 = vmneg %vm557_vm0  ;;  %vm890_vm3 = vcmask 1046528  }
  0x40   : > { %662 = vmatprep.subr.bf16.mxu0 %v1866_v9  ;;  %829 = vmatprep.subr.bf16.mxu1 %v1869_v11  ;;  %v1883_v21 = vld [vmem:[%s2481_s1 + $0xb0] ss:$8 sps:$4 sm:$0xff]   ;;  %v1887_v22 = vld [vmem:[%s2481_s1 + $0xa4] ss:$8 sps:$4 sm:$0xff]   ;;  %s514_s26 = scalar_lea.vmem %s2480_s0, %s2258_s14  ;;  %v1886_v23 = vld [vmem:[%s2481_s1 + $0x20] ss:$8 sps:$4 sm:$0xff]   ;;  %s524_s19 = scalar_lea.vmem %s2484_s4, %s2258_s14 }
  0x41   : > { %v1890_v24 = vld [vmem:[%s2481_s1 + $0x14] ss:$8 sps:$4 sm:$0xff]   ;;  %v1889_v25 = vld [vmem:[%s2481_s1 + $0xa0] ss:$8 sps:$4 sm:$0xff]   ;;  %v1892_v28 = vld [vmem:[%s2481_s1 + $0x10] ss:$8 sps:$4 sm:$0xff]   ;;  %s519_s25 = scalar_lea.vmem %s2483_s3, %s2258_s14  ;;  %s529_s23 = scalar_lea.vmem %s2485_s5, %s2258_s14 }
  0x42   : > { %v2282_v26 = vld [vmem:[%s514_s26] sm:$0xff]   ;;  %v1893_v27 = vld [vmem:[%s2481_s1 + $0x94] ss:$8 sps:$4 sm:$0xff]   ;;  %v1895_v31 = vld [vmem:[%s2481_s1 + $0x90] ss:$8 sps:$4 sm:$0xff]   ;;  %v2060_v63 = vmov 0.0   ;;  %s539_s20 = scalar_lea.vmem %s2491_s11, %s2258_s14 }
  0x43   : > { %663 = vmatpush1.bf16.msra.mxu0 %v1868_v10  ;;  %830 = vmatpush1.bf16.msra.mxu1 %v1871_v13  ;;  %v1896_v29 = vld [vmem:[%s2481_s1 + $0x4] ss:$8 sps:$4 sm:$0xff]   ;;  %v2294_v30 = vrot.slane %v2282_v26, 7  ;;  %v1898_v35 = vld [vmem:[%s2481_s1] ss:$8 sps:$4 sm:$0xff]   ;;  %v1927_v62 = vld [vmem:[%s2486_s6 + $0x38] sm:$0xff]  }
  0x44   : > { %664 = vmatprep.subr.bf16.mxu0 %v1872_v12  ;;  %831 = vmatprep.subr.bf16.mxu1 %v1875_v14  ;;  %v1899_v32 = vld [vmem:[%s2481_s1 + $0x84] ss:$8 sps:$4 sm:$0xff]   ;;  %v1905_v38 = vld [vmem:[%s2481_s1 + $0x174] ss:$8 sps:$4 sm:$0xff]   ;;  %v1901_v39 = vld [vmem:[%s2481_s1 + $0x80] ss:$8 sps:$4 sm:$0xff]  }
  0x45   : > { %v560_v33 = vsel %vm557_vm0, 0, %v2294_v30  ;;  %v740_v34 = vshll.u32 %v2294_v30, 16  ;;  %vm733_vm2 = vsmask.f32 7424  ;;  %v1903_v42 = vld [vmem:[%s2481_s1 + $0x170] ss:$8 sps:$4 sm:$0xff]  }
  0x46   : > { %v734_v36 = vshrl.u32 %v560_v33, 16  ;;  %v736_v37 = vshll.u32 %v560_v33, 16  ;;  %v1908_v44 = vld [vmem:[%s2481_s1 + $0x164] ss:$8 sps:$4 sm:$0xff]   ;;  %v1906_v46 = vld [vmem:[%s2481_s1 + $0x160] ss:$8 sps:$4 sm:$0xff]  }
  0x47   : > { %665 = vmatpush1.bf16.msra.mxu0 %v1874_v15  ;;  %832 = vmatpush1.bf16.msra.mxu1 %v1877_v17  ;;  %v742_v41 = vrot.slane %v740_v34, 1  ;;  %v1911_v47 = vld [vmem:[%s2481_s1 + $0x154] ss:$8 sps:$4 sm:$0xff]   ;;  %v1909_v48 = vld [vmem:[%s2481_s1 + $0x150] ss:$8 sps:$4 sm:$0xff]   ;;  %v891_v58 = vrot.slane %v560_v33, 1 }
  0x48   : > { %666 = vmatprep.subr.bf16.mxu0 %v1878_v16  ;;  %833 = vmatprep.subr.bf16.mxu1 %v1881_v18  ;;  %v738_v40 = vrot.slane %v736_v37, 1  ;;  %v1914_v49 = vld [vmem:[%s2481_s1 + $0x144] ss:$8 sps:$4 sm:$0xff]   ;;  %v1912_v50 = vld [vmem:[%s2481_s1 + $0x140] ss:$8 sps:$4 sm:$0xff]   ;;  %v892_v60 = vrot.slane %v2294_v30, 1 }
  0x49   : > { %v1917_v51 = vld [vmem:[%s2481_s1 + $0x134] ss:$8 sps:$4 sm:$0xff]   ;;  %v1915_v52 = vld [vmem:[%s2481_s1 + $0x130] ss:$8 sps:$4 sm:$0xff]   ;;  %v1920_v53 = vld [vmem:[%s2481_s1 + $0x124] ss:$8 sps:$4 sm:$0xff]  }
  0x4a   : > { %v739_v43 = vor.u32 %v738_v40, %v734_v36  ;;  %v1918_v54 = vld [vmem:[%s2481_s1 + $0x120] ss:$8 sps:$4 sm:$0xff]   ;;  %v1923_v55 = vld [vmem:[%s2481_s1 + $0x114] ss:$8 sps:$4 sm:$0xff]   ;;  %v1921_v56 = vld [vmem:[%s2481_s1 + $0x110] ss:$8 sps:$4 sm:$0xff]   ;;  %v893_v61 = vsel %vm890_vm3, %v891_v58, %v892_v60 }
  0x4b   : > { %667 = vmatpush1.bf16.msra.mxu0 %v1880_v19  ;;  %834 = vmatpush1.bf16.msra.mxu1 %v1883_v21  ;;  %v1926_v57 = vld [vmem:[%s2481_s1 + $0x104] ss:$8 sps:$4 sm:$0xff]   ;;  %v1924_v59 = vld [vmem:[%s2481_s1 + $0x100] ss:$8 sps:$4 sm:$0xff]   ;;  %v1931_v3 = vld [vmem:[%s2486_s6 + $0x18] sm:$0xff]   ;;  %vm2061_vm4 = vmmov 0  }
  0x4c   : > { %668 = vmatprep.subr.bf16.mxu0 %v1884_v20  ;;  %835 = vmatprep.subr.bf16.mxu1 %v1887_v22  ;;  %v743_v45 = vsel %vm733_vm2, %v739_v43, %v742_v41  ;;  %v1929_v1 = vld [vmem:[%s2486_s6 + $0x28] sm:$0xff]   ;;  %v1930_v2 = vld [vmem:[%s2486_s6 + $0x20] sm:$0xff]   ;;  %v1932_v4 = vld [vmem:[%s2486_s6 + $0x10] sm:$0xff]   ;;  %v703_v8 = vshrl.u32 %v702_v7, 7  ;;  %vm1209_vm5 = vcmask 130048   ;;  %s1724_s26 = sshll.u32 %s2503_s22, 4 }
  0x4d   : > { %v1933_v5 = vld [vmem:[%s2486_s6 + $0x8] sm:$0xff]   ;;  %v1934_v6 = vld [vmem:[%s2486_s6] sm:$0xff]   ;;  %s534_s28 = scalar_lea.vmem %s2490_s10, %s1724_s26  ;;  %s544_s13 = scalar_lea.vmem %s2492_s12, %s1724_s26 }
  0x4e   : > { %v708_v10 = vsub.s32 1, %v703_v8  ;;  %v550_v11 = vld [vmem:[#allocation2] sm:$0x3]  ;;  %v704_v36 = vsub.s32 0, %v703_v8 }
  0x4f   : > { %669 = vmatpush1.bf16.msra.mxu0 %v1886_v23  ;;  %836 = vmatpush1.bf16.msra.mxu1 %v1889_v25 }
  0x50   : > { %670 = vmatprep.subr.bf16.mxu0 %v1890_v24  ;;  %837 = vmatprep.subr.bf16.mxu1 %v1893_v27  ;;  %v709_v14 = vrot.slane %v550_v11, %v708_v10 }
  0x53   : > { %671 = vmatpush1.bf16.msra.mxu0 %v1892_v28  ;;  %838 = vmatpush1.bf16.msra.mxu1 %v1895_v31 }
  0x54   : > { %672 = vmatprep.subr.bf16.mxu0 %v1896_v29  ;;  %839 = vmatprep.subr.bf16.mxu1 %v1899_v32 }
  0x57   : > { %673 = vmatpush1.bf16.msra.mxu0 %v1898_v35  ;;  %840 = vmatpush1.bf16.msra.mxu1 %v1901_v39 }
  0x58   : > { %975 = vmatprep.subr.bf16.mxu0 %v1905_v38  ;;  %1760 = vmatprep.subr.bf16.mxu1 %v2060_v63  ;;  %v705_v38 = vrot.slane %v550_v11, %v704_v36 }
  0x5a   : > { %1628 = vmatmul.mubr.msk.bf16.vlgmr.msra.gmra.mxu0 %vm1627_vm1, %v2294_v30  ;;  %858 = vmatmul.mubr.bf16.vlgmr.msra.gmra.mxu1 %v743_v45 }
  0x5b   : > { %976 = vmatpush1.bf16.msra.mxu0 %v1903_v42  ;;  %1007 = vmatprep.mubr.bf16.mxu0 %v2059_v0  ;;  %v1928_v0 = vld [vmem:[%s2486_s6 + $0x30] sm:$0xff]  }
  0x5c   : > { %977 = vmatprep.subr.bf16.mxu0 %v1908_v44  ;;  %1761 = vmatpush3.bf16.msra.mxu1 %v1927_v62 }
  0x5d   : > { %1762 = vmatprep.subr.bf16.mxu1 %v2060_v63  ;;  %1776 = vmatprep.mubr.msk.bf16.mxu1 %vm2061_vm4, %v2060_v63 }
  0x5f   : > { %978 = vmatpush1.bf16.msra.mxu0 %v1906_v46 }
  0x60   : > { %979 = vmatprep.subr.bf16.mxu0 %v1911_v47  ;;  %1763 = vmatpush3.bf16.msra.mxu1 %v1928_v0 }
  0x61   : > { %1764 = vmatprep.subr.bf16.mxu1 %v2060_v63 }
  0x63   : > { %980 = vmatpush1.bf16.msra.mxu0 %v1909_v48 }
  0x64   : > { %981 = vmatprep.subr.bf16.mxu0 %v1914_v49  ;;  %1765 = vmatpush3.bf16.msra.mxu1 %v1929_v1 }
  0x65   : > { %1766 = vmatprep.subr.bf16.mxu1 %v2060_v63 }
  0x67   : > { %982 = vmatpush1.bf16.msra.mxu0 %v1912_v50  ;;  %v1935_v50 = vld [vmem:[%s524_s19] sm:$0xff]  }
  0x68   : > { %983 = vmatprep.subr.bf16.mxu0 %v1917_v51  ;;  %1767 = vmatpush3.bf16.msra.mxu1 %v1930_v2  ;;  %v1695_v51 = vld [vmem:[#allocation4] ss:$0 sm:$0xff] }
  0x69   : > { %1768 = vmatprep.subr.bf16.mxu1 %v2060_v63 }
  0x6b   : > { %984 = vmatpush1.bf16.msra.mxu0 %v1915_v52  ;;  %v1730_v52 = vld [vmem:[%s519_s25] sm:$0xff]  }
  0x6c   : > { %985 = vmatprep.subr.bf16.mxu0 %v1920_v53  ;;  %1769 = vmatpush3.bf16.msra.mxu1 %v1931_v3 }
  0x6d   : > { %1770 = vmatprep.subr.bf16.mxu1 %v2060_v63 }
  0x6f   : > { %986 = vmatpush1.bf16.msra.mxu0 %v1918_v54 }
  0x70   : > { %987 = vmatprep.subr.bf16.mxu0 %v1923_v55  ;;  %1771 = vmatpush3.bf16.msra.mxu1 %v1932_v4  ;;  %v1731_v55 = vunpack.c.l.bf16 %v1730_v52 }
  0x71   : > { %1772 = vmatprep.subr.bf16.mxu1 %v2060_v63 }
  0x73   : > { %988 = vmatpush1.bf16.msra.mxu0 %v1921_v56 }
  0x74   : > { %989 = vmatprep.subr.bf16.mxu0 %v1926_v57  ;;  %1773 = vmatpush3.bf16.msra.mxu1 %v1933_v5  ;;  %v1732_v57 = vunpack.c.h.bf16 %v1730_v52 }
  0x75   : > { %1774 = vmatprep.subr.bf16.mxu1 %v2060_v63 }
  0x77   : > { %990 = vmatpush1.bf16.msra.mxu0 %v1924_v59 }
  0x78   : > { %1792 = vmatprep.subr.bf16.mxu0 %v2060_v63  ;;  %1775 = vmatpush3.bf16.msra.mxu1 %v1934_v6 }
  0x79   : > { %1780 = vmatprep.subr.bf16.mxu1 %v2060_v63 }
  0x7a   : > { %1008 = vmatmul.mubr.bf16.vlgmr.msra.gmra.mxu0 %v893_v61 }
  0x7b   : > { %1808 = vmatprep.mubr.msk.bf16.mxu0 %vm2061_vm4, %v2060_v63 }
 0x11a   : > { %v692_v9 = vpop.f32.mrf.mxu0  ;;  %v859_v13 = vpop.f32.mrf.mxu1 }
 0x11b   : > { %v712_v39 = vadd.f32 %v705_v38, %v692_v9 }
 0x11c   : > { %v694_v12 = vpop.f32.mrf.mxu0  ;;  %v861_v16 = vpop.f32.mrf.mxu1 }
 0x11d   : > { %v713_v17 = vadd.f32 %v709_v14, %v694_v12  ;;  %v868_v41 = vadd.f32 %v859_v13, %v712_v39  ;;  %v1944_v39 = vld [vmem:[%s2488_s8] sm:$0xff]  }
 0x11e   : > { %v696_v15 = vpop.f32.mrf.mxu0  ;;  %v863_v19 = vpop.f32.mrf.mxu1 }
 0x11f   : > { %v869_v21 = vadd.f32 %v861_v16, %v713_v17  ;;  %v714_v40 = vadd.f32 %v705_v38, %v696_v15  ;;  %v1943_v38 = vld [vmem:[%s2488_s8 + $0x8] sm:$0xff]  }
 0x120   : > { %v698_v18 = vpop.f32.mrf.mxu0  ;;  %v865_v23 = vpop.f32.mrf.mxu1 }
 0x121   : > { %v715_v22 = vadd.f32 %v709_v14, %v698_v18  ;;  %v870_v42 = vadd.f32 %v863_v19, %v714_v40  ;;  %v1936_v19 = vld [vmem:[%s529_s23] sm:$0xff]  }
 0x123   : > { %v871_v28 = vadd.f32 %v865_v23, %v715_v22  ;;  %v1939_v22 = vld [vmem:[%s2488_s8 + $0x28] sm:$0xff]   ;;  %v1940_v23 = vld [vmem:[%s2488_s8 + $0x20] sm:$0xff]  }
 0x13a   : > { %v1009_v20 = vpop.f32.mrf.mxu0 }
 0x13b   : > { %v1018_v44 = vadd.f32 %v1009_v20, %v868_v41  ;;  %v1937_v20 = vld [vmem:[%s2488_s8 + $0x38] sm:$0xff]  }
 0x13c   : > { %v1011_v24 = vpop.f32.mrf.mxu0  ;;  %1793 = vmatpush3.bf16.msra.mxu0 %v1937_v20 }
 0x13d   : > { %v1019_v25 = vadd.f32 %v1011_v24, %v869_v21  ;;  %v1938_v21 = vld [vmem:[%s2488_s8 + $0x30] sm:$0xff]   ;;  %1794 = vmatprep.subr.bf16.mxu0 %v2060_v63  ;;  %v1941_v24 = vld [vmem:[%s2488_s8 + $0x18] sm:$0xff]  }
 0x13e   : > { %v1013_v27 = vpop.f32.mrf.mxu0 }
 0x13f   : > { %v1693_v29 = vmul.f32 -1.442695, %v1019_v25  ;;  %v1020_v45 = vadd.f32 %v1013_v27, %v870_v42  ;;  %v1942_v25 = vld [vmem:[%s2488_s8 + $0x10] sm:$0xff]  }
 0x140   : > { %v1015_v30 = vpop.f32.mrf.mxu0  ;;  %1795 = vmatpush3.bf16.msra.mxu0 %v1938_v21 }
 0x141   : > { %1946 = vpow2.f32 %v1693_v29  ;;  %v1021_v31 = vadd.f32 %v1015_v30, %v871_v28  ;;  %1796 = vmatprep.subr.bf16.mxu0 %v2060_v63  ;;  %v1398_v30 = vld [vmem:[%s534_s28] sm:$0xff] }
 0x143   : > { %v1694_v32 = vmul.f32 -1.442695, %v1021_v31 }
 0x144   : > { %1797 = vmatpush3.bf16.msra.mxu0 %v1939_v22 }
 0x145   : > { %1948 = vpow2.f32 %v1694_v32  ;;  %1798 = vmatprep.subr.bf16.mxu0 %v2060_v63  ;;  %v1399_v32 = vld [vmem:[%s534_s28 + $0x8] sm:$0xff] }
 0x148   : > { %1799 = vmatpush3.bf16.msra.mxu0 %v1940_v23 }
 0x149   : > { %1800 = vmatprep.subr.bf16.mxu0 %v2060_v63 }
 0x14c   : > { %1801 = vmatpush3.bf16.msra.mxu0 %v1941_v24 }
 0x14d   : > { %1802 = vmatprep.subr.bf16.mxu0 %v2060_v63 }
 0x14e   : > { %v1947_v33 = vpop.eup %1946 }
 0x14f   : > { %v1028_v34 = vadd.f32 1.0, %v1947_v33 }
 0x150   : > { %1803 = vmatpush3.bf16.msra.mxu0 %v1942_v25 }
 0x151   : > { %1950 = vrcp.f32 %v1028_v34  ;;  %1804 = vmatprep.subr.bf16.mxu0 %v2060_v63 }
 0x152   : > { %v1949_v35 = vpop.eup %1948 }
 0x153   : > { %v1029_v37 = vadd.f32 1.0, %v1949_v35 }
 0x154   : > { %1805 = vmatpush3.bf16.msra.mxu0 %v1943_v38 }
 0x155   : > { %1952 = vrcp.f32 %v1029_v37  ;;  %1806 = vmatprep.subr.bf16.mxu0 %v2060_v63 }
 0x158   : > { %1807 = vmatpush3.bf16.msra.mxu0 %v1944_v39 }
 0x15e   : > { %v1951_v43 = vpop.eup %1950 }
 0x15f   : > { %v2401_v47 = vmul.f32 %v1951_v43, %v1018_v44 }
 0x162   : > { %v1953_v46 = vpop.eup %1952 }
 0x163   : > { %v2403_v48 = vmul.f32 %v1953_v46, %v1020_v45  ;;  %v1707_v45 = vld [vmem:[#allocation6] ss:$0 sm:$0xff] }
 0x165   : > { %v1052_v49 = vpack.c.bf16 %v2403_v48, %v2401_v47 }
 0x167   : > { %1777 = vmatmul.mubr.bf16.vlgmr.msra.gmra.mxu1 %v1052_v49 }
 0x168   : > { %1782 = vmatprep.mubr.msk.bf16.mxu1 %vm2061_vm4, %v2060_v63  ;;  %1781 = vmatpush3.bf16.xpose.msra.mxu1 %v1935_v50 }
 0x169   : > { %1786 = vmatprep.subr.bf16.mxu1 %v2060_v63 }
 0x227   : > { %v1142_v53 = vpop.f32.mrf.mxu1 }
 0x228   : > { %v1143_v54 = vadd.f32 %v1695_v51, %v1142_v53  ;;  %v549_v53 = vunpack.c.h.bf16 %v2282_v26 }
 0x229   : > { %v1778_v56 = vpop.f32.mrf.mxu1 }
 0x22a   : > { %v1153_v59 = vadd.f32 %v1731_v55, %v1143_v54 }
 0x22b   : > { %v1145_v58 = vpop.f32.mrf.mxu1 }
 0x22c   : > { %v1146_v60 = vadd.f32 %v1695_v51, %v1145_v58  ;;  %v1155_v0 = vmul.f32 0.088388346, %v1153_v59  ;;  %v548_v51 = vunpack.c.l.bf16 %v2282_v26 }
 0x22d   : > { %v1779_v61 = vpop.f32.mrf.mxu1 }
 0x22e   : > { %v1154_v62 = vadd.f32 %v1732_v57, %v1146_v60 }
 0x230   : > { %v1156_v1 = vmul.f32 0.088388346, %v1154_v62 }
 0x232   : > { %v1161_v2 = vpack.c.bf16 %v1156_v1, %v1155_v0 }
 0x234   : > { %1783 = vmatmul.mubr.bf16.vlgmr.msra.gmra.mxu1 %v1161_v2 }
 0x235   : > { %1788 = vmatprep.mubr.msk.bf16.mxu1 %vm2061_vm4, %v2060_v63  ;;  %1787 = vmatpush3.bf16.msra.mxu1 %v1936_v19 }
 0x2f4   : > { %v1202_v3 = vpop.f32.mrf.mxu1 }
 0x2f5   : > { %v1210_v4 = vsel %vm1209_vm5, %v1202_v3, -inf }
 0x2f6   : > { %1211 = vmax.xlane.f32.xlu0 %v1210_v4  ;;  %v1784_v5 = vpop.f32.mrf.mxu1 }
 0x2f8   : > { %v1205_v6 = vpop.f32.mrf.mxu1 }
 0x2f9   : > { %v1213_v7 = vsel %vm1209_vm5, %v1205_v6, -inf }
 0x2fa   : > { %1214 = vmax.xlane.f32.xlu0 %v1213_v7  ;;  %v1785_v8 = vpop.f32.mrf.mxu1 }
 0x37f   : > { %v1212_v9 = vpop.xlane.xlu0 %1211 }
 0x380   : > { %v1216_v10 = vsub.f32 %v1202_v3, %v1212_v9 }
 0x382   : > { %v1218_v11 = vmul.f32 1.442695, %v1216_v10 }
 0x383   : > { %v1215_v12 = vpop.xlane.xlu0 %1214 }
 0x384   : > { %1954 = vpow2.f32 %v1218_v11  ;;  %v1217_v13 = vsub.f32 %v1205_v6, %v1215_v12 }
 0x386   : > { %v1220_v14 = vmul.f32 1.442695, %v1217_v13 }
 0x388   : > { %1956 = vpow2.f32 %v1220_v14 }
 0x391   : > { %v1955_v15 = vpop.eup %1954 }
 0x392   : > { %v1222_v16 = vsel %vm1209_vm5, %v1955_v15, 0.0 }
 0x393   : > { %1223 = vadd.xlane.f32.xlu1 %v1222_v16 }
 0x395   : > { %v1957_v17 = vpop.eup %1956 }
 0x396   : > { %v1225_v18 = vsel %vm1209_vm5, %v1957_v17, 0.0 }
 0x397   : > { %1226 = vadd.xlane.f32.xlu1 %v1225_v18 }
 0x41c   : > { %v1224_v27 = vpop.xlane.xlu1 %1223 }
 0x41d   : > { %1958 = vrcp.f32 %v1224_v27 }
 0x420   : > { %v1227_v28 = vpop.xlane.xlu1 %1226 }
 0x421   : > { %1960 = vrcp.f32 %v1227_v28 }
 0x42a   : > { %v1959_v29 = vpop.eup %1958 }
 0x42b   : > { %v1230_v31 = vmul.f32 %v1959_v29, %v1955_v15 }
 0x42d   : > { %v1400_v33 = vadd.f32 %v1398_v30, %v1230_v31 }
 0x42e   : > { %v1961_v34 = vpop.eup %1960 }
 0x42f   : > { %v1231_v35 = vmul.f32 %v1961_v34, %v1957_v17  ;;  %1402 = vst.msk [vmem:[%s544_s13] sm:$0xff] %vm1209_vm5, %v1400_v33 }
 0x431   : > { %v1401_v36 = vadd.f32 %v1399_v32, %v1231_v35  ;;  %v1232_v37 = vpack.c.bf16 %v1231_v35, %v1230_v31 }
 0x433   : > { %1789 = vmatmul.mubr.msk.bf16.vlgmr.msra.gmra.mxu1 %vm1209_vm5, %v1232_v37  ;;  %1403 = vst.msk [vmem:[%s544_s13 + $0x8] sm:$0xff] %vm1209_vm5, %v1401_v36 }
 0x4f3   : > { %v1276_v40 = vpop.f32.mrf.mxu1 }
 0x4f5   : > { %v1790_v41 = vpop.f32.mrf.mxu1 }
 0x4f7   : > { %v1279_v42 = vpop.f32.mrf.mxu1 }
 0x4f8   : > { %v1299_v43 = vpack.c.bf16 %v1279_v42, %v1276_v40 }
 0x4f9   : > { %v1791_v44 = vpop.f32.mrf.mxu1 }
 0x4fa   : > { %1809 = vmatmul.mubr.bf16.vlgmr.msra.gmra.mxu0 %v1299_v43 }
 0x5ba   : > { %v1389_v46 = vpop.f32.mrf.mxu0 }
 0x5bb   : > { %v1390_v49 = vadd.f32 %v1707_v45, %v1389_v46 }
 0x5bc   : > { %v1810_v50 = vpop.f32.mrf.mxu0 }
 0x5bd   : > { %v1396_v63 = vadd.f32 %v1390_v49, %v2401_v47 }
 0x5be   : > { %v1392_v52 = vpop.f32.mrf.mxu0 }
 0x5bf   : > { %v1393_v54 = vadd.f32 %v1707_v45, %v1392_v52  ;;  %v1404_v56 = vadd.f32 %v1396_v63, %v548_v51 }
 0x5c0   : > { %v1811_v55 = vpop.f32.mrf.mxu0 }
 0x5c1   : > { %v1397_v57 = vadd.f32 %v1393_v54, %v2403_v48  ;;  %v1406_v59 = vmul.f32 0.70710677, %v1404_v56 }
 0x5c3   : > { %v1405_v58 = vadd.f32 %v1397_v57, %v549_v53 }
 0x5c5   : > { %v1407_v60 = vmul.f32 0.70710677, %v1405_v58 }
 0x5c7   : > { %v1736_v61 = vpack.c.bf16 %v1407_v60, %v1406_v59 }
 0x5c9   : > { %1737 = vst [vmem:[%s539_s20] sm:$0xff] %v1736_v61  }
 0x5ca PF: > { %s25_s21 = sadd.s32 1, %s2054_s21  }
 0x5cb   : > { %p22_p8 = scmp.ge.s32.totalorder %s25_s21, 4  }
 0x5cd   :  { %24 = sbr.rel (!%p22_p8) target bundleno = 2 (0x2), region = 133 }
 0x5d2   :  { %1455 = vsyncpa [#allocation3], 1 }
 0x5d3   :  { %1457 = vsyncpa [#allocation3 + $0x1], 1 }
 0x5d4   :  { %1458 = vsyncpa [#allocation5], 1 }

// kernel: conv_decoder_forward.8
= control target key start
LH: loop header
LB: loop body
LE: loop exit
PB: predicated region body
PF: predicated region fallthrough
CT: control target
= control target key end

     0   :  { %s2914_s29 = smov 0   ;;  %s3490_s0 = inlined_call_operand.vmem [shape: bf16[2,16,128], index: 0, kind: input, shape index: {}]   ;;  %s3491_s1 = inlined_call_operand.vmem [shape: bf16[3,128,512], index: 1, kind: input, shape index: {}]   ;;  %s3492_s2 = inlined_call_operand.vmem [shape: f32[1,512], index: 2, kind: input, shape index: {}]   ;;  %s3493_s3 = inlined_call_operand.vmem [shape: bf16[128,256], index: 3, kind: input, shape index: {}]   ;;  %s3494_s4 = inlined_call_operand.vmem [shape: f32[1,256], index: 4, kind: input, shape index: {}]   ;;  %s3495_s5 = inlined_call_operand.vmem [shape: bf16[2,16,128], index: 5, kind: input, shape index: {}]   ;;  %s3496_s6 = inlined_call_operand.vmem [shape: bf16[2,16,128], index: 6, kind: input, shape index: {}]   ;;  %s3497_s7 = inlined_call_operand.vmem [shape: bf16[2,16,128], index: 7, kind: input, shape index: {}]   ;;  %s3498_s8 = inlined_call_operand.vmem [shape: bf16[256,128], index: 8, kind: input, shape index: {}]   ;;  %s3499_s9 = inlined_call_operand.vmem [shape: f32[1,128], index: 9, kind: input, shape index: {}]   ;;  %s3500_s10 = inlined_call_operand.vmem [shape: bf16[128,256], index: 10, kind: input, shape index: {}]   ;;  %s3501_s11 = inlined_call_operand.vmem [shape: f32[1,256], index: 11, kind: input, shape index: {}]   ;;  %s3502_s12 = inlined_call_operand.vmem [shape: f32[2,16,16], index: 12, kind: input, shape index: {}, may-alias: {12,14}]   ;;  %s3503_s13 = inlined_call_operand.vmem [shape: bf16[2,16,256], index: 13, kind: output, shape index: {0}]   ;;  %s3504_s14 = inlined_call_operand.vmem [shape: f32[2,16,16], index: 14, kind: output, shape index: {1}, may-alias: {12,14}]  }
   0x1 LB: > { %s2287_s30 = sadd.s32 4294967295, %s2834_s29   ;;  %p2291_p0 = scmp.ge.s32.totalorder %s2834_s29, 1  ;;  %s2834_s29 = sphi %s2914_s29, %s25_s29  }
   0x2   : > { %p455_p1 = scmp.lt.s32.totalorder %s2834_s29, 3 }
   0x4   : > { %p456_p2 = pnand %p2291_p0, %p455_p1 }
   0x5   : > { %p526_p3 = scmp.lt.s32.totalorder (!%p456_p2), %s2287_s30, 1 }
   0x6   : > { %459 = sbr.rel (%p456_p2) target bundleno = 1508 (0x5e4), region = 72 }
   0xb   : > { %v2593_v0 = vld [vmem:[%s3493_s3 + $0x74] ss:$8 sps:$4 sm:$0xff]   ;;  %v2836_v2 = vmov 0   ;;  %v2597_v3 = vld [vmem:[%s3493_s3 + $0x70] ss:$8 sps:$4 sm:$0xff]   ;;  %s3508_s30 = smov (!%p526_p3, %s2287_s30), 1 }
   0xc   : > { %v2595_v1 = vld [vmem:[%s3491_s1 + $0xe4] ss:$16 sps:$4 sm:$0xff]   ;;  %710 = vmatprep.mubr.bf16.mxu0 %v2836_v2  ;;  %952 = vmatprep.mubr.bf16.mxu1 %v2836_v2  ;;  %v2598_v4 = vld [vmem:[%s3491_s1 + $0xe0] ss:$16 sps:$4 sm:$0xff]   ;;  %s2997_s17 = sshll.u32 %s3508_s30, 3  ;;  %vm723_vm0 = vcmask 1040384  }
   0xd   : > { %678 = vmatprep.subr.bf16.mxu0 %v2593_v0  ;;  %920 = vmatprep.subr.bf16.mxu1 %v2595_v1  ;;  %v2599_v5 = vld [vmem:[%s3493_s3 + $0x64] ss:$8 sps:$4 sm:$0xff]   ;;  %v2603_v7 = vld [vmem:[%s3493_s3 + $0x60] ss:$8 sps:$4 sm:$0xff]   ;;  %v2605_v9 = vld [vmem:[%s3493_s3 + $0x54] ss:$8 sps:$4 sm:$0xff]   ;;  %s530_s26 = scalar_lea.vmem %s3490_s0, %s2997_s17  ;;  %s540_s16 = scalar_lea.vmem %s3496_s6, %s2997_s17 }
   0xe   : > { %679 = vmatpush1.bf16.msra.mxu0 %v2597_v3  ;;  %921 = vmatpush1.bf16.msra.mxu1 %v2598_v4  ;;  %v2601_v6 = vld [vmem:[%s3491_s1 + $0xc4] ss:$16 sps:$4 sm:$0xff]   ;;  %v2604_v8 = vld [vmem:[%s3491_s1 + $0xc0] ss:$16 sps:$4 sm:$0xff]   ;;  %v2644_v34 = vld [vmem:[%s3491_s1 + $0xec] ss:$16 sps:$4 sm:$0xff]   ;;  %s535_s20 = scalar_lea.vmem %s3495_s5, %s2997_s17  ;;  %s545_s24 = scalar_lea.vmem %s3497_s7, %s2997_s17 }
   0xf   : > { %680 = vmatprep.subr.bf16.mxu0 %v2599_v5  ;;  %922 = vmatprep.subr.bf16.mxu1 %v2601_v6  ;;  %v2607_v10 = vld [vmem:[%s3491_s1 + $0xa4] ss:$16 sps:$4 sm:$0xff]   ;;  %v2609_v11 = vld [vmem:[%s3493_s3 + $0x50] ss:$8 sps:$4 sm:$0xff]   ;;  %v2615_v15 = vld [vmem:[%s3493_s3 + $0x40] ss:$8 sps:$4 sm:$0xff]  }
  0x10   : > { %v2610_v12 = vld [vmem:[%s3491_s1 + $0xa0] ss:$16 sps:$4 sm:$0xff]   ;;  %v2611_v13 = vld [vmem:[%s3493_s3 + $0x44] ss:$8 sps:$4 sm:$0xff]   ;;  %v2617_v17 = vld [vmem:[%s3493_s3 + $0x34] ss:$8 sps:$4 sm:$0xff]  }
  0x11   : > { %v2613_v14 = vld [vmem:[%s3491_s1 + $0x84] ss:$16 sps:$4 sm:$0xff]   ;;  %v2616_v16 = vld [vmem:[%s3491_s1 + $0x80] ss:$16 sps:$4 sm:$0xff]   ;;  %v2642_v36 = vld [vmem:[%s3491_s1 + $0xe8] ss:$16 sps:$4 sm:$0xff]  }
  0x12   : > { %681 = vmatpush1.bf16.msra.mxu0 %v2603_v7  ;;  %923 = vmatpush1.bf16.msra.mxu1 %v2604_v8  ;;  %v2619_v18 = vld [vmem:[%s3491_s1 + $0x64] ss:$16 sps:$4 sm:$0xff]   ;;  %v2621_v19 = vld [vmem:[%s3493_s3 + $0x30] ss:$8 sps:$4 sm:$0xff]   ;;  %v2627_v23 = vld [vmem:[%s3493_s3 + $0x20] ss:$8 sps:$4 sm:$0xff]  }
  0x13   : > { %682 = vmatprep.subr.bf16.mxu0 %v2605_v9  ;;  %924 = vmatprep.subr.bf16.mxu1 %v2607_v10  ;;  %v2622_v20 = vld [vmem:[%s3491_s1 + $0x60] ss:$16 sps:$4 sm:$0xff]   ;;  %v2623_v21 = vld [vmem:[%s3493_s3 + $0x24] ss:$8 sps:$4 sm:$0xff]   ;;  %v2629_v25 = vld [vmem:[%s3493_s3 + $0x14] ss:$8 sps:$4 sm:$0xff]  }
  0x14   : > { %v2625_v22 = vld [vmem:[%s3491_s1 + $0x44] ss:$16 sps:$4 sm:$0xff]   ;;  %v2628_v24 = vld [vmem:[%s3491_s1 + $0x40] ss:$16 sps:$4 sm:$0xff]   ;;  %vm3048_vm1 = vmneg %vm723_vm0  ;;  %vm1068_vm2 = vsmask.f32 7424 }
  0x15   : > { %v2631_v26 = vld [vmem:[%s3491_s1 + $0x24] ss:$16 sps:$4 sm:$0xff]   ;;  %v2633_v27 = vld [vmem:[%s3493_s3 + $0x10] ss:$8 sps:$4 sm:$0xff]   ;;  %v2639_v31 = vld [vmem:[%s3493_s3] ss:$8 sps:$4 sm:$0xff]  }
  0x16   : > { %683 = vmatpush1.bf16.msra.mxu0 %v2609_v11  ;;  %925 = vmatpush1.bf16.msra.mxu1 %v2610_v12  ;;  %v2634_v28 = vld [vmem:[%s3491_s1 + $0x20] ss:$16 sps:$4 sm:$0xff]   ;;  %v2635_v29 = vld [vmem:[%s3493_s3 + $0x4] ss:$8 sps:$4 sm:$0xff]   ;;  %v2648_v42 = vld [vmem:[%s3491_s1 + $0xc8] ss:$16 sps:$4 sm:$0xff]  }
  0x17   : > { %684 = vmatprep.subr.bf16.mxu0 %v2611_v13  ;;  %926 = vmatprep.subr.bf16.mxu1 %v2613_v14  ;;  %v2637_v30 = vld [vmem:[%s3491_s1 + $0x4] ss:$16 sps:$4 sm:$0xff]   ;;  %v2640_v33 = vld [vmem:[%s3491_s1] ss:$16 sps:$4 sm:$0xff]   ;;  %v2650_v40 = vld [vmem:[%s3491_s1 + $0xcc] ss:$16 sps:$4 sm:$0xff]  }
  0x18   : > { %v2641_v32 = vld [vmem:[%s530_s26] sm:$0xff]   ;;  %v2656_v44 = vld [vmem:[%s3491_s1 + $0xac] ss:$16 sps:$4 sm:$0xff]   ;;  %v2654_v46 = vld [vmem:[%s3491_s1 + $0xa8] ss:$16 sps:$4 sm:$0xff]   ;;  %vm1368_vm3 = vcmask 1046528  }
  0x19   : > { %v2647_v35 = vld [vmem:[%s3491_s1 + $0x1e4] ss:$16 sps:$4 sm:$0xff]   ;;  %v3042_v37 = vrot.slane %v2641_v32, 7  ;;  %v2645_v38 = vld [vmem:[%s3491_s1 + $0x1e0] ss:$16 sps:$4 sm:$0xff]   ;;  %vm2838_vm4 = vmmov 0  }
  0x1a   : > { %685 = vmatpush1.bf16.msra.mxu0 %v2615_v15  ;;  %927 = vmatpush1.bf16.msra.mxu1 %v2616_v16  ;;  %v2653_v41 = vld [vmem:[%s3491_s1 + $0x1c4] ss:$16 sps:$4 sm:$0xff]   ;;  %v2651_v43 = vld [vmem:[%s3491_s1 + $0x1c0] ss:$16 sps:$4 sm:$0xff]   ;;  %v2662_v48 = vld [vmem:[%s3491_s1 + $0x8c] ss:$16 sps:$4 sm:$0xff]  }
  0x1b   : > { %686 = vmatprep.subr.bf16.mxu0 %v2617_v17  ;;  %928 = vmatprep.subr.bf16.mxu1 %v2619_v18  ;;  %v2659_v45 = vld [vmem:[%s3491_s1 + $0x1a4] ss:$16 sps:$4 sm:$0xff]   ;;  %v2657_v47 = vld [vmem:[%s3491_s1 + $0x1a0] ss:$16 sps:$4 sm:$0xff]   ;;  %v2660_v50 = vld [vmem:[%s3491_s1 + $0x88] ss:$16 sps:$4 sm:$0xff]  }
  0x1c   : > { %v2665_v49 = vld [vmem:[%s3491_s1 + $0x184] ss:$16 sps:$4 sm:$0xff]   ;;  %v2663_v51 = vld [vmem:[%s3491_s1 + $0x180] ss:$16 sps:$4 sm:$0xff]   ;;  %v2668_v52 = vld [vmem:[%s3491_s1 + $0x6c] ss:$16 sps:$4 sm:$0xff]  }
  0x1d   : > { %v2671_v53 = vld [vmem:[%s3491_s1 + $0x164] ss:$16 sps:$4 sm:$0xff]   ;;  %v2666_v54 = vld [vmem:[%s3491_s1 + $0x68] ss:$16 sps:$4 sm:$0xff]   ;;  %v2669_v55 = vld [vmem:[%s3491_s1 + $0x160] ss:$16 sps:$4 sm:$0xff]  }
  0x1e   : > { %687 = vmatpush1.bf16.msra.mxu0 %v2621_v19  ;;  %929 = vmatpush1.bf16.msra.mxu1 %v2622_v20  ;;  %v3107_v56 = vsel %vm723_vm0, 0, %v3042_v37  ;;  %v2674_v57 = vld [vmem:[%s3491_s1 + $0x4c] ss:$16 sps:$4 sm:$0xff]   ;;  %v2677_v58 = vld [vmem:[%s3491_s1 + $0x144] ss:$16 sps:$4 sm:$0xff]   ;;  %v1075_v5 = vshll.u32 %v3042_v37, 16 }
  0x1f   : > { %688 = vmatprep.subr.bf16.mxu0 %v2623_v21  ;;  %930 = vmatprep.subr.bf16.mxu1 %v2625_v22  ;;  %v2672_v59 = vld [vmem:[%s3491_s1 + $0x48] ss:$16 sps:$4 sm:$0xff]   ;;  %v1071_v60 = vshll.u32 %v3107_v56, 16  ;;  %v2675_v61 = vld [vmem:[%s3491_s1 + $0x140] ss:$16 sps:$4 sm:$0xff]   ;;  %v1069_v0 = vshrl.u32 %v3107_v56, 16 }
  0x20   : > { %v2680_v62 = vld [vmem:[%s3491_s1 + $0x2c] ss:$16 sps:$4 sm:$0xff]   ;;  %v2683_v63 = vld [vmem:[%s3491_s1 + $0x124] ss:$16 sps:$4 sm:$0xff]   ;;  %v2678_v1 = vld [vmem:[%s3491_s1 + $0x28] ss:$16 sps:$4 sm:$0xff]  }
  0x21   : > { %v1073_v3 = vrot.slane %v1071_v60, 1  ;;  %v2681_v4 = vld [vmem:[%s3491_s1 + $0x120] ss:$16 sps:$4 sm:$0xff]   ;;  %v2686_v6 = vld [vmem:[%s3491_s1 + $0xc] ss:$16 sps:$4 sm:$0xff]   ;;  %v1077_v11 = vrot.slane %v1075_v5, 1 }
  0x22   : > { %689 = vmatpush1.bf16.msra.mxu0 %v2627_v23  ;;  %931 = vmatpush1.bf16.msra.mxu1 %v2628_v24  ;;  %v2689_v7 = vld [vmem:[%s3491_s1 + $0x104] ss:$16 sps:$4 sm:$0xff]   ;;  %v2684_v8 = vld [vmem:[%s3491_s1 + $0x8] ss:$16 sps:$4 sm:$0xff]   ;;  %v2687_v9 = vld [vmem:[%s3491_s1 + $0x100] ss:$16 sps:$4 sm:$0xff]  }
  0x23   : > { %690 = vmatprep.subr.bf16.mxu0 %v2629_v25  ;;  %932 = vmatprep.subr.bf16.mxu1 %v2631_v26  ;;  %v1074_v10 = vor.u32 %v1073_v3, %v1069_v0  ;;  %v2692_v12 = vld [vmem:[%s3491_s1 + $0x1ec] ss:$16 sps:$4 sm:$0xff]   ;;  %v2695_v13 = vld [vmem:[%s3491_s1 + $0x2e4] ss:$16 sps:$4 sm:$0xff]   ;;  %v2690_v14 = vld [vmem:[%s3491_s1 + $0x1e8] ss:$16 sps:$4 sm:$0xff]  }
  0x24   : > { %v2693_v15 = vld [vmem:[%s3491_s1 + $0x2e0] ss:$16 sps:$4 sm:$0xff]   ;;  %v2698_v17 = vld [vmem:[%s3491_s1 + $0x1cc] ss:$16 sps:$4 sm:$0xff]   ;;  %v2701_v18 = vld [vmem:[%s3491_s1 + $0x2c4] ss:$16 sps:$4 sm:$0xff]  }
  0x25   : > { %v3160_v16 = vsel %vm1068_vm2, %v1074_v10, %v1077_v11  ;;  %v2696_v19 = vld [vmem:[%s3491_s1 + $0x1c8] ss:$16 sps:$4 sm:$0xff]   ;;  %v2699_v20 = vld [vmem:[%s3491_s1 + $0x2c0] ss:$16 sps:$4 sm:$0xff]   ;;  %v2704_v21 = vld [vmem:[%s3491_s1 + $0x1ac] ss:$16 sps:$4 sm:$0xff]  }
  0x26   : > { %691 = vmatpush1.bf16.msra.mxu0 %v2633_v27  ;;  %933 = vmatpush1.bf16.msra.mxu1 %v2634_v28  ;;  %v2707_v22 = vld [vmem:[%s3491_s1 + $0x2a4] ss:$16 sps:$4 sm:$0xff]   ;;  %v2702_v23 = vld [vmem:[%s3491_s1 + $0x1a8] ss:$16 sps:$4 sm:$0xff]   ;;  %v2705_v24 = vld [vmem:[%s3491_s1 + $0x2a0] ss:$16 sps:$4 sm:$0xff]  }
  0x27   : > { %692 = vmatprep.subr.bf16.mxu0 %v2635_v29  ;;  %934 = vmatprep.subr.bf16.mxu1 %v2637_v30  ;;  %v2710_v25 = vld [vmem:[%s3491_s1 + $0x18c] ss:$16 sps:$4 sm:$0xff]   ;;  %v2713_v26 = vld [vmem:[%s3491_s1 + $0x284] ss:$16 sps:$4 sm:$0xff]   ;;  %v2708_v27 = vld [vmem:[%s3491_s1 + $0x188] ss:$16 sps:$4 sm:$0xff]  }
  0x28   : > { %v2711_v28 = vld [vmem:[%s3491_s1 + $0x280] ss:$16 sps:$4 sm:$0xff]   ;;  %v2716_v29 = vld [vmem:[%s3491_s1 + $0x16c] ss:$16 sps:$4 sm:$0xff]   ;;  %v2719_v30 = vld [vmem:[%s3491_s1 + $0x264] ss:$16 sps:$4 sm:$0xff]  }
  0x29   : > { %v2731_v39 = vld [vmem:[%s3491_s1 + $0x224] ss:$16 sps:$4 sm:$0xff]   ;;  %v2758_v60 = vld [vmem:[%s3491_s1 + $0x22c] ss:$16 sps:$4 sm:$0xff]   ;;  %vm1893_vm5 = vcmask 130048   ;;  %s3446_s25 = sshll.u32 %s3508_s30, 4 }
  0x2a   : > { %693 = vmatpush1.bf16.msra.mxu0 %v2639_v31  ;;  %935 = vmatpush1.bf16.msra.mxu1 %v2640_v33  ;;  %v2714_v31 = vld [vmem:[%s3491_s1 + $0x168] ss:$16 sps:$4 sm:$0xff]   ;;  %v2722_v33 = vld [vmem:[%s3491_s1 + $0x14c] ss:$16 sps:$4 sm:$0xff]   ;;  %v2764_v3 = vld [vmem:[%s3498_s8 + $0x70] sm:$0xff]   ;;  %s550_s15 = scalar_lea.vmem %s3502_s12, %s3446_s25  ;;  %s560_s19 = scalar_lea.vmem %s3504_s14, %s3446_s25 }
  0x2b   : > { %963 = vmatprep.subr.bf16.mxu0 %v2644_v34  ;;  %1240 = vmatprep.subr.bf16.mxu1 %v2647_v35  ;;  %v2725_v34 = vld [vmem:[%s3491_s1 + $0x244] ss:$16 sps:$4 sm:$0xff]   ;;  %v2720_v35 = vld [vmem:[%s3491_s1 + $0x148] ss:$16 sps:$4 sm:$0xff]  }
  0x2c   : > { %v2762_v0 = vld [vmem:[%s3498_s8 + $0x78] sm:$0xff]   ;;  %v2767_v5 = vld [vmem:[%s3498_s8 + $0x28] sm:$0xff]   ;;  %v2772_v10 = vld [vmem:[%s3498_s8 + $0x50] sm:$0xff]  }
  0x2d   : > { %711 = vmatmul.mubr.bf16.vlgmr.msra.gmra.mxu0 %v2641_v32  ;;  %2356 = vmatmul.mubr.msk.bf16.vlgmr.msra.gmra.mxu1 %vm3048_vm1, %v3042_v37  ;;  %v2717_v32 = vld [vmem:[%s3491_s1 + $0x260] ss:$16 sps:$4 sm:$0xff]  }
  0x2e   : > { %964 = vmatpush1.bf16.msra.mxu0 %v2642_v36  ;;  %1241 = vmatpush1.bf16.msra.mxu1 %v2645_v38  ;;  %v2723_v36 = vld [vmem:[%s3491_s1 + $0x240] ss:$16 sps:$4 sm:$0xff]   ;;  %v2728_v38 = vld [vmem:[%s3491_s1 + $0x12c] ss:$16 sps:$4 sm:$0xff]  }
  0x2f   : > { %965 = vmatprep.subr.bf16.mxu0 %v2650_v40  ;;  %1242 = vmatprep.subr.bf16.mxu1 %v2653_v41  ;;  %v2726_v40 = vld [vmem:[%s3491_s1 + $0x128] ss:$16 sps:$4 sm:$0xff]   ;;  %v2729_v41 = vld [vmem:[%s3491_s1 + $0x220] ss:$16 sps:$4 sm:$0xff]  }
  0x30   : > { %995 = vmatprep.mubr.bf16.mxu0 %v2836_v2  ;;  %1272 = vmatprep.mubr.bf16.mxu1 %v2836_v2  ;;  %v2773_v11 = vld [vmem:[%s3498_s8 + $0x10] sm:$0xff]  }
  0x32   : > { %966 = vmatpush1.bf16.msra.mxu0 %v2648_v42  ;;  %1243 = vmatpush1.bf16.msra.mxu1 %v2651_v43  ;;  %v2734_v42 = vld [vmem:[%s3491_s1 + $0x10c] ss:$16 sps:$4 sm:$0xff]   ;;  %v2737_v43 = vld [vmem:[%s3491_s1 + $0x204] ss:$16 sps:$4 sm:$0xff]  }
  0x33   : > { %967 = vmatprep.subr.bf16.mxu0 %v2656_v44  ;;  %1244 = vmatprep.subr.bf16.mxu1 %v2659_v45  ;;  %v2732_v44 = vld [vmem:[%s3491_s1 + $0x108] ss:$16 sps:$4 sm:$0xff]   ;;  %v1369_v45 = vrot.slane %v3107_v56, 1  ;;  %v2752_v56 = vld [vmem:[%s3491_s1 + $0x26c] ss:$16 sps:$4 sm:$0xff]  }
  0x36   : > { %968 = vmatpush1.bf16.msra.mxu0 %v2654_v46  ;;  %1245 = vmatpush1.bf16.msra.mxu1 %v2657_v47  ;;  %v2735_v46 = vld [vmem:[%s3491_s1 + $0x200] ss:$16 sps:$4 sm:$0xff]   ;;  %v1370_v47 = vrot.slane %v3042_v37, 1 }
  0x37   : > { %969 = vmatprep.subr.bf16.mxu0 %v2662_v48  ;;  %1246 = vmatprep.subr.bf16.mxu1 %v2665_v49  ;;  %v2740_v48 = vld [vmem:[%s3491_s1 + $0x2ec] ss:$16 sps:$4 sm:$0xff]  }
  0x38   : > { %v1371_v49 = vsel %vm1368_vm3, %v1369_v45, %v1370_v47 }
  0x3a   : > { %970 = vmatpush1.bf16.msra.mxu0 %v2660_v50  ;;  %1247 = vmatpush1.bf16.msra.mxu1 %v2663_v51  ;;  %v2738_v50 = vld [vmem:[%s3491_s1 + $0x2e8] ss:$16 sps:$4 sm:$0xff]   ;;  %v2743_v51 = vld [vmem:[%s3491_s1 + $0x2cc] ss:$16 sps:$4 sm:$0xff]  }
  0x3b   : > { %971 = vmatprep.subr.bf16.mxu0 %v2668_v52  ;;  %1248 = vmatprep.subr.bf16.mxu1 %v2671_v53  ;;  %v2746_v52 = vld [vmem:[%s3491_s1 + $0x2ac] ss:$16 sps:$4 sm:$0xff]   ;;  %v2744_v53 = vld [vmem:[%s3491_s1 + $0x2a8] ss:$16 sps:$4 sm:$0xff]  }
  0x3e   : > { %972 = vmatpush1.bf16.msra.mxu0 %v2666_v54  ;;  %1249 = vmatpush1.bf16.msra.mxu1 %v2669_v55  ;;  %v2749_v54 = vld [vmem:[%s3491_s1 + $0x28c] ss:$16 sps:$4 sm:$0xff]   ;;  %v2747_v55 = vld [vmem:[%s3491_s1 + $0x288] ss:$16 sps:$4 sm:$0xff]  }
  0x3f   : > { %973 = vmatprep.subr.bf16.mxu0 %v2674_v57  ;;  %1250 = vmatprep.subr.bf16.mxu1 %v2677_v58  ;;  %v2750_v57 = vld [vmem:[%s3491_s1 + $0x268] ss:$16 sps:$4 sm:$0xff]   ;;  %v2755_v58 = vld [vmem:[%s3491_s1 + $0x24c] ss:$16 sps:$4 sm:$0xff]  }
  0x42   : > { %974 = vmatpush1.bf16.msra.mxu0 %v2672_v59  ;;  %1251 = vmatpush1.bf16.msra.mxu1 %v2675_v61  ;;  %v2753_v59 = vld [vmem:[%s3491_s1 + $0x248] ss:$16 sps:$4 sm:$0xff]  }
  0x43   : > { %975 = vmatprep.subr.bf16.mxu0 %v2680_v62  ;;  %1252 = vmatprep.subr.bf16.mxu1 %v2683_v63  ;;  %v2756_v61 = vld [vmem:[%s3491_s1 + $0x228] ss:$16 sps:$4 sm:$0xff]   ;;  %v2761_v62 = vld [vmem:[%s3491_s1 + $0x20c] ss:$16 sps:$4 sm:$0xff]  }
  0x44   : > { %v2759_v63 = vld [vmem:[%s3491_s1 + $0x208] ss:$16 sps:$4 sm:$0xff]  }
  0x46   : > { %976 = vmatpush1.bf16.msra.mxu0 %v2678_v1  ;;  %1253 = vmatpush1.bf16.msra.mxu1 %v2681_v4  ;;  %v2763_v1 = vld [vmem:[%s3498_s8 + $0x38] sm:$0xff]   ;;  %v2765_v4 = vld [vmem:[%s3498_s8 + $0x30] sm:$0xff]  }
  0x47   : > { %977 = vmatprep.subr.bf16.mxu0 %v2686_v6  ;;  %1254 = vmatprep.subr.bf16.mxu1 %v2689_v7  ;;  %v2768_v6 = vld [vmem:[%s3498_s8 + $0x60] sm:$0xff]  }
  0x48   : > { %v2769_v7 = vld [vmem:[%s3498_s8 + $0x20] sm:$0xff]  }
  0x4a   : > { %978 = vmatpush1.bf16.msra.mxu0 %v2684_v8  ;;  %1255 = vmatpush1.bf16.msra.mxu1 %v2687_v9  ;;  %v2770_v8 = vld [vmem:[%s3498_s8 + $0x58] sm:$0xff]  }
  0x4b   : > { %1283 = vmatprep.subr.bf16.mxu0 %v2692_v12  ;;  %1533 = vmatprep.subr.bf16.mxu1 %v2695_v13  ;;  %v2771_v9 = vld [vmem:[%s3498_s8 + $0x18] sm:$0xff]   ;;  %v2774_v12 = vld [vmem:[%s3498_s8 + $0x48] sm:$0xff]  }
  0x4c   : > { %v2775_v13 = vld [vmem:[%s3498_s8 + $0x8] sm:$0xff]  }
  0x4d   : > { %2358 = vmatmul.mubr.msk.bf16.vlgmr.msra.gmra.mxu0 %vm3048_vm1, %v3042_v37  ;;  %1273 = vmatmul.mubr.bf16.vlgmr.msra.gmra.mxu1 %v3160_v16  ;;  %v2741_v37 = vld [vmem:[%s3491_s1 + $0x2c8] ss:$16 sps:$4 sm:$0xff]  }
  0x4e   : > { %1284 = vmatpush1.bf16.msra.mxu0 %v2690_v14  ;;  %1534 = vmatpush1.bf16.msra.mxu1 %v2693_v15  ;;  %v2776_v14 = vld [vmem:[%s3498_s8 + $0x40] sm:$0xff]  }
  0x4f   : > { %1285 = vmatprep.subr.bf16.mxu0 %v2698_v17  ;;  %1535 = vmatprep.subr.bf16.mxu1 %v2701_v18  ;;  %v2777_v15 = vld [vmem:[%s3498_s8] sm:$0xff]  }
  0x50   : > { %1315 = vmatprep.mubr.bf16.mxu0 %v2836_v2  ;;  %1565 = vmatprep.mubr.bf16.mxu1 %v2836_v2 }
  0x52   : > { %1286 = vmatpush1.bf16.msra.mxu0 %v2696_v19  ;;  %1536 = vmatpush1.bf16.msra.mxu1 %v2699_v20 }
  0x53   : > { %1287 = vmatprep.subr.bf16.mxu0 %v2704_v21  ;;  %1537 = vmatprep.subr.bf16.mxu1 %v2707_v22 }
  0x56   : > { %1288 = vmatpush1.bf16.msra.mxu0 %v2702_v23  ;;  %1538 = vmatpush1.bf16.msra.mxu1 %v2705_v24  ;;  %v582_v23 = vlaneseq }
  0x57   : > { %1289 = vmatprep.subr.bf16.mxu0 %v2710_v25  ;;  %1539 = vmatprep.subr.bf16.mxu1 %v2713_v26 }
  0x58   : > { %v583_v26 = vshrl.u32 %v582_v23, 7 }
  0x5a   : > { %1290 = vmatpush1.bf16.msra.mxu0 %v2708_v27  ;;  %1540 = vmatpush1.bf16.msra.mxu1 %v2711_v28  ;;  %v1017_v27 = vsub.s32 2, %v583_v26  ;;  %v721_v28 = vld [vmem:[%s3492_s2] sm:$0xf] }
  0x5b   : > { %1291 = vmatprep.subr.bf16.mxu0 %v2716_v29  ;;  %1541 = vmatprep.subr.bf16.mxu1 %v2719_v30  ;;  %v1021_v30 = vsub.s32 3, %v583_v26 }
  0x5e   : > { %1292 = vmatpush1.bf16.msra.mxu0 %v2714_v31  ;;  %1542 = vmatpush1.bf16.msra.mxu1 %v2717_v32  ;;  %v1018_v32 = vrot.slane %v721_v28, %v1017_v27 }
  0x5f   : > { %1293 = vmatprep.subr.bf16.mxu0 %v2722_v33  ;;  %1543 = vmatprep.subr.bf16.mxu1 %v2725_v34  ;;  %v1022_v34 = vrot.slane %v721_v28, %v1021_v30 }
  0x62   : > { %1294 = vmatpush1.bf16.msra.mxu0 %v2720_v35  ;;  %1544 = vmatpush1.bf16.msra.mxu1 %v2723_v36 }
  0x63   : > { %1295 = vmatprep.subr.bf16.mxu0 %v2728_v38  ;;  %1545 = vmatprep.subr.bf16.mxu1 %v2731_v39 }
  0x66   : > { %1296 = vmatpush1.bf16.msra.mxu0 %v2726_v40  ;;  %1546 = vmatpush1.bf16.msra.mxu1 %v2729_v41 }
  0x67   : > { %1297 = vmatprep.subr.bf16.mxu0 %v2734_v42  ;;  %1547 = vmatprep.subr.bf16.mxu1 %v2737_v43 }
  0x6a   : > { %1298 = vmatpush1.bf16.msra.mxu0 %v2732_v44  ;;  %1548 = vmatpush1.bf16.msra.mxu1 %v2735_v46 }
  0x6b   : > { %1576 = vmatprep.subr.bf16.mxu0 %v2740_v48  ;;  %2544 = vmatprep.subr.bf16.mxu1 %v2762_v0 }
  0x6d   : > { %1316 = vmatmul.mubr.bf16.vlgmr.msra.gmra.mxu0 %v3160_v16  ;;  %1566 = vmatmul.mubr.bf16.vlgmr.msra.gmra.mxu1 %v1371_v49 }
  0x6e   : > { %1577 = vmatpush1.bf16.msra.mxu0 %v2738_v50  ;;  %1608 = vmatprep.mubr.bf16.mxu0 %v2836_v2 }
  0x6f   : > { %1578 = vmatprep.subr.bf16.mxu0 %v2743_v51  ;;  %2545 = vmatpush3.bf16.msra.mxu1 %v2763_v1 }
  0x70   : > { %2546 = vmatprep.subr.bf16.mxu1 %v2764_v3 }
  0x72   : > { %1579 = vmatpush1.bf16.msra.mxu0 %v2741_v37 }
  0x73   : > { %1580 = vmatprep.subr.bf16.mxu0 %v2746_v52  ;;  %2547 = vmatpush3.bf16.msra.mxu1 %v2765_v4 }
  0x76   : > { %1581 = vmatpush1.bf16.msra.mxu0 %v2744_v53 }
  0x77   : > { %1582 = vmatprep.subr.bf16.mxu0 %v2749_v54 }
  0x7a   : > { %1583 = vmatpush1.bf16.msra.mxu0 %v2747_v55 }
  0x7b   : > { %1584 = vmatprep.subr.bf16.mxu0 %v2752_v56 }
  0x7e   : > { %1585 = vmatpush1.bf16.msra.mxu0 %v2750_v57 }
  0x7f   : > { %1586 = vmatprep.subr.bf16.mxu0 %v2755_v58 }
  0x82   : > { %1587 = vmatpush1.bf16.msra.mxu0 %v2753_v59 }
  0x83   : > { %1588 = vmatprep.subr.bf16.mxu0 %v2758_v60 }
  0x86   : > { %1589 = vmatpush1.bf16.msra.mxu0 %v2756_v61 }
  0x87   : > { %1590 = vmatprep.subr.bf16.mxu0 %v2761_v62 }
  0x8a   : > { %1591 = vmatpush1.bf16.msra.mxu0 %v2759_v63 }
  0x8d   : > { %1609 = vmatmul.mubr.bf16.vlgmr.msra.gmra.mxu0 %v1371_v49 }
  0x8e   : > { %2108 = vmatprep.mubr.bf16.mxu0 %v2836_v2  ;;  %v2766_v2 = vld [vmem:[%s3498_s8 + $0x68] sm:$0xff]  }
  0x8f   : > { %2548 = vmatprep.subr.bf16.mxu1 %v2766_v2 }
  0x90   : > { %2549 = vmatpush3.bf16.msra.mxu1 %v2767_v5 }
  0x91   : > { %2550 = vmatprep.subr.bf16.mxu1 %v2768_v6  ;;  %v3364_v6 = vsub.s32 0, %v583_v26 }
  0x94   : > { %2551 = vmatpush3.bf16.msra.mxu1 %v2769_v7 }
  0x95   : > { %2552 = vmatprep.subr.bf16.mxu1 %v2770_v8  ;;  %v3366_v8 = vsub.s32 1, %v583_v26 }
  0x98   : > { %2553 = vmatpush3.bf16.msra.mxu1 %v2771_v9 }
  0x99   : > { %2554 = vmatprep.subr.bf16.mxu1 %v2772_v10  ;;  %v1010_v10 = vrot.slane %v721_v28, %v3364_v6 }
  0x9c   : > { %2555 = vmatpush3.bf16.msra.mxu1 %v2773_v11  ;;  %v1014_v11 = vrot.slane %v721_v28, %v3366_v8 }
  0x9d   : > { %2556 = vmatprep.subr.bf16.mxu1 %v2774_v12 }
  0xa0   : > { %2557 = vmatpush3.bf16.msra.mxu1 %v2775_v13 }
  0xa1   : > { %2558 = vmatprep.subr.bf16.mxu1 %v2776_v14 }
  0xa4   : > { %2559 = vmatpush3.bf16.msra.mxu1 %v2777_v15 }
  0xed   : > { %v3353_v16 = vpop.f32.mrf.mxu0  ;;  %v954_v31 = vpop.f32.mrf.mxu1 }
  0xef   : > { %v3355_v17 = vpop.f32.mrf.mxu0  ;;  %v956_v35 = vpop.f32.mrf.mxu1 }
  0xf0   : > { %v1028_v14 = vadd.f32 %v1014_v11, %v956_v35 }
  0xf1   : > { %v3357_v18 = vpop.f32.mrf.mxu0  ;;  %v958_v41 = vpop.f32.mrf.mxu1 }
  0xf2   : > { %v1031_v13 = vadd.f32 %v1010_v10, %v958_v41 }
  0xf3   : > { %v3359_v19 = vpop.f32.mrf.mxu0  ;;  %v960_v51 = vpop.f32.mrf.mxu1 }
  0xf4   : > { %v1032_v15 = vadd.f32 %v1014_v11, %v960_v51 }
 0x10d   : > { %v997_v20 = vpop.f32.mrf.mxu0  ;;  %v1274_v58 = vpop.f32.mrf.mxu1 }
 0x10e   : > { %v1029_v36 = vadd.f32 %v1018_v32, %v997_v20  ;;  %v1027_v20 = vadd.f32 %v1010_v10, %v954_v31 }
 0x10f   : > { %v999_v21 = vpop.f32.mrf.mxu0  ;;  %v1276_v60 = vpop.f32.mrf.mxu1 }
 0x110   : > { %v1030_v39 = vadd.f32 %v1022_v34, %v999_v21  ;;  %v1327_v23 = vadd.f32 %v1276_v60, %v1028_v14  ;;  %v2779_v14 = vld [vmem:[%s545_s24] sm:$0xff]  }
 0x111   : > { %v1001_v22 = vpop.f32.mrf.mxu0  ;;  %v1278_v61 = vpop.f32.mrf.mxu1 }
 0x112   : > { %v1033_v43 = vadd.f32 %v1018_v32, %v1001_v22  ;;  %v1330_v22 = vadd.f32 %v1278_v61, %v1031_v13 }
 0x113   : > { %v1003_v24 = vpop.f32.mrf.mxu0  ;;  %v1280_v0 = vpop.f32.mrf.mxu1 }
 0x114   : > { %v1034_v47 = vadd.f32 %v1022_v34, %v1003_v24  ;;  %v1331_v24 = vadd.f32 %v1280_v0, %v1032_v15  ;;  %v2780_v15 = vld [vmem:[%s3500_s10 + $0x70] ss:$8 sps:$4 sm:$0xff]  }
 0x12d   : > { %v1317_v25 = vpop.f32.mrf.mxu0  ;;  %v1567_v7 = vpop.f32.mrf.mxu1 }
 0x12e   : > { %v1328_v40 = vadd.f32 %v1317_v25, %v1029_v36  ;;  %v1326_v25 = vadd.f32 %v1274_v58, %v1027_v20  ;;  %v2782_v20 = vld [vmem:[%s3500_s10 + $0x74] ss:$8 sps:$4 sm:$0xff]  }
 0x12f   : > { %v1319_v29 = vpop.f32.mrf.mxu0  ;;  %v1569_v12 = vpop.f32.mrf.mxu1  ;;  %2076 = vmatprep.subr.bf16.mxu0 %v2782_v20 }
 0x130   : > { %v1329_v44 = vadd.f32 %v1319_v29, %v1030_v39  ;;  %v1619_v36 = vadd.f32 %v1567_v7, %v1326_v25  ;;  %2077 = vmatpush1.bf16.msra.mxu0 %v2780_v15  ;;  %v2791_v25 = vld [vmem:[%s3500_s10 + $0x44] ss:$8 sps:$4 sm:$0xff]  }
 0x131   : > { %v1321_v33 = vpop.f32.mrf.mxu0  ;;  %v1571_v21 = vpop.f32.mrf.mxu1 }
 0x132   : > { %v1332_v48 = vadd.f32 %v1321_v33, %v1033_v43  ;;  %v1623_v30 = vadd.f32 %v1571_v21, %v1330_v22  ;;  %v1620_v33 = vadd.f32 %v1569_v12, %v1327_v23  ;;  %v2837_v43 = vmov 0.0   ;;  %v2785_v21 = vld [vmem:[%s3500_s10 + $0x64] ss:$8 sps:$4 sm:$0xff]   ;;  %v2783_v22 = vld [vmem:[%s3500_s10 + $0x60] ss:$8 sps:$4 sm:$0xff]  }
 0x133   : > { %v1323_v38 = vpop.f32.mrf.mxu0  ;;  %v1573_v26 = vpop.f32.mrf.mxu1  ;;  %2570 = vmatprep.subr.bf16.mxu1 %v2837_v43  ;;  %2078 = vmatprep.subr.bf16.mxu0 %v2785_v21  ;;  %v2788_v23 = vld [vmem:[%s3500_s10 + $0x54] ss:$8 sps:$4 sm:$0xff]  }
 0x134   : > { %v1333_v52 = vadd.f32 %v1323_v38, %v1034_v47  ;;  %v1624_v34 = vadd.f32 %v1573_v26, %v1331_v24  ;;  %v2541_v47 = vld [vmem:[%s535_s20] sm:$0xff]   ;;  %2079 = vmatpush1.bf16.msra.mxu0 %v2783_v22  ;;  %v2786_v24 = vld [vmem:[%s3500_s10 + $0x50] ss:$8 sps:$4 sm:$0xff]  }
 0x135   : > { %v2542_v51 = vunpack.c.l.bf16 %v2541_v47  ;;  %2080 = vmatprep.subr.bf16.mxu0 %v2788_v23  ;;  %v2789_v26 = vld [vmem:[%s3500_s10 + $0x40] ss:$8 sps:$4 sm:$0xff]  }
 0x138   : > { %2081 = vmatpush1.bf16.msra.mxu0 %v2786_v24 }
 0x139   : > { %2082 = vmatprep.subr.bf16.mxu0 %v2791_v25 }
 0x13c   : > { %2083 = vmatpush1.bf16.msra.mxu0 %v2789_v26 }
 0x14d   : > { %v1610_v42 = vpop.f32.mrf.mxu0 }
 0x14e   : > { %v1621_v45 = vadd.f32 %v1610_v42, %v1328_v40  ;;  %v2778_v42 = vld [vmem:[%s540_s16] sm:$0xff]  }
 0x14f   : > { %v1612_v46 = vpop.f32.mrf.mxu0 }
 0x150   : > { %v2487_v49 = vmul.f32 -1.442695, %v1621_v45  ;;  %v1622_v50 = vadd.f32 %v1612_v46, %v1329_v44  ;;  %v2491_v45 = vld [vmem:[%s3499_s9] ss:$0 sm:$0xff] }
 0x151   : > { %v1614_v37 = vpop.f32.mrf.mxu0 }
 0x152   : > { %v2488_v53 = vmul.f32 -1.442695, %v1622_v50  ;;  %v1625_v54 = vadd.f32 %v1614_v37, %v1332_v48  ;;  %2804 = vpow2.f32 %v2487_v49 }
 0x153   : > { %v1616_v55 = vpop.f32.mrf.mxu0 }
 0x154   : > { %2806 = vpow2.f32 %v2488_v53  ;;  %v2489_v56 = vmul.f32 -1.442695, %v1625_v54  ;;  %v1626_v57 = vadd.f32 %v1616_v55, %v1333_v52  ;;  %v2543_v53 = vunpack.c.h.bf16 %v2541_v47 }
 0x156   : > { %2808 = vpow2.f32 %v2489_v56  ;;  %v2490_v59 = vmul.f32 -1.442695, %v1626_v57 }
 0x158   : > { %2810 = vpow2.f32 %v2490_v59 }
 0x15f   : > { %v2805_v62 = vpop.eup %2804 }
 0x160   : > { %v1639_v4 = vadd.f32 1.0, %v2805_v62 }
 0x161   : > { %v2807_v63 = vpop.eup %2806 }
 0x162   : > { %v1640_v1 = vadd.f32 1.0, %v2807_v63 }
 0x163   : > { %v2809_v3 = vpop.eup %2808 }
 0x164   : > { %v1641_v2 = vadd.f32 1.0, %v2809_v3  ;;  %2812 = vrcp.f32 %v1640_v1 }
 0x165   : > { %v2811_v5 = vpop.eup %2810 }
 0x166   : > { %2814 = vrcp.f32 %v1641_v2  ;;  %v1642_v9 = vadd.f32 1.0, %v2811_v5 }
 0x167   : > { %2816 = vrcp.f32 %v1639_v4 }
 0x168   : > { %2818 = vrcp.f32 %v1642_v9 }
 0x171   : > { %v2813_v27 = vpop.eup %2812 }
 0x172   : > { %v3372_v35 = vmul.f32 %v2813_v27, %v1620_v33  ;;  %v2794_v27 = vld [vmem:[%s3500_s10 + $0x34] ss:$8 sps:$4 sm:$0xff]  }
 0x173   : > { %v2815_v29 = vpop.eup %2814  ;;  %2084 = vmatprep.subr.bf16.mxu0 %v2794_v27  ;;  %v2800_v33 = vld [vmem:[%s3500_s10 + $0x14] ss:$8 sps:$4 sm:$0xff]  }
 0x174   : > { %v2817_v32 = vpop.eup %2816  ;;  %v3370_v38 = vmul.f32 %v2815_v29, %v1623_v30  ;;  %v2792_v29 = vld [vmem:[%s3500_s10 + $0x30] ss:$8 sps:$4 sm:$0xff]   ;;  %v2797_v30 = vld [vmem:[%s3500_s10 + $0x24] ss:$8 sps:$4 sm:$0xff]  }
 0x175   : > { %v2819_v28 = vpop.eup %2818  ;;  %v3376_v39 = vmul.f32 %v2817_v32, %v1619_v36  ;;  %2085 = vmatpush1.bf16.msra.mxu0 %v2792_v29  ;;  %v2795_v32 = vld [vmem:[%s3500_s10 + $0x20] ss:$8 sps:$4 sm:$0xff]  }
 0x176   : > { %v3374_v31 = vmul.f32 %v2819_v28, %v1624_v34  ;;  %2086 = vmatprep.subr.bf16.mxu0 %v2797_v30  ;;  %v2798_v34 = vld [vmem:[%s3500_s10 + $0x10] ss:$8 sps:$4 sm:$0xff]  }
 0x177   : > { %v1687_v41 = vpack.c.bf16 %v3370_v38, %v3376_v39 }
 0x178   : > { %v1688_v40 = vpack.c.bf16 %v3374_v31, %v3372_v35 }
 0x179   : > { %2087 = vmatpush1.bf16.msra.mxu0 %v2795_v32 }
 0x17a   : > { %1824 = vmatprep.mubr.bf16.mxu1 %v1688_v40  ;;  %2088 = vmatprep.subr.bf16.mxu0 %v2800_v33 }
 0x17b   : > { %1825 = vmatmul.mubr.bf16.vlgmr.msra.gmra.mxu1 %v1687_v41  ;;  %v2123_v41 = vld [vmem:[%s550_s15] sm:$0xff] }
 0x17c   : > { %2571 = vmatpush3.bf16.xpose.msra.mxu1 %v2778_v42  ;;  %2572 = vmatprep.mubr.msk.bf16.mxu1 %vm2838_vm4, %v2837_v43 }
 0x17d   : > { %2576 = vmatprep.subr.bf16.mxu1 %v2837_v43  ;;  %2089 = vmatpush1.bf16.msra.mxu0 %v2798_v34 }
 0x23b   : > { %v2560_v44 = vpop.f32.mrf.mxu1 }
 0x23d   : > { %v2561_v46 = vpop.f32.mrf.mxu1 }
 0x23e   : > { %v2562_v48 = vadd.f32 %v2561_v46, %v2560_v44 }
 0x23f   : > { %v2563_v49 = vpop.f32.mrf.mxu1 }
 0x240   : > { %v1827_v50 = vadd.f32 %v2562_v48, %v2491_v45 }
 0x241   : > { %v2564_v37 = vpop.f32.mrf.mxu1 }
 0x242   : > { %v2565_v52 = vadd.f32 %v2564_v37, %v2563_v49  ;;  %v1837_v54 = vadd.f32 %v2542_v51, %v1827_v50  ;;  %v2803_v49 = vld [vmem:[%s3500_s10 + $0x4] ss:$8 sps:$4 sm:$0xff]   ;;  %v2801_v50 = vld [vmem:[%s3500_s10] ss:$8 sps:$4 sm:$0xff]  }
 0x243   : > { %2090 = vmatprep.subr.bf16.mxu0 %v2803_v49 }
 0x244   : > { %v1830_v55 = vadd.f32 %v2565_v52, %v2491_v45  ;;  %v1839_v57 = vmul.f32 0.088388346, %v1837_v54  ;;  %2091 = vmatpush1.bf16.msra.mxu0 %v2801_v50 }
 0x246   : > { %v1838_v56 = vadd.f32 %v2543_v53, %v1830_v55  ;;  %v1984_v55 = vld [vmem:[%s3501_s11] sm:$0x3] }
 0x248   : > { %v1840_v58 = vmul.f32 0.088388346, %v1838_v56  ;;  %v580_v56 = vld [vmem:[%s3494_s4] sm:$0x3] }
 0x24a   : > { %v1845_v59 = vpack.c.bf16 %v1840_v58, %v1839_v57  ;;  %v1989_v57 = vrot.slane %v1984_v55, %v3364_v6  ;;  %v585_v58 = vrot.slane %v580_v56, %v3364_v6 }
 0x24c   : > { %2573 = vmatmul.mubr.bf16.vlgmr.msra.gmra.mxu1 %v1845_v59  ;;  %v1993_v59 = vrot.slane %v1984_v55, %v3366_v8 }
 0x24d   : > { %2578 = vmatprep.mubr.msk.bf16.mxu1 %vm2838_vm4, %v2837_v43  ;;  %2577 = vmatpush3.bf16.msra.mxu1 %v2779_v14  ;;  %v2124_v43 = vld [vmem:[%s550_s15 + $0x8] sm:$0xff]  ;;  %s555_s15 = scalar_lea.vmem %s3503_s13, %s3446_s25 }
 0x30c   : > { %v1886_v60 = vpop.f32.mrf.mxu1 }
 0x30d   : > { %v1894_v61 = vsel %vm1893_vm5, %v1886_v60, -inf }
 0x30e   : > { %1895 = vmax.xlane.f32.xlu0 %v1894_v61  ;;  %v2574_v62 = vpop.f32.mrf.mxu1  ;;  %v589_v61 = vrot.slane %v580_v56, %v3366_v8 }
 0x310   : > { %v1889_v63 = vpop.f32.mrf.mxu1 }
 0x311   : > { %v1897_v0 = vsel %vm1893_vm5, %v1889_v63, -inf }
 0x312   : > { %1898 = vmax.xlane.f32.xlu0 %v1897_v0  ;;  %v2575_v1 = vpop.f32.mrf.mxu1  ;;  %v713_v0 = vadd.f32 %v3353_v16, %v585_v58  ;;  %v719_v16 = vadd.f32 %v3359_v19, %v589_v61 }
 0x397   : > { %v1896_v3 = vpop.xlane.xlu0 %1895 }
 0x398   : > { %v1900_v4 = vsub.f32 %v1886_v60, %v1896_v3 }
 0x39a   : > { %v1902_v2 = vmul.f32 1.442695, %v1900_v4 }
 0x39b   : > { %v1899_v5 = vpop.xlane.xlu0 %1898 }
 0x39c   : > { %2820 = vpow2.f32 %v1902_v2  ;;  %v1901_v7 = vsub.f32 %v1889_v63, %v1899_v5  ;;  %v715_v2 = vadd.f32 %v3355_v17, %v589_v61 }
 0x39e   : > { %v1904_v9 = vmul.f32 1.442695, %v1901_v7 }
 0x3a0   : > { %2822 = vpow2.f32 %v1904_v9 }
 0x3a9   : > { %v2821_v10 = vpop.eup %2820 }
 0x3aa   : > { %v1906_v11 = vsel %vm1893_vm5, %v2821_v10, 0.0 }
 0x3ab   : > { %1907 = vadd.xlane.f32.xlu1 %v1906_v11 }
 0x3ad   : > { %v2823_v12 = vpop.eup %2822 }
 0x3ae   : > { %v1909_v13 = vsel %vm1893_vm5, %v2823_v12, 0.0 }
 0x3af   : > { %1910 = vadd.xlane.f32.xlu1 %v1909_v13 }
 0x434   : > { %v1908_v28 = vpop.xlane.xlu1 %1907 }
 0x435   : > { %2824 = vrcp.f32 %v1908_v28 }
 0x438   : > { %v1911_v36 = vpop.xlane.xlu1 %1910 }
 0x439   : > { %2826 = vrcp.f32 %v1911_v36 }
 0x442   : > { %v2825_v40 = vpop.eup %2824 }
 0x443   : > { %v1914_v42 = vmul.f32 %v2825_v40, %v2821_v10  ;;  %v717_v10 = vadd.f32 %v3357_v18, %v585_v58 }
 0x445   : > { %v2125_v44 = vadd.f32 %v2123_v41, %v1914_v42 }
 0x446   : > { %v2827_v45 = vpop.eup %2826 }
 0x447   : > { %v1915_v46 = vmul.f32 %v2827_v45, %v2823_v12  ;;  %2127 = vst.msk [vmem:[%s560_s19] sm:$0xff] %vm1893_vm5, %v2125_v44 }
 0x449   : > { %v1916_v47 = vpack.c.bf16 %v1915_v46, %v1914_v42  ;;  %v2126_v48 = vadd.f32 %v2124_v43, %v1915_v46 }
 0x44b   : > { %2579 = vmatmul.mubr.msk.bf16.vlgmr.msra.gmra.mxu1 %vm1893_vm5, %v1916_v47  ;;  %2128 = vst.msk [vmem:[%s560_s19 + $0x8] sm:$0xff] %vm1893_vm5, %v2126_v48 }
 0x50b   : > { %v1960_v51 = vpop.f32.mrf.mxu1 }
 0x50d   : > { %v2580_v37 = vpop.f32.mrf.mxu1 }
 0x50f   : > { %v1963_v52 = vpop.f32.mrf.mxu1 }
 0x510   : > { %v1983_v53 = vpack.c.bf16 %v1963_v52, %v1960_v51 }
 0x511   : > { %v2581_v54 = vpop.f32.mrf.mxu1 }
 0x512   : > { %2109 = vmatmul.mubr.bf16.vlgmr.msra.gmra.mxu0 %v1983_v53 }
 0x5d2   : > { %v2110_v60 = vpop.f32.mrf.mxu0 }
 0x5d3   : > { %v2111_v62 = vadd.f32 %v2110_v60, %v1989_v57 }
 0x5d4   : > { %v2112_v63 = vpop.f32.mrf.mxu0 }
 0x5d5   : > { %v2119_v1 = vadd.f32 %v2111_v62, %v3376_v39  ;;  %v2113_v3 = vadd.f32 %v2112_v63, %v1993_v59 }
 0x5d6   : > { %v2114_v4 = vpop.f32.mrf.mxu0 }
 0x5d7   : > { %v2129_v5 = vadd.f32 %v2119_v1, %v713_v0  ;;  %v2120_v7 = vadd.f32 %v2113_v3, %v3372_v35  ;;  %v2115_v6 = vadd.f32 %v2114_v4, %v1989_v57 }
 0x5d8   : > { %v2116_v9 = vpop.f32.mrf.mxu0 }
 0x5d9   : > { %v2130_v11 = vadd.f32 %v2120_v7, %v715_v2  ;;  %v2121_v8 = vadd.f32 %v2115_v6, %v3370_v38  ;;  %v2117_v12 = vadd.f32 %v2116_v9, %v1993_v59  ;;  %v2133_v13 = vmul.f32 0.70710677, %v2129_v5 }
 0x5db   : > { %v2134_v39 = vmul.f32 0.70710677, %v2130_v11  ;;  %v2131_v14 = vadd.f32 %v2121_v8, %v717_v10  ;;  %v2122_v15 = vadd.f32 %v2117_v12, %v3374_v31 }
 0x5dd   : > { %v2538_v17 = vpack.c.bf16 %v2134_v39, %v2133_v13  ;;  %v2132_v35 = vadd.f32 %v2122_v15, %v719_v16  ;;  %v2135_v20 = vmul.f32 0.70710677, %v2131_v14 }
 0x5df   : > { %2149 = vst [vmem:[%s555_s15] sm:$0xff] %v2538_v17  ;;  %v2136_v18 = vmul.f32 0.70710677, %v2132_v35 }
 0x5e1   : > { %v2539_v21 = vpack.c.bf16 %v2136_v18, %v2135_v20 }
 0x5e3   : > { %2150 = vst [vmem:[%s555_s15 + $0x8] sm:$0xff] %v2539_v21 }
 0x5e4 PF: > { %s25_s29 = sadd.s32 1, %s2834_s29  }
 0x5e5   : > { %p22_p4 = scmp.ge.s32.totalorder %s25_s29, 4  }
 0x5e7   :  { %24 = sbr.rel (!%p22_p4) target bundleno = 1 (0x1), region = 128 }

// kernel: conv_decoder_forward.10
= control target key start
LH: loop header
LB: loop body
LE: loop exit
PB: predicated region body
PF: predicated region fallthrough
CT: control target
= control target key end

     0   :  { %s442_s1 = inlined_call_operand.vmem [shape: bf16[256,128], index: 1, kind: input, shape index: {}]   ;;  %s443_s0 = inlined_call_operand.vmem [shape: bf16[32,256], index: 0, kind: input, shape index: {}]   ;;  %s444_s2 = inlined_call_operand.vmem [shape: f32[1,128], index: 2, kind: input, shape index: {}]   ;;  %s445_s3 = inlined_call_operand.vmem [shape: bf16[32,128], index: 3, kind: output, shape index: {}]  }
   0x1   :  { %v331_v0 = vld [vmem:[%s442_s1 + $0x78] sm:$0xff]   ;;  %v333_v2 = vld [vmem:[%s442_s1 + $0x70] sm:$0xff]   ;;  %v335_v4 = vld [vmem:[%s442_s1 + $0x68] sm:$0xff]  }
   0x2   :  { %v332_v1 = vld [vmem:[%s442_s1 + $0x38] sm:$0xff]   ;;  %287 = vmatprep.subr.bf16.mxu0 %v331_v0  ;;  %315 = vmatprep.subr.bf16.mxu1 %v331_v0  ;;  %v334_v3 = vld [vmem:[%s442_s1 + $0x30] sm:$0xff]   ;;  %v336_v5 = vld [vmem:[%s442_s1 + $0x28] sm:$0xff]  }
   0x3   :  { %288 = vmatpush3.bf16.msra.mxu0 %v332_v1  ;;  %323 = vmatpush3.bf16.msra.mxu1 %v332_v1  ;;  %v337_v6 = vld [vmem:[%s442_s1 + $0x60] sm:$0xff]   ;;  %v339_v8 = vld [vmem:[%s442_s1 + $0x58] sm:$0xff]   ;;  %v341_v10 = vld [vmem:[%s442_s1 + $0x50] sm:$0xff]  }
   0x4   :  { %289 = vmatprep.subr.bf16.mxu0 %v333_v2  ;;  %316 = vmatprep.subr.bf16.mxu1 %v333_v2  ;;  %v338_v7 = vld [vmem:[%s442_s1 + $0x20] sm:$0xff]   ;;  %v340_v9 = vld [vmem:[%s442_s1 + $0x18] sm:$0xff]   ;;  %v342_v13 = vld [vmem:[%s442_s1 + $0x10] sm:$0xff]  }
   0x5   :  { %v349_v11 = vld [vmem:[%s443_s0 + $0x4] ss:$8 sps:$4 sm:$0xff]   ;;  %v352_v12 = vld [vmem:[%s443_s0 + $0x14] ss:$8 sps:$4 sm:$0xff]   ;;  %v347_v18 = vld [vmem:[%s443_s0] ss:$8 sps:$4 sm:$0xff]  }
   0x6   :  { %v343_v14 = vld [vmem:[%s442_s1 + $0x48] sm:$0xff]   ;;  %206 = vmatprep.mubr.bf16.mxu0 %v349_v11  ;;  %214 = vmatprep.mubr.bf16.mxu1 %v352_v12  ;;  %v345_v16 = vld [vmem:[%s442_s1 + $0x40] sm:$0xff]   ;;  %v350_v19 = vld [vmem:[%s443_s0 + $0x10] ss:$8 sps:$4 sm:$0xff]  }
   0x7   :  { %290 = vmatpush3.bf16.msra.mxu0 %v334_v3  ;;  %324 = vmatpush3.bf16.msra.mxu1 %v334_v3  ;;  %v344_v15 = vld [vmem:[%s442_s1 + $0x8] sm:$0xff]   ;;  %v346_v17 = vld [vmem:[%s442_s1] sm:$0xff]  }
   0x8   :  { %291 = vmatprep.subr.bf16.mxu0 %v335_v4  ;;  %317 = vmatprep.subr.bf16.mxu1 %v335_v4  ;;  %v247_v28 = vld [vmem:[%s444_s2] ss:$0 sm:$0xff] }
   0xb   :  { %292 = vmatpush3.bf16.msra.mxu0 %v336_v5  ;;  %325 = vmatpush3.bf16.msra.mxu1 %v336_v5 }
   0xc   :  { %293 = vmatprep.subr.bf16.mxu0 %v337_v6  ;;  %318 = vmatprep.subr.bf16.mxu1 %v337_v6 }
   0xf   :  { %294 = vmatpush3.bf16.msra.mxu0 %v338_v7  ;;  %326 = vmatpush3.bf16.msra.mxu1 %v338_v7 }
  0x10   :  { %295 = vmatprep.subr.bf16.mxu0 %v339_v8  ;;  %319 = vmatprep.subr.bf16.mxu1 %v339_v8 }
  0x13   :  { %296 = vmatpush3.bf16.msra.mxu0 %v340_v9  ;;  %327 = vmatpush3.bf16.msra.mxu1 %v340_v9 }
  0x14   :  { %297 = vmatprep.subr.bf16.mxu0 %v341_v10  ;;  %320 = vmatprep.subr.bf16.mxu1 %v341_v10 }
  0x17   :  { %298 = vmatpush3.bf16.msra.mxu0 %v342_v13  ;;  %328 = vmatpush3.bf16.msra.mxu1 %v342_v13 }
  0x18   :  { %299 = vmatprep.subr.bf16.mxu0 %v343_v14  ;;  %321 = vmatprep.subr.bf16.mxu1 %v343_v14 }
  0x1b   :  { %300 = vmatpush3.bf16.msra.mxu0 %v344_v15  ;;  %329 = vmatpush3.bf16.msra.mxu1 %v344_v15 }
  0x1c   :  { %301 = vmatprep.subr.bf16.mxu0 %v345_v16  ;;  %322 = vmatprep.subr.bf16.mxu1 %v345_v16 }
  0x1f   :  { %302 = vmatpush3.bf16.msra.mxu0 %v346_v17  ;;  %330 = vmatpush3.bf16.msra.mxu1 %v346_v17 }
  0x22   :  { %207 = vmatmul.mubr.bf16.vlgmr.msra.gmra.mxu0 %v347_v18  ;;  %215 = vmatmul.mubr.bf16.vlgmr.msra.gmra.mxu1 %v350_v19 }
  0xe2   :  { %v303_v20 = vpop.f32.mrf.mxu0  ;;  %v309_v21 = vpop.f32.mrf.mxu1 }
  0xe4   :  { %v304_v22 = vpop.f32.mrf.mxu0  ;;  %v310_v23 = vpop.f32.mrf.mxu1 }
  0xe5   :  { %v305_v26 = vadd.f32 %v304_v22, %v303_v20  ;;  %v311_v27 = vadd.f32 %v310_v23, %v309_v21 }
  0xe6   :  { %v306_v24 = vpop.f32.mrf.mxu0  ;;  %v312_v25 = vpop.f32.mrf.mxu1 }
  0xe7   :  { %v209_v33 = vadd.f32 %v305_v26, %v247_v28  ;;  %v217_v34 = vadd.f32 %v311_v27, %v247_v28 }
  0xe8   :  { %v307_v29 = vpop.f32.mrf.mxu0  ;;  %v313_v30 = vpop.f32.mrf.mxu1 }
  0xe9   :  { %v308_v31 = vadd.f32 %v307_v29, %v306_v24  ;;  %v314_v32 = vadd.f32 %v313_v30, %v312_v25 }
  0xeb   :  { %v212_v35 = vadd.f32 %v308_v31, %v247_v28  ;;  %v220_v36 = vadd.f32 %v314_v32, %v247_v28 }
  0xed   :  { %v279_v37 = vpack.c.bf16 %v212_v35, %v209_v33  ;;  %v284_v38 = vpack.c.bf16 %v220_v36, %v217_v34 }
  0xef   :  { %280 = vst [vmem:[%s445_s3] sm:$0xff] %v279_v37   ;;  %286 = vst [vmem:[%s445_s3 + $0x8] sm:$0xff] %v284_v38  }

// kernel: conv_decoder_forward.9
= control target key start
LH: loop header
LB: loop body
LE: loop exit
PB: predicated region body
PF: predicated region fallthrough
CT: control target
= control target key end

     0   :  { %s3573_s21 = smov 0   ;;  %s4394_s0 = inlined_call_operand.vmem [shape: bf16[2,16,256], index: 0, kind: input, shape index: {}]   ;;  %s4395_s1 = inlined_call_operand.vmem [shape: bf16[3,256,512], index: 1, kind: input, shape index: {}]   ;;  %s4396_s2 = inlined_call_operand.vmem [shape: f32[1,512], index: 2, kind: input, shape index: {}]   ;;  %s4397_s3 = inlined_call_operand.vmem [shape: bf16[2,16,128], index: 3, kind: input, shape index: {}]   ;;  %s4398_s4 = inlined_call_operand.vmem [shape: bf16[2,16,128], index: 4, kind: input, shape index: {}]   ;;  %s4399_s5 = inlined_call_operand.vmem [shape: bf16[2,16,128], index: 5, kind: input, shape index: {}]   ;;  %s4400_s6 = inlined_call_operand.vmem [shape: bf16[256,128], index: 6, kind: input, shape index: {}]   ;;  %s4401_s7 = inlined_call_operand.vmem [shape: f32[1,128], index: 7, kind: input, shape index: {}]   ;;  %s4402_s8 = inlined_call_operand.vmem [shape: bf16[128,256], index: 8, kind: input, shape index: {}]   ;;  %s4403_s9 = inlined_call_operand.vmem [shape: f32[1,256], index: 9, kind: input, shape index: {}]   ;;  %s4404_s10 = inlined_call_operand.vmem [shape: f32[2,16,16], index: 10, kind: input, shape index: {}, may-alias: {10,12}]   ;;  %s4405_s11 = inlined_call_operand.vmem [shape: bf16[2,16,256], index: 11, kind: output, shape index: {0}]   ;;  %s4406_s12 = inlined_call_operand.vmem [shape: f32[2,16,16], index: 12, kind: output, shape index: {1}, may-alias: {10,12}]  }
   0x1 LB: > { %s2684_s22 = sadd.s32 4294967295, %s3503_s21   ;;  %p2688_p0 = scmp.ge.s32.totalorder %s3503_s21, 1  ;;  %s3503_s21 = sphi %s3573_s21, %s23_s21  }
   0x2   : > { %p405_p1 = scmp.lt.s32.totalorder %s3503_s21, 3 }
   0x4   : > { %p406_p2 = pnand %p2688_p0, %p405_p1 }
   0x5   : > { %p472_p3 = scmp.lt.s32.totalorder (!%p406_p2), %s2684_s22, 1 }
   0x6   : > { %409 = sbr.rel (%p406_p2) target bundleno = 1571 (0x623), region = 64 }
   0xb   : > { %v3139_v0 = vld [vmem:[%s4395_s1 + $0xe4] ss:$16 sps:$4 sm:$0xff]   ;;  %v3141_v1 = vld [vmem:[%s4395_s1 + $0xec] ss:$16 sps:$4 sm:$0xff]   ;;  %v3143_v2 = vld [vmem:[%s4395_s1 + $0xe0] ss:$16 sps:$4 sm:$0xff]  }
   0xc   : > { %917 = vmatprep.subr.bf16.mxu0 %v3139_v0  ;;  %v3144_v3 = vld [vmem:[%s4395_s1 + $0xe8] ss:$16 sps:$4 sm:$0xff]   ;;  %960 = vmatprep.subr.bf16.mxu1 %v3141_v1  ;;  %v3145_v4 = vld [vmem:[%s4395_s1 + $0xc4] ss:$16 sps:$4 sm:$0xff]   ;;  %v3147_v5 = vld [vmem:[%s4395_s1 + $0xcc] ss:$16 sps:$4 sm:$0xff]  }
   0xd   : > { %918 = vmatpush1.bf16.msra.mxu0 %v3143_v2  ;;  %961 = vmatpush1.bf16.msra.mxu1 %v3144_v3  ;;  %v3149_v6 = vld [vmem:[%s4395_s1 + $0xc0] ss:$16 sps:$4 sm:$0xff]   ;;  %v3150_v7 = vld [vmem:[%s4395_s1 + $0xc8] ss:$16 sps:$4 sm:$0xff]   ;;  %v3151_v8 = vld [vmem:[%s4395_s1 + $0xa4] ss:$16 sps:$4 sm:$0xff]  }
   0xe   : > { %919 = vmatprep.subr.bf16.mxu0 %v3145_v4  ;;  %962 = vmatprep.subr.bf16.mxu1 %v3147_v5  ;;  %v3153_v9 = vld [vmem:[%s4395_s1 + $0xac] ss:$16 sps:$4 sm:$0xff]   ;;  %v3155_v10 = vld [vmem:[%s4395_s1 + $0xa0] ss:$16 sps:$4 sm:$0xff]   ;;  %v3156_v11 = vld [vmem:[%s4395_s1 + $0xa8] ss:$16 sps:$4 sm:$0xff]  }
   0xf   : > { %v3157_v12 = vld [vmem:[%s4395_s1 + $0x84] ss:$16 sps:$4 sm:$0xff]   ;;  %v3159_v13 = vld [vmem:[%s4395_s1 + $0x8c] ss:$16 sps:$4 sm:$0xff]   ;;  %v3161_v14 = vld [vmem:[%s4395_s1 + $0x80] ss:$16 sps:$4 sm:$0xff]  }
  0x10   : > { %v3162_v15 = vld [vmem:[%s4395_s1 + $0x88] ss:$16 sps:$4 sm:$0xff]   ;;  %v3163_v16 = vld [vmem:[%s4395_s1 + $0x64] ss:$16 sps:$4 sm:$0xff]   ;;  %v3165_v17 = vld [vmem:[%s4395_s1 + $0x6c] ss:$16 sps:$4 sm:$0xff]  }
  0x11   : > { %920 = vmatpush1.bf16.msra.mxu0 %v3149_v6  ;;  %963 = vmatpush1.bf16.msra.mxu1 %v3150_v7  ;;  %v3167_v18 = vld [vmem:[%s4395_s1 + $0x60] ss:$16 sps:$4 sm:$0xff]   ;;  %v3168_v19 = vld [vmem:[%s4395_s1 + $0x68] ss:$16 sps:$4 sm:$0xff]   ;;  %v3169_v20 = vld [vmem:[%s4395_s1 + $0x44] ss:$16 sps:$4 sm:$0xff]  }
  0x12   : > { %921 = vmatprep.subr.bf16.mxu0 %v3151_v8  ;;  %964 = vmatprep.subr.bf16.mxu1 %v3153_v9  ;;  %v3171_v21 = vld [vmem:[%s4395_s1 + $0x4c] ss:$16 sps:$4 sm:$0xff]   ;;  %v3173_v22 = vld [vmem:[%s4395_s1 + $0x40] ss:$16 sps:$4 sm:$0xff]   ;;  %v3174_v23 = vld [vmem:[%s4395_s1 + $0x48] ss:$16 sps:$4 sm:$0xff]  }
  0x13   : > { %v3175_v24 = vld [vmem:[%s4395_s1 + $0x24] ss:$16 sps:$4 sm:$0xff]   ;;  %v3177_v25 = vld [vmem:[%s4395_s1 + $0x2c] ss:$16 sps:$4 sm:$0xff]   ;;  %v3179_v26 = vld [vmem:[%s4395_s1 + $0x20] ss:$16 sps:$4 sm:$0xff]  }
  0x14   : > { %v3180_v27 = vld [vmem:[%s4395_s1 + $0x28] ss:$16 sps:$4 sm:$0xff]   ;;  %v3181_v28 = vld [vmem:[%s4395_s1 + $0x4] ss:$16 sps:$4 sm:$0xff]   ;;  %v3183_v29 = vld [vmem:[%s4395_s1 + $0xc] ss:$16 sps:$4 sm:$0xff]  }
  0x15   : > { %922 = vmatpush1.bf16.msra.mxu0 %v3155_v10  ;;  %965 = vmatpush1.bf16.msra.mxu1 %v3156_v11  ;;  %v3185_v30 = vld [vmem:[%s4395_s1] ss:$16 sps:$4 sm:$0xff]   ;;  %v3186_v31 = vld [vmem:[%s4395_s1 + $0x8] ss:$16 sps:$4 sm:$0xff]   ;;  %v3187_v32 = vld [vmem:[%s4395_s1 + $0x1e4] ss:$16 sps:$4 sm:$0xff]  }
  0x16   : > { %923 = vmatprep.subr.bf16.mxu0 %v3157_v12  ;;  %966 = vmatprep.subr.bf16.mxu1 %v3159_v13  ;;  %v3189_v33 = vld [vmem:[%s4395_s1 + $0x1ec] ss:$16 sps:$4 sm:$0xff]   ;;  %v3191_v34 = vld [vmem:[%s4395_s1 + $0x1e0] ss:$16 sps:$4 sm:$0xff]   ;;  %v3192_v35 = vld [vmem:[%s4395_s1 + $0x1e8] ss:$16 sps:$4 sm:$0xff]  }
  0x17   : > { %v3193_v36 = vld [vmem:[%s4395_s1 + $0x1c4] ss:$16 sps:$4 sm:$0xff]   ;;  %s4410_s22 = smov (!%p472_p3, %s2684_s22), 1  ;;  %v3195_v37 = vld [vmem:[%s4395_s1 + $0x1cc] ss:$16 sps:$4 sm:$0xff]   ;;  %vm525_vm0 = vcmask 1040384  }
  0x18   : > { %v3197_v38 = vld [vmem:[%s4395_s1 + $0x1c0] ss:$16 sps:$4 sm:$0xff]   ;;  %v3198_v39 = vld [vmem:[%s4395_s1 + $0x1c8] ss:$16 sps:$4 sm:$0xff]   ;;  %v3199_v40 = vld [vmem:[%s4395_s1 + $0x1a4] ss:$16 sps:$4 sm:$0xff]  }
  0x19   : > { %924 = vmatpush1.bf16.msra.mxu0 %v3161_v14  ;;  %967 = vmatpush1.bf16.msra.mxu1 %v3162_v15  ;;  %s3711_s25 = sshll.u32 %s4410_s22, 4  ;;  %v3201_v41 = vld [vmem:[%s4395_s1 + $0x1ac] ss:$16 sps:$4 sm:$0xff]   ;;  %v3203_v42 = vld [vmem:[%s4395_s1 + $0x1a0] ss:$16 sps:$4 sm:$0xff]   ;;  %vm3754_vm1 = vmneg %vm525_vm0  ;;  %vm1601_vm3 = vcmask 1046528  }
  0x1a   : > { %925 = vmatprep.subr.bf16.mxu0 %v3163_v16  ;;  %968 = vmatprep.subr.bf16.mxu1 %v3165_v17  ;;  %v3204_v43 = vld [vmem:[%s4395_s1 + $0x1a8] ss:$16 sps:$4 sm:$0xff]   ;;  %s3726_s16 = scalar_lea.vmem %s4394_s0, %s3711_s25  ;;  %v3205_v44 = vld [vmem:[%s4395_s1 + $0x184] ss:$16 sps:$4 sm:$0xff]   ;;  %v3207_v45 = vld [vmem:[%s4395_s1 + $0x18c] ss:$16 sps:$4 sm:$0xff]   ;;  %s496_s30 = scalar_lea.vmem %s4404_s10, %s3711_s25 }
  0x1b   : > { %v508_v46 = vld [vmem:[%s3726_s16] sm:$0xff]  ;;  %v509_v48 = vld [vmem:[%s3726_s16 + $0x8] sm:$0xff]  ;;  %vm1097_vm2 = vsmask.f32 7424  ;;  %s4294_s28 = sshll.u32 %s4410_s22, 3  ;;  %vm3506_vm4 = vmmov 0   ;;  %s506_s14 = scalar_lea.vmem %s4406_s12, %s3711_s25 }
  0x1c   : > { %v3209_v47 = vld [vmem:[%s4395_s1 + $0x180] ss:$16 sps:$4 sm:$0xff]   ;;  %v3210_v49 = vld [vmem:[%s4395_s1 + $0x188] ss:$16 sps:$4 sm:$0xff]   ;;  %v3211_v50 = vld [vmem:[%s4395_s1 + $0x164] ss:$16 sps:$4 sm:$0xff]   ;;  %v2704_v51 = vcombine.high %v508_v46, %v509_v48  ;;  %v2703_v5 = vcombine.low %v508_v46, %v509_v48  ;;  %s486_s13 = scalar_lea.vmem %s4398_s4, %s4294_s28  ;;  %s481_s17 = scalar_lea.vmem %s4397_s3, %s4294_s28 }
  0x1d   : > { %926 = vmatpush1.bf16.msra.mxu0 %v3167_v18  ;;  %969 = vmatpush1.bf16.msra.mxu1 %v3168_v19  ;;  %v3213_v52 = vld [vmem:[%s4395_s1 + $0x16c] ss:$16 sps:$4 sm:$0xff]   ;;  %v3215_v54 = vld [vmem:[%s4395_s1 + $0x160] ss:$16 sps:$4 sm:$0xff]   ;;  %v3216_v56 = vld [vmem:[%s4395_s1 + $0x168] ss:$16 sps:$4 sm:$0xff]   ;;  %s491_s23 = scalar_lea.vmem %s4399_s5, %s4294_s28  ;;  %s501_s19 = scalar_lea.vmem %s4405_s11, %s3711_s25 }
  0x1e   : > { %927 = vmatprep.subr.bf16.mxu0 %v3169_v20  ;;  %970 = vmatprep.subr.bf16.mxu1 %v3171_v21  ;;  %v3748_v53 = vrot.slane %v2704_v51, 7  ;;  %v3217_v57 = vld [vmem:[%s4395_s1 + $0x144] ss:$16 sps:$4 sm:$0xff]   ;;  %v3219_v58 = vld [vmem:[%s4395_s1 + $0x14c] ss:$16 sps:$4 sm:$0xff]   ;;  %v3812_v13 = vrot.slane %v2703_v5, 7 }
  0x1f   : > { %v3221_v59 = vld [vmem:[%s4395_s1 + $0x140] ss:$16 sps:$4 sm:$0xff]   ;;  %v3222_v60 = vld [vmem:[%s4395_s1 + $0x148] ss:$16 sps:$4 sm:$0xff]   ;;  %v3223_v61 = vld [vmem:[%s4395_s1 + $0x124] ss:$16 sps:$4 sm:$0xff]  }
  0x20   : > { %2774 = vmatprep.mubr.msk.bf16.mxu1 %vm3754_vm1, %v3748_v53  ;;  %2770 = vmatprep.mubr.msk.bf16.mxu0 %vm3754_vm1, %v3748_v53  ;;  %v531_v62 = vsel %vm525_vm0, 0, %v3748_v53  ;;  %v3225_v63 = vld [vmem:[%s4395_s1 + $0x12c] ss:$16 sps:$4 sm:$0xff]   ;;  %v3227_v0 = vld [vmem:[%s4395_s1 + $0x120] ss:$16 sps:$4 sm:$0xff]   ;;  %v1114_v9 = vshll.u32 %v3748_v53, 16 }
  0x21   : > { %928 = vmatpush1.bf16.msra.mxu0 %v3173_v22  ;;  %971 = vmatpush1.bf16.msra.mxu1 %v3174_v23  ;;  %v1110_v1 = vshll.u32 %v531_v62, 16  ;;  %v3228_v2 = vld [vmem:[%s4395_s1 + $0x128] ss:$16 sps:$4 sm:$0xff]   ;;  %v3229_v3 = vld [vmem:[%s4395_s1 + $0x104] ss:$16 sps:$4 sm:$0xff]   ;;  %v1108_v7 = vshrl.u32 %v531_v62, 16 }
  0x22   : > { %929 = vmatprep.subr.bf16.mxu0 %v3175_v24  ;;  %972 = vmatprep.subr.bf16.mxu1 %v3177_v25  ;;  %v3231_v4 = vld [vmem:[%s4395_s1 + $0x10c] ss:$16 sps:$4 sm:$0xff]   ;;  %v3233_v6 = vld [vmem:[%s4395_s1 + $0x100] ss:$16 sps:$4 sm:$0xff]   ;;  %v3234_v10 = vld [vmem:[%s4395_s1 + $0x108] ss:$16 sps:$4 sm:$0xff]  }
  0x23   : > { %v1112_v8 = vrot.slane %v1110_v1, 1  ;;  %v3239_v11 = vld [vmem:[%s4395_s1 + $0x2e4] ss:$16 sps:$4 sm:$0xff]   ;;  %v3242_v12 = vld [vmem:[%s4395_s1 + $0x2ec] ss:$16 sps:$4 sm:$0xff]   ;;  %v1116_v17 = vrot.slane %v1114_v9, 1 }
  0x24   : > { %v3237_v14 = vld [vmem:[%s4395_s1 + $0x2e0] ss:$16 sps:$4 sm:$0xff]   ;;  %v3240_v15 = vld [vmem:[%s4395_s1 + $0x2e8] ss:$16 sps:$4 sm:$0xff]   ;;  %v1605_v18 = vrot.slane %v531_v62, 1  ;;  %v3822_v19 = vsel %vm525_vm0, 0, %v3812_v13 }
  0x25   : > { %930 = vmatpush1.bf16.msra.mxu0 %v3179_v26  ;;  %973 = vmatpush1.bf16.msra.mxu1 %v3180_v27  ;;  %v1113_v16 = vor.u32 %v1112_v8, %v1108_v7  ;;  %v3245_v20 = vld [vmem:[%s4395_s1 + $0x2c4] ss:$16 sps:$4 sm:$0xff]   ;;  %v3248_v21 = vld [vmem:[%s4395_s1 + $0x2cc] ss:$16 sps:$4 sm:$0xff]   ;;  %v1606_v22 = vrot.slane %v3748_v53, 1  ;;  %v1602_v23 = vrot.slane %v3822_v19, 1 }
  0x26   : > { %931 = vmatprep.subr.bf16.mxu0 %v3181_v28  ;;  %974 = vmatprep.subr.bf16.mxu1 %v3183_v29  ;;  %v1603_v24 = vrot.slane %v3812_v13, 1  ;;  %v3243_v25 = vld [vmem:[%s4395_s1 + $0x2c0] ss:$16 sps:$4 sm:$0xff]   ;;  %v3246_v28 = vld [vmem:[%s4395_s1 + $0x2c8] ss:$16 sps:$4 sm:$0xff]   ;;  %vm2290_vm5 = vcmask 130048  }
  0x27   : > { %v1117_v26 = vsel %vm1097_vm2, %v1113_v16, %v1116_v17  ;;  %v3844_v27 = vsel %vm1601_vm3, %v1605_v18, %v1606_v22  ;;  %v3251_v29 = vld [vmem:[%s4395_s1 + $0x2a4] ss:$16 sps:$4 sm:$0xff]   ;;  %v3273_v48 = vld [vmem:[%s4395_s1 + $0x220] ss:$16 sps:$4 sm:$0xff]   ;;  %v3284_v51 = vld [vmem:[%s4395_s1 + $0x20c] ss:$16 sps:$4 sm:$0xff]  }
  0x28   : > { %v3275_v46 = vld [vmem:[%s4395_s1 + $0x224] ss:$16 sps:$4 sm:$0xff]   ;;  %v3282_v53 = vld [vmem:[%s4395_s1 + $0x208] ss:$16 sps:$4 sm:$0xff]   ;;  %v3290_v55 = vld [vmem:[%s4395_s1 + $0x3ec] ss:$16 sps:$4 sm:$0xff]  }
  0x29   : > { %932 = vmatpush1.bf16.msra.mxu0 %v3185_v30  ;;  %975 = vmatpush1.bf16.msra.mxu1 %v3186_v31  ;;  %v3853_v30 = vsel %vm1601_vm3, %v1602_v23, %v1603_v24  ;;  %v3254_v31 = vld [vmem:[%s4395_s1 + $0x2ac] ss:$16 sps:$4 sm:$0xff]   ;;  %v3299_v62 = vld [vmem:[%s4395_s1 + $0x3a4] ss:$16 sps:$4 sm:$0xff]   ;;  %v3300_v1 = vld [vmem:[%s4395_s1 + $0x3a8] ss:$16 sps:$4 sm:$0xff]  }
  0x2a   : > { %933 = vmatprep.subr.bf16.mxu0 %v3187_v32  ;;  %976 = vmatprep.subr.bf16.mxu1 %v3189_v33  ;;  %v3249_v32 = vld [vmem:[%s4395_s1 + $0x2a0] ss:$16 sps:$4 sm:$0xff]   ;;  %v3252_v33 = vld [vmem:[%s4395_s1 + $0x2a8] ss:$16 sps:$4 sm:$0xff]   ;;  %v3314_v7 = vld [vmem:[%s4395_s1 + $0x36c] ss:$16 sps:$4 sm:$0xff]  }
  0x2b   : > { %v3306_v5 = vld [vmem:[%s4395_s1 + $0x388] ss:$16 sps:$4 sm:$0xff]   ;;  %v3309_v8 = vld [vmem:[%s4395_s1 + $0x360] ss:$16 sps:$4 sm:$0xff]   ;;  %v3323_v16 = vld [vmem:[%s4395_s1 + $0x324] ss:$16 sps:$4 sm:$0xff]  }
  0x2c   : > { %v3312_v9 = vld [vmem:[%s4395_s1 + $0x368] ss:$16 sps:$4 sm:$0xff]   ;;  %v3326_v17 = vld [vmem:[%s4395_s1 + $0x32c] ss:$16 sps:$4 sm:$0xff]   ;;  %v3321_v18 = vld [vmem:[%s4395_s1 + $0x320] ss:$16 sps:$4 sm:$0xff]  }
  0x2d   : > { %934 = vmatpush2.bf16.msra.mxu0 %v3191_v34  ;;  %977 = vmatpush2.bf16.msra.mxu1 %v3192_v35  ;;  %v3257_v34 = vld [vmem:[%s4395_s1 + $0x284] ss:$16 sps:$4 sm:$0xff]   ;;  %v3260_v35 = vld [vmem:[%s4395_s1 + $0x28c] ss:$16 sps:$4 sm:$0xff]   ;;  %v3324_v22 = vld [vmem:[%s4395_s1 + $0x328] ss:$16 sps:$4 sm:$0xff]  }
  0x2e   : > { %935 = vmatprep.subr.bf16.mxu0 %v3193_v36  ;;  %978 = vmatprep.subr.bf16.mxu1 %v3195_v37  ;;  %v3255_v36 = vld [vmem:[%s4395_s1 + $0x280] ss:$16 sps:$4 sm:$0xff]   ;;  %v3258_v37 = vld [vmem:[%s4395_s1 + $0x288] ss:$16 sps:$4 sm:$0xff]   ;;  %v3329_v23 = vld [vmem:[%s4395_s1 + $0x304] ss:$16 sps:$4 sm:$0xff]  }
  0x2f   : > { %v1104_v24 = vshll.u32 %v3812_v13, 16 }
  0x31   : > { %936 = vmatpush2.bf16.msra.mxu0 %v3197_v38  ;;  %979 = vmatpush2.bf16.msra.mxu1 %v3198_v39  ;;  %v3263_v38 = vld [vmem:[%s4395_s1 + $0x264] ss:$16 sps:$4 sm:$0xff]   ;;  %v3266_v39 = vld [vmem:[%s4395_s1 + $0x26c] ss:$16 sps:$4 sm:$0xff]  }
  0x32   : > { %937 = vmatprep.subr.bf16.mxu0 %v3199_v40  ;;  %980 = vmatprep.subr.bf16.mxu1 %v3201_v41  ;;  %v3261_v40 = vld [vmem:[%s4395_s1 + $0x260] ss:$16 sps:$4 sm:$0xff]   ;;  %v3264_v41 = vld [vmem:[%s4395_s1 + $0x268] ss:$16 sps:$4 sm:$0xff]  }
  0x35   : > { %938 = vmatpush2.bf16.msra.mxu0 %v3203_v42  ;;  %981 = vmatpush2.bf16.msra.mxu1 %v3204_v43  ;;  %v3269_v42 = vld [vmem:[%s4395_s1 + $0x244] ss:$16 sps:$4 sm:$0xff]   ;;  %v3272_v43 = vld [vmem:[%s4395_s1 + $0x24c] ss:$16 sps:$4 sm:$0xff]  }
  0x36   : > { %939 = vmatprep.subr.bf16.mxu0 %v3205_v44  ;;  %982 = vmatprep.subr.bf16.mxu1 %v3207_v45  ;;  %v3267_v44 = vld [vmem:[%s4395_s1 + $0x240] ss:$16 sps:$4 sm:$0xff]   ;;  %v3270_v45 = vld [vmem:[%s4395_s1 + $0x248] ss:$16 sps:$4 sm:$0xff]  }
  0x39   : > { %940 = vmatpush2.bf16.msra.mxu0 %v3209_v47  ;;  %983 = vmatpush2.bf16.msra.mxu1 %v3210_v49  ;;  %v3278_v47 = vld [vmem:[%s4395_s1 + $0x22c] ss:$16 sps:$4 sm:$0xff]   ;;  %v3276_v49 = vld [vmem:[%s4395_s1 + $0x228] ss:$16 sps:$4 sm:$0xff]  }
  0x3a   : > { %941 = vmatprep.subr.bf16.mxu0 %v3211_v50  ;;  %984 = vmatprep.subr.bf16.mxu1 %v3213_v52  ;;  %v3281_v50 = vld [vmem:[%s4395_s1 + $0x204] ss:$16 sps:$4 sm:$0xff]   ;;  %v3279_v52 = vld [vmem:[%s4395_s1 + $0x200] ss:$16 sps:$4 sm:$0xff]  }
  0x3d   : > { %942 = vmatpush2.bf16.msra.mxu0 %v3215_v54  ;;  %985 = vmatpush2.bf16.msra.mxu1 %v3216_v56  ;;  %v3287_v54 = vld [vmem:[%s4395_s1 + $0x3e4] ss:$16 sps:$4 sm:$0xff]   ;;  %v3285_v56 = vld [vmem:[%s4395_s1 + $0x3e0] ss:$16 sps:$4 sm:$0xff]  }
  0x3e   : > { %943 = vmatprep.subr.bf16.mxu0 %v3217_v57  ;;  %986 = vmatprep.subr.bf16.mxu1 %v3219_v58  ;;  %v3288_v57 = vld [vmem:[%s4395_s1 + $0x3e8] ss:$16 sps:$4 sm:$0xff]   ;;  %v3293_v58 = vld [vmem:[%s4395_s1 + $0x3c4] ss:$16 sps:$4 sm:$0xff]  }
  0x41   : > { %944 = vmatpush2.bf16.msra.mxu0 %v3221_v59  ;;  %987 = vmatpush2.bf16.msra.mxu1 %v3222_v60  ;;  %v3296_v59 = vld [vmem:[%s4395_s1 + $0x3cc] ss:$16 sps:$4 sm:$0xff]   ;;  %v3291_v60 = vld [vmem:[%s4395_s1 + $0x3c0] ss:$16 sps:$4 sm:$0xff]  }
  0x42   : > { %945 = vmatprep.subr.bf16.mxu0 %v3223_v61  ;;  %988 = vmatprep.subr.bf16.mxu1 %v3225_v63  ;;  %v3294_v61 = vld [vmem:[%s4395_s1 + $0x3c8] ss:$16 sps:$4 sm:$0xff]   ;;  %v3302_v63 = vld [vmem:[%s4395_s1 + $0x3ac] ss:$16 sps:$4 sm:$0xff]  }
  0x45   : > { %946 = vmatpush2.bf16.msra.mxu0 %v3227_v0  ;;  %989 = vmatpush2.bf16.msra.mxu1 %v3228_v2  ;;  %v3297_v0 = vld [vmem:[%s4395_s1 + $0x3a0] ss:$16 sps:$4 sm:$0xff]   ;;  %v3305_v2 = vld [vmem:[%s4395_s1 + $0x384] ss:$16 sps:$4 sm:$0xff]  }
  0x46   : > { %947 = vmatprep.subr.bf16.mxu0 %v3229_v3  ;;  %990 = vmatprep.subr.bf16.mxu1 %v3231_v4  ;;  %v3308_v3 = vld [vmem:[%s4395_s1 + $0x38c] ss:$16 sps:$4 sm:$0xff]   ;;  %v3303_v4 = vld [vmem:[%s4395_s1 + $0x380] ss:$16 sps:$4 sm:$0xff]  }
  0x49   : > { %948 = vmatpush2.bf16.msra.mxu0 %v3233_v6  ;;  %991 = vmatpush2.bf16.msra.mxu1 %v3234_v10  ;;  %v3311_v6 = vld [vmem:[%s4395_s1 + $0x364] ss:$16 sps:$4 sm:$0xff]  }
  0x4a   : > { %1440 = vmatprep.subr.bf16.mxu0 %v3239_v11  ;;  %1483 = vmatprep.subr.bf16.mxu1 %v3242_v12  ;;  %v3317_v10 = vld [vmem:[%s4395_s1 + $0x344] ss:$16 sps:$4 sm:$0xff]   ;;  %v3320_v11 = vld [vmem:[%s4395_s1 + $0x34c] ss:$16 sps:$4 sm:$0xff]   ;;  %v1100_v12 = vshll.u32 %v3822_v19, 16 }
  0x4c   : > { %2776 = vmatmul.mubr.msk.bf16.vlgmr.msra.gmra.mxu1 %vm3754_vm1, %v3812_v13  ;;  %2772 = vmatmul.mubr.msk.bf16.vlgmr.msra.gmra.mxu0 %vm3754_vm1, %v3812_v13  ;;  %v3335_v13 = vld [vmem:[%s4395_s1 + $0x4e4] ss:$16 sps:$4 sm:$0xff]  }
  0x4d   : > { %1441 = vmatpush1.bf16.msra.mxu0 %v3237_v14  ;;  %1484 = vmatpush1.bf16.msra.mxu1 %v3240_v15  ;;  %v3315_v14 = vld [vmem:[%s4395_s1 + $0x340] ss:$16 sps:$4 sm:$0xff]   ;;  %v3318_v15 = vld [vmem:[%s4395_s1 + $0x348] ss:$16 sps:$4 sm:$0xff]  }
  0x4e   : > { %1442 = vmatprep.subr.bf16.mxu0 %v3245_v20  ;;  %1485 = vmatprep.subr.bf16.mxu1 %v3248_v21  ;;  %v1098_v20 = vshrl.u32 %v3822_v19, 16  ;;  %v1102_v21 = vrot.slane %v1100_v12, 1  ;;  %v3327_v19 = vld [vmem:[%s4395_s1 + $0x300] ss:$16 sps:$4 sm:$0xff]  }
  0x4f   : > { %1472 = vmatprep.mubr.bf16.mxu0 %v1117_v26  ;;  %1515 = vmatprep.mubr.bf16.mxu1 %v1117_v26  ;;  %v3330_v26 = vld [vmem:[%s4395_s1 + $0x308] ss:$16 sps:$4 sm:$0xff]   ;;  %v3399_v12 = vld [vmem:[%s4395_s1 + $0x580] ss:$16 sps:$4 sm:$0xff]  }
  0x51   : > { %1443 = vmatpush1.bf16.msra.mxu0 %v3243_v25  ;;  %1486 = vmatpush1.bf16.msra.mxu1 %v3246_v28  ;;  %v3332_v25 = vld [vmem:[%s4395_s1 + $0x30c] ss:$16 sps:$4 sm:$0xff]   ;;  %v1103_v28 = vor.u32 %v1102_v21, %v1098_v20  ;;  %v3413_v20 = vld [vmem:[%s4395_s1 + $0x544] ss:$16 sps:$4 sm:$0xff]  }
  0x52   : > { %1444 = vmatprep.subr.bf16.mxu0 %v3251_v29  ;;  %1487 = vmatprep.subr.bf16.mxu1 %v3254_v31  ;;  %v1106_v29 = vrot.slane %v1104_v24, 1  ;;  %v3338_v31 = vld [vmem:[%s4395_s1 + $0x4ec] ss:$16 sps:$4 sm:$0xff]   ;;  %v3419_v24 = vld [vmem:[%s4395_s1 + $0x524] ss:$16 sps:$4 sm:$0xff]  }
  0x53   : > { %v3416_v21 = vld [vmem:[%s4395_s1 + $0x54c] ss:$16 sps:$4 sm:$0xff]  }
  0x55   : > { %1445 = vmatpush1.bf16.msra.mxu0 %v3249_v32  ;;  %1488 = vmatpush1.bf16.msra.mxu1 %v3252_v33  ;;  %v3333_v32 = vld [vmem:[%s4395_s1 + $0x4e0] ss:$16 sps:$4 sm:$0xff]   ;;  %v1107_v33 = vsel %vm1097_vm2, %v1103_v28, %v1106_v29  ;;  %v3425_v28 = vld [vmem:[%s4395_s1 + $0x504] ss:$16 sps:$4 sm:$0xff]   ;;  %v3428_v29 = vld [vmem:[%s4395_s1 + $0x50c] ss:$16 sps:$4 sm:$0xff]  }
  0x56   : > { %1446 = vmatprep.subr.bf16.mxu0 %v3257_v34  ;;  %1489 = vmatprep.subr.bf16.mxu1 %v3260_v35  ;;  %v3336_v34 = vld [vmem:[%s4395_s1 + $0x4e8] ss:$16 sps:$4 sm:$0xff]   ;;  %v3341_v35 = vld [vmem:[%s4395_s1 + $0x4c4] ss:$16 sps:$4 sm:$0xff]  }
  0x59   : > { %1447 = vmatpush1.bf16.msra.mxu0 %v3255_v36  ;;  %1490 = vmatpush1.bf16.msra.mxu1 %v3258_v37  ;;  %v3344_v36 = vld [vmem:[%s4395_s1 + $0x4cc] ss:$16 sps:$4 sm:$0xff]   ;;  %v3339_v37 = vld [vmem:[%s4395_s1 + $0x4c0] ss:$16 sps:$4 sm:$0xff]  }
  0x5a   : > { %1448 = vmatprep.subr.bf16.mxu0 %v3263_v38  ;;  %1491 = vmatprep.subr.bf16.mxu1 %v3266_v39  ;;  %v3342_v38 = vld [vmem:[%s4395_s1 + $0x4c8] ss:$16 sps:$4 sm:$0xff]   ;;  %v3347_v39 = vld [vmem:[%s4395_s1 + $0x4a4] ss:$16 sps:$4 sm:$0xff]  }
  0x5d   : > { %1449 = vmatpush1.bf16.msra.mxu0 %v3261_v40  ;;  %1492 = vmatpush1.bf16.msra.mxu1 %v3264_v41  ;;  %v3350_v40 = vld [vmem:[%s4395_s1 + $0x4ac] ss:$16 sps:$4 sm:$0xff]   ;;  %v3345_v41 = vld [vmem:[%s4395_s1 + $0x4a0] ss:$16 sps:$4 sm:$0xff]  }
  0x5e   : > { %1450 = vmatprep.subr.bf16.mxu0 %v3269_v42  ;;  %1493 = vmatprep.subr.bf16.mxu1 %v3272_v43  ;;  %v3348_v42 = vld [vmem:[%s4395_s1 + $0x4a8] ss:$16 sps:$4 sm:$0xff]   ;;  %v3353_v43 = vld [vmem:[%s4395_s1 + $0x484] ss:$16 sps:$4 sm:$0xff]  }
  0x61   : > { %1451 = vmatpush1.bf16.msra.mxu0 %v3267_v44  ;;  %1494 = vmatpush1.bf16.msra.mxu1 %v3270_v45  ;;  %v3356_v44 = vld [vmem:[%s4395_s1 + $0x48c] ss:$16 sps:$4 sm:$0xff]   ;;  %v3351_v45 = vld [vmem:[%s4395_s1 + $0x480] ss:$16 sps:$4 sm:$0xff]  }
  0x62   : > { %1452 = vmatprep.subr.bf16.mxu0 %v3275_v46  ;;  %1495 = vmatprep.subr.bf16.mxu1 %v3278_v47  ;;  %v3359_v46 = vld [vmem:[%s4395_s1 + $0x464] ss:$16 sps:$4 sm:$0xff]   ;;  %v3362_v47 = vld [vmem:[%s4395_s1 + $0x46c] ss:$16 sps:$4 sm:$0xff]  }
  0x65   : > { %1453 = vmatpush1.bf16.msra.mxu0 %v3273_v48  ;;  %1496 = vmatpush1.bf16.msra.mxu1 %v3276_v49  ;;  %v3357_v48 = vld [vmem:[%s4395_s1 + $0x460] ss:$16 sps:$4 sm:$0xff]   ;;  %v3360_v49 = vld [vmem:[%s4395_s1 + $0x468] ss:$16 sps:$4 sm:$0xff]  }
  0x66   : > { %1454 = vmatprep.subr.bf16.mxu0 %v3281_v50  ;;  %1497 = vmatprep.subr.bf16.mxu1 %v3284_v51  ;;  %v3365_v50 = vld [vmem:[%s4395_s1 + $0x444] ss:$16 sps:$4 sm:$0xff]   ;;  %v3368_v51 = vld [vmem:[%s4395_s1 + $0x44c] ss:$16 sps:$4 sm:$0xff]  }
  0x69   : > { %1455 = vmatpush1.bf16.msra.mxu0 %v3279_v52  ;;  %1498 = vmatpush1.bf16.msra.mxu1 %v3282_v53  ;;  %v3363_v52 = vld [vmem:[%s4395_s1 + $0x440] ss:$16 sps:$4 sm:$0xff]   ;;  %v3366_v53 = vld [vmem:[%s4395_s1 + $0x448] ss:$16 sps:$4 sm:$0xff]  }
  0x6a   : > { %1456 = vmatprep.subr.bf16.mxu0 %v3287_v54  ;;  %1499 = vmatprep.subr.bf16.mxu1 %v3290_v55  ;;  %v3371_v54 = vld [vmem:[%s4395_s1 + $0x424] ss:$16 sps:$4 sm:$0xff]   ;;  %v3374_v55 = vld [vmem:[%s4395_s1 + $0x42c] ss:$16 sps:$4 sm:$0xff]  }
  0x6d   : > { %1457 = vmatpush2.bf16.msra.mxu0 %v3285_v56  ;;  %1500 = vmatpush2.bf16.msra.mxu1 %v3288_v57  ;;  %v3369_v56 = vld [vmem:[%s4395_s1 + $0x420] ss:$16 sps:$4 sm:$0xff]   ;;  %v3372_v57 = vld [vmem:[%s4395_s1 + $0x428] ss:$16 sps:$4 sm:$0xff]  }
  0x6e   : > { %1458 = vmatprep.subr.bf16.mxu0 %v3293_v58  ;;  %1501 = vmatprep.subr.bf16.mxu1 %v3296_v59  ;;  %v3377_v58 = vld [vmem:[%s4395_s1 + $0x404] ss:$16 sps:$4 sm:$0xff]   ;;  %v3380_v59 = vld [vmem:[%s4395_s1 + $0x40c] ss:$16 sps:$4 sm:$0xff]  }
  0x71   : > { %1459 = vmatpush2.bf16.msra.mxu0 %v3291_v60  ;;  %1502 = vmatpush2.bf16.msra.mxu1 %v3294_v61  ;;  %v3375_v60 = vld [vmem:[%s4395_s1 + $0x400] ss:$16 sps:$4 sm:$0xff]   ;;  %v3378_v61 = vld [vmem:[%s4395_s1 + $0x408] ss:$16 sps:$4 sm:$0xff]  }
  0x72   : > { %1460 = vmatprep.subr.bf16.mxu0 %v3299_v62  ;;  %1503 = vmatprep.subr.bf16.mxu1 %v3302_v63  ;;  %v3383_v62 = vld [vmem:[%s4395_s1 + $0x5e4] ss:$16 sps:$4 sm:$0xff]   ;;  %v3386_v63 = vld [vmem:[%s4395_s1 + $0x5ec] ss:$16 sps:$4 sm:$0xff]  }
  0x75   : > { %1461 = vmatpush2.bf16.msra.mxu0 %v3297_v0  ;;  %1504 = vmatpush2.bf16.msra.mxu1 %v3300_v1  ;;  %v3381_v0 = vld [vmem:[%s4395_s1 + $0x5e0] ss:$16 sps:$4 sm:$0xff]   ;;  %v3384_v1 = vld [vmem:[%s4395_s1 + $0x5e8] ss:$16 sps:$4 sm:$0xff]  }
  0x76   : > { %1462 = vmatprep.subr.bf16.mxu0 %v3305_v2  ;;  %1505 = vmatprep.subr.bf16.mxu1 %v3308_v3  ;;  %v3389_v2 = vld [vmem:[%s4395_s1 + $0x5c4] ss:$16 sps:$4 sm:$0xff]   ;;  %v3392_v3 = vld [vmem:[%s4395_s1 + $0x5cc] ss:$16 sps:$4 sm:$0xff]  }
  0x79   : > { %1463 = vmatpush2.bf16.msra.mxu0 %v3303_v4  ;;  %1506 = vmatpush2.bf16.msra.mxu1 %v3306_v5  ;;  %v3387_v4 = vld [vmem:[%s4395_s1 + $0x5c0] ss:$16 sps:$4 sm:$0xff]   ;;  %v3390_v5 = vld [vmem:[%s4395_s1 + $0x5c8] ss:$16 sps:$4 sm:$0xff]  }
  0x7a   : > { %1464 = vmatprep.subr.bf16.mxu0 %v3311_v6  ;;  %1507 = vmatprep.subr.bf16.mxu1 %v3314_v7  ;;  %v3395_v6 = vld [vmem:[%s4395_s1 + $0x5a4] ss:$16 sps:$4 sm:$0xff]   ;;  %v3398_v7 = vld [vmem:[%s4395_s1 + $0x5ac] ss:$16 sps:$4 sm:$0xff]  }
  0x7d   : > { %1465 = vmatpush2.bf16.msra.mxu0 %v3309_v8  ;;  %1508 = vmatpush2.bf16.msra.mxu1 %v3312_v9  ;;  %v3393_v8 = vld [vmem:[%s4395_s1 + $0x5a0] ss:$16 sps:$4 sm:$0xff]   ;;  %v3396_v9 = vld [vmem:[%s4395_s1 + $0x5a8] ss:$16 sps:$4 sm:$0xff]  }
  0x7e   : > { %1466 = vmatprep.subr.bf16.mxu0 %v3317_v10  ;;  %1509 = vmatprep.subr.bf16.mxu1 %v3320_v11  ;;  %v3401_v10 = vld [vmem:[%s4395_s1 + $0x584] ss:$16 sps:$4 sm:$0xff]   ;;  %v3404_v11 = vld [vmem:[%s4395_s1 + $0x58c] ss:$16 sps:$4 sm:$0xff]  }
  0x81   : > { %1467 = vmatpush2.bf16.msra.mxu0 %v3315_v14  ;;  %1510 = vmatpush2.bf16.msra.mxu1 %v3318_v15  ;;  %v3402_v14 = vld [vmem:[%s4395_s1 + $0x588] ss:$16 sps:$4 sm:$0xff]   ;;  %v3407_v15 = vld [vmem:[%s4395_s1 + $0x564] ss:$16 sps:$4 sm:$0xff]  }
  0x82   : > { %1468 = vmatprep.subr.bf16.mxu0 %v3323_v16  ;;  %1511 = vmatprep.subr.bf16.mxu1 %v3326_v17  ;;  %v3410_v16 = vld [vmem:[%s4395_s1 + $0x56c] ss:$16 sps:$4 sm:$0xff]   ;;  %v3405_v17 = vld [vmem:[%s4395_s1 + $0x560] ss:$16 sps:$4 sm:$0xff]  }
  0x85   : > { %1469 = vmatpush2.bf16.msra.mxu0 %v3321_v18  ;;  %1512 = vmatpush2.bf16.msra.mxu1 %v3324_v22  ;;  %v3408_v18 = vld [vmem:[%s4395_s1 + $0x568] ss:$16 sps:$4 sm:$0xff]   ;;  %v3411_v22 = vld [vmem:[%s4395_s1 + $0x540] ss:$16 sps:$4 sm:$0xff]  }
  0x86   : > { %1470 = vmatprep.subr.bf16.mxu0 %v3329_v23  ;;  %1513 = vmatprep.subr.bf16.mxu1 %v3332_v25  ;;  %v3414_v23 = vld [vmem:[%s4395_s1 + $0x548] ss:$16 sps:$4 sm:$0xff]   ;;  %v3422_v25 = vld [vmem:[%s4395_s1 + $0x52c] ss:$16 sps:$4 sm:$0xff]  }
  0x89   : > { %1471 = vmatpush2.bf16.msra.mxu0 %v3327_v19  ;;  %1514 = vmatpush2.bf16.msra.mxu1 %v3330_v26  ;;  %v3417_v19 = vld [vmem:[%s4395_s1 + $0x520] ss:$16 sps:$4 sm:$0xff]   ;;  %v3420_v26 = vld [vmem:[%s4395_s1 + $0x528] ss:$16 sps:$4 sm:$0xff]  }
  0x8a   : > { %1930 = vmatprep.subr.bf16.mxu0 %v3335_v13  ;;  %1973 = vmatprep.subr.bf16.mxu1 %v3338_v31  ;;  %v3423_v13 = vld [vmem:[%s4395_s1 + $0x500] ss:$16 sps:$4 sm:$0xff]   ;;  %v3426_v31 = vld [vmem:[%s4395_s1 + $0x508] ss:$16 sps:$4 sm:$0xff]  }
  0x8c   : > { %1473 = vmatmul.mubr.bf16.vlgmr.msra.gmra.mxu0 %v1107_v33  ;;  %1516 = vmatmul.mubr.bf16.vlgmr.msra.gmra.mxu1 %v1107_v33  ;;  %v3430_v33 = vld [vmem:[%s4400_s6 + $0x38] sm:$0xff]  }
  0x8d   : > { %1931 = vmatpush1.bf16.msra.mxu0 %v3333_v32  ;;  %1974 = vmatpush1.bf16.msra.mxu1 %v3336_v34  ;;  %v3429_v32 = vld [vmem:[%s4400_s6 + $0x78] sm:$0xff]   ;;  %v3431_v34 = vld [vmem:[%s4400_s6 + $0x70] sm:$0xff]  }
  0x8e   : > { %1932 = vmatprep.subr.bf16.mxu0 %v3341_v35  ;;  %1975 = vmatprep.subr.bf16.mxu1 %v3344_v36  ;;  %v3432_v35 = vld [vmem:[%s4400_s6 + $0x30] sm:$0xff]   ;;  %v3434_v36 = vld [vmem:[%s4400_s6 + $0x28] sm:$0xff]  }
  0x8f   : > { %1962 = vmatprep.mubr.bf16.mxu0 %v3844_v27  ;;  %2005 = vmatprep.mubr.bf16.mxu1 %v3844_v27  ;;  %v3354_v27 = vld [vmem:[%s4395_s1 + $0x488] ss:$16 sps:$4 sm:$0xff]  }
  0x91   : > { %1933 = vmatpush1.bf16.msra.mxu0 %v3339_v37  ;;  %1976 = vmatpush1.bf16.msra.mxu1 %v3342_v38  ;;  %v3435_v37 = vld [vmem:[%s4400_s6 + $0x60] sm:$0xff]  }
  0x92   : > { %1934 = vmatprep.subr.bf16.mxu0 %v3347_v39  ;;  %1977 = vmatprep.subr.bf16.mxu1 %v3350_v40  ;;  %v3436_v38 = vld [vmem:[%s4400_s6 + $0x20] sm:$0xff]   ;;  %v3437_v39 = vld [vmem:[%s4400_s6 + $0x58] sm:$0xff]  }
  0x93   : > { %v3438_v40 = vld [vmem:[%s4400_s6 + $0x18] sm:$0xff]  }
  0x95   : > { %1935 = vmatpush1.bf16.msra.mxu0 %v3345_v41  ;;  %1978 = vmatpush1.bf16.msra.mxu1 %v3348_v42  ;;  %v3439_v41 = vld [vmem:[%s4400_s6 + $0x50] sm:$0xff]  }
  0x96   : > { %1936 = vmatprep.subr.bf16.mxu0 %v3353_v43  ;;  %1979 = vmatprep.subr.bf16.mxu1 %v3356_v44  ;;  %v3440_v42 = vld [vmem:[%s4400_s6 + $0x10] sm:$0xff]   ;;  %v3441_v43 = vld [vmem:[%s4400_s6 + $0x48] sm:$0xff]  }
  0x97   : > { %v3442_v44 = vld [vmem:[%s4400_s6 + $0x8] sm:$0xff]  }
  0x99   : > { %1937 = vmatpush1.bf16.msra.mxu0 %v3351_v45  ;;  %1980 = vmatpush1.bf16.msra.mxu1 %v3354_v27  ;;  %v3443_v45 = vld [vmem:[%s4400_s6 + $0x40] sm:$0xff]  }
  0x9a   : > { %1938 = vmatprep.subr.bf16.mxu0 %v3359_v46  ;;  %1981 = vmatprep.subr.bf16.mxu1 %v3362_v47  ;;  %v3444_v27 = vld [vmem:[%s4400_s6] sm:$0xff]  }
  0x9d   : > { %1939 = vmatpush1.bf16.msra.mxu0 %v3357_v48  ;;  %1982 = vmatpush1.bf16.msra.mxu1 %v3360_v49  ;;  %v1004_v49 = vlaneseq }
  0x9e   : > { %1940 = vmatprep.subr.bf16.mxu0 %v3365_v50  ;;  %1983 = vmatprep.subr.bf16.mxu1 %v3368_v51 }
  0x9f   : > { %v4268_v51 = vshrl.u32 %v1004_v49, 7 }
  0xa1   : > { %1941 = vmatpush1.bf16.msra.mxu0 %v3363_v52  ;;  %1984 = vmatpush1.bf16.msra.mxu1 %v3366_v53  ;;  %v1014_v53 = vsub.s32 2, %v4268_v51 }
  0xa2   : > { %1942 = vmatprep.subr.bf16.mxu0 %v3371_v54  ;;  %1985 = vmatprep.subr.bf16.mxu1 %v3374_v55  ;;  %v514_v54 = vld [vmem:[%s4396_s2] sm:$0xf] }
  0xa5   : > { %1943 = vmatpush1.bf16.msra.mxu0 %v3369_v56  ;;  %1986 = vmatpush1.bf16.msra.mxu1 %v3372_v57  ;;  %v1018_v56 = vsub.s32 3, %v4268_v51  ;;  %v1015_v57 = vrot.slane %v514_v54, %v1014_v53 }
  0xa6   : > { %1944 = vmatprep.subr.bf16.mxu0 %v3377_v58  ;;  %1987 = vmatprep.subr.bf16.mxu1 %v3380_v59 }
  0xa7   : > { %v1019_v59 = vrot.slane %v514_v54, %v1018_v56 }
  0xa9   : > { %1945 = vmatpush1.bf16.msra.mxu0 %v3375_v60  ;;  %1988 = vmatpush1.bf16.msra.mxu1 %v3378_v61 }
  0xaa   : > { %1946 = vmatprep.subr.bf16.mxu0 %v3383_v62  ;;  %1989 = vmatprep.subr.bf16.mxu1 %v3386_v63 }
  0xad   : > { %1947 = vmatpush2.bf16.msra.mxu0 %v3381_v0  ;;  %1990 = vmatpush2.bf16.msra.mxu1 %v3384_v1 }
  0xae   : > { %1948 = vmatprep.subr.bf16.mxu0 %v3389_v2  ;;  %1991 = vmatprep.subr.bf16.mxu1 %v3392_v3 }
  0xb1   : > { %1949 = vmatpush2.bf16.msra.mxu0 %v3387_v4  ;;  %1992 = vmatpush2.bf16.msra.mxu1 %v3390_v5 }
  0xb2   : > { %1950 = vmatprep.subr.bf16.mxu0 %v3395_v6  ;;  %1993 = vmatprep.subr.bf16.mxu1 %v3398_v7 }
  0xb5   : > { %1951 = vmatpush2.bf16.msra.mxu0 %v3393_v8  ;;  %1994 = vmatpush2.bf16.msra.mxu1 %v3396_v9 }
  0xb6   : > { %1952 = vmatprep.subr.bf16.mxu0 %v3401_v10  ;;  %1995 = vmatprep.subr.bf16.mxu1 %v3404_v11 }
  0xb9   : > { %1953 = vmatpush2.bf16.msra.mxu0 %v3399_v12  ;;  %1996 = vmatpush2.bf16.msra.mxu1 %v3402_v14 }
  0xba   : > { %1954 = vmatprep.subr.bf16.mxu0 %v3407_v15  ;;  %1997 = vmatprep.subr.bf16.mxu1 %v3410_v16 }
  0xbd   : > { %1955 = vmatpush2.bf16.msra.mxu0 %v3405_v17  ;;  %1998 = vmatpush2.bf16.msra.mxu1 %v3408_v18 }
  0xbe   : > { %1956 = vmatprep.subr.bf16.mxu0 %v3413_v20  ;;  %1999 = vmatprep.subr.bf16.mxu1 %v3416_v21 }
  0xc1   : > { %1957 = vmatpush2.bf16.msra.mxu0 %v3411_v22  ;;  %2000 = vmatpush2.bf16.msra.mxu1 %v3414_v23 }
  0xc2   : > { %1958 = vmatprep.subr.bf16.mxu0 %v3419_v24  ;;  %2001 = vmatprep.subr.bf16.mxu1 %v3422_v25 }
  0xc5   : > { %1959 = vmatpush2.bf16.msra.mxu0 %v3417_v19  ;;  %2002 = vmatpush2.bf16.msra.mxu1 %v3420_v26 }
  0xc6   : > { %1960 = vmatprep.subr.bf16.mxu0 %v3425_v28  ;;  %2003 = vmatprep.subr.bf16.mxu1 %v3428_v29 }
  0xc9   : > { %1961 = vmatpush2.bf16.msra.mxu0 %v3423_v13  ;;  %2004 = vmatpush2.bf16.msra.mxu1 %v3426_v31 }
  0xca   : > { %3090 = vmatprep.subr.bf16.mxu0 %v3429_v32 }
  0xcc   : > { %1963 = vmatmul.mubr.bf16.vlgmr.msra.gmra.mxu0 %v3853_v30  ;;  %2006 = vmatmul.mubr.bf16.vlgmr.msra.gmra.mxu1 %v3853_v30  ;;  %v3433_v30 = vld [vmem:[%s4400_s6 + $0x68] sm:$0xff]  }
  0xcd   : > { %3091 = vmatpush3.bf16.msra.mxu0 %v3430_v33 }
  0xce   : > { %3092 = vmatprep.subr.bf16.mxu0 %v3431_v34 }
  0xd1   : > { %3093 = vmatpush3.bf16.msra.mxu0 %v3432_v35 }
  0xd2   : > { %3094 = vmatprep.subr.bf16.mxu0 %v3433_v30  ;;  %v1006_v30 = vsub.s32 0, %v4268_v51 }
  0xd5   : > { %3095 = vmatpush3.bf16.msra.mxu0 %v3434_v36  ;;  %v1010_v36 = vsub.s32 1, %v4268_v51 }
  0xd6   : > { %3096 = vmatprep.subr.bf16.mxu0 %v3435_v37 }
  0xd9   : > { %3097 = vmatpush3.bf16.msra.mxu0 %v3436_v38  ;;  %v1007_v38 = vrot.slane %v514_v54, %v1006_v30 }
  0xda   : > { %3098 = vmatprep.subr.bf16.mxu0 %v3437_v39  ;;  %v1011_v39 = vrot.slane %v514_v54, %v1010_v36 }
  0xdd   : > { %3099 = vmatpush3.bf16.msra.mxu0 %v3438_v40 }
  0xde   : > { %3100 = vmatprep.subr.bf16.mxu0 %v3439_v41 }
  0xe1   : > { %3101 = vmatpush3.bf16.msra.mxu0 %v3440_v42 }
  0xe2   : > { %3102 = vmatprep.subr.bf16.mxu0 %v3441_v43 }
  0xe5   : > { %3103 = vmatpush3.bf16.msra.mxu0 %v3442_v44 }
  0xe6   : > { %3104 = vmatprep.subr.bf16.mxu0 %v3443_v45 }
  0xe9   : > { %3105 = vmatpush3.bf16.msra.mxu0 %v3444_v27 }
 0x10c   : > { %v994_v46 = vpop.f32.mrf.mxu1  ;;  %v951_v60 = vpop.f32.mrf.mxu0 }
 0x10d   : > { %v1026_v61 = vadd.f32 %v1015_v57, %v994_v46  ;;  %v1024_v44 = vadd.f32 %v1007_v38, %v951_v60 }
 0x10e   : > { %v996_v47 = vpop.f32.mrf.mxu1  ;;  %v953_v1 = vpop.f32.mrf.mxu0 }
 0x10f   : > { %v1027_v63 = vadd.f32 %v1019_v59, %v996_v47  ;;  %v1025_v42 = vadd.f32 %v1011_v39, %v953_v1  ;;  %v3505_v1 = vmov 0.0  }
 0x110   : > { %v998_v48 = vpop.f32.mrf.mxu1  ;;  %v955_v11 = vpop.f32.mrf.mxu0  ;;  %3116 = vmatprep.subr.bf16.mxu0 %v3505_v1  ;;  %3122 = vmatprep.subr.bf16.mxu1 %v3505_v1 }
 0x111   : > { %v1030_v3 = vadd.f32 %v1015_v57, %v998_v48  ;;  %v1028_v41 = vadd.f32 %v1007_v38, %v955_v11  ;;  %3124 = vmatprep.mubr.msk.bf16.mxu1 %vm3506_vm4, %v3505_v1  ;;  %v3446_v38 = vld [vmem:[%s491_s23] sm:$0xff]  }
 0x112   : > { %v1000_v50 = vpop.f32.mrf.mxu1  ;;  %v957_v21 = vpop.f32.mrf.mxu0  ;;  %3123 = vmatpush3.bf16.msra.mxu1 %v3446_v38 }
 0x113   : > { %v1031_v7 = vadd.f32 %v1019_v59, %v1000_v50  ;;  %v1029_v43 = vadd.f32 %v1011_v39, %v957_v21  ;;  %v3449_v39 = vld [vmem:[%s4402_s8 + $0x74] ss:$8 sps:$4 sm:$0xff]  }
 0x114   : > { %2473 = vmatprep.subr.bf16.mxu1 %v3449_v39 }
 0x14c   : > { %v1517_v52 = vpop.f32.mrf.mxu1  ;;  %v1474_v23 = vpop.f32.mrf.mxu0 }
 0x14d   : > { %v1528_v0 = vadd.f32 %v1517_v52, %v1026_v61  ;;  %v1526_v50 = vadd.f32 %v1474_v23, %v1024_v44 }
 0x14e   : > { %v1519_v55 = vpop.f32.mrf.mxu1  ;;  %v1476_v24 = vpop.f32.mrf.mxu0 }
 0x14f   : > { %v1529_v4 = vadd.f32 %v1519_v55, %v1027_v63  ;;  %v1527_v47 = vadd.f32 %v1476_v24, %v1025_v42 }
 0x150   : > { %v1521_v58 = vpop.f32.mrf.mxu1  ;;  %v1478_v25 = vpop.f32.mrf.mxu0 }
 0x151   : > { %v1532_v8 = vadd.f32 %v1521_v58, %v1030_v3  ;;  %v1530_v45 = vadd.f32 %v1478_v25, %v1028_v41  ;;  %v3037_v3 = vld [vmem:[%s4401_s7] ss:$0 sm:$0xff] }
 0x152   : > { %v1523_v62 = vpop.f32.mrf.mxu1  ;;  %v1480_v13 = vpop.f32.mrf.mxu0 }
 0x153   : > { %v1533_v14 = vadd.f32 %v1523_v62, %v1031_v7  ;;  %v1531_v48 = vadd.f32 %v1480_v13, %v1029_v43  ;;  %v2520_v43 = vld [vmem:[%s496_s30] sm:$0xff] }
 0x18c   : > { %v2007_v2 = vpop.f32.mrf.mxu1  ;;  %v1964_v34 = vpop.f32.mrf.mxu0 }
 0x18d   : > { %v2018_v5 = vadd.f32 %v2007_v2, %v1528_v0  ;;  %v2016_v58 = vadd.f32 %v1964_v34, %v1526_v50  ;;  %v3445_v0 = vld [vmem:[%s486_s13] sm:$0xff]  }
 0x18e   : > { %v2009_v6 = vpop.f32.mrf.mxu1  ;;  %v1966_v37 = vpop.f32.mrf.mxu0 }
 0x18f   : > { %v3033_v9 = vmul.f32 -1.442695, %v2018_v5  ;;  %v2019_v10 = vadd.f32 %v2009_v6, %v1529_v4  ;;  %v2017_v55 = vadd.f32 %v1966_v37, %v1527_v47  ;;  %v3087_v5 = vld [vmem:[%s481_s17] sm:$0xff]  }
 0x190   : > { %v2011_v12 = vpop.f32.mrf.mxu1  ;;  %v1968_v40 = vpop.f32.mrf.mxu0 }
 0x191   : > { %v3034_v15 = vmul.f32 -1.442695, %v2019_v10  ;;  %v2022_v16 = vadd.f32 %v2011_v12, %v1532_v8  ;;  %3471 = vpow2.f32 %v3033_v9  ;;  %v2020_v52 = vadd.f32 %v1968_v40, %v1530_v45  ;;  %v2521_v45 = vld [vmem:[%s496_s30 + $0x8] sm:$0xff] }
 0x192   : > { %v2013_v17 = vpop.f32.mrf.mxu1  ;;  %v1970_v27 = vpop.f32.mrf.mxu0  ;;  %v3088_v9 = vunpack.c.l.bf16 %v3087_v5  ;;  %v3089_v12 = vunpack.c.h.bf16 %v3087_v5  ;;  %v3468_v5 = vld [vmem:[%s4402_s8] ss:$8 sps:$4 sm:$0xff]  }
 0x193   : > { %3473 = vpow2.f32 %v3034_v15  ;;  %v3035_v18 = vmul.f32 -1.442695, %v2022_v16  ;;  %v2023_v20 = vadd.f32 %v2013_v17, %v1533_v14  ;;  %v2021_v56 = vadd.f32 %v1970_v27, %v1531_v48  ;;  %v3447_v48 = vld [vmem:[%s4402_s8 + $0x70] ss:$8 sps:$4 sm:$0xff]  }
 0x195   : > { %3475 = vpow2.f32 %v3035_v18  ;;  %v3036_v22 = vmul.f32 -1.442695, %v2023_v20 }
 0x197   : > { %3477 = vpow2.f32 %v3036_v22 }
 0x19e   : > { %v3472_v19 = vpop.eup %3471 }
 0x19f   : > { %v2036_v31 = vadd.f32 1.0, %v3472_v19 }
 0x1a0   : > { %v3474_v26 = vpop.eup %3473 }
 0x1a1   : > { %v2037_v28 = vadd.f32 1.0, %v3474_v26 }
 0x1a2   : > { %v3476_v29 = vpop.eup %3475 }
 0x1a3   : > { %v2038_v32 = vadd.f32 1.0, %v3476_v29  ;;  %3479 = vrcp.f32 %v2037_v28 }
 0x1a4   : > { %v3478_v33 = vpop.eup %3477 }
 0x1a5   : > { %3481 = vrcp.f32 %v2038_v32  ;;  %v2039_v35 = vadd.f32 1.0, %v3478_v33 }
 0x1a6   : > { %3483 = vrcp.f32 %v2036_v31 }
 0x1a7   : > { %3485 = vrcp.f32 %v2039_v35 }
 0x1b0   : > { %v3480_v46 = vpop.eup %3479 }
 0x1b1   : > { %v4283_v59 = vmul.f32 %v3480_v46, %v2017_v55  ;;  %v3455_v55 = vld [vmem:[%s4402_s8 + $0x54] ss:$8 sps:$4 sm:$0xff]  }
 0x1b2   : > { %v3482_v49 = vpop.eup %3481 }
 0x1b3   : > { %v3484_v53 = vpop.eup %3483  ;;  %v4281_v54 = vmul.f32 %v3482_v49, %v2020_v52  ;;  %v3452_v52 = vld [vmem:[%s4402_s8 + $0x64] ss:$8 sps:$4 sm:$0xff]  }
 0x1b4   : > { %v3486_v57 = vpop.eup %3485  ;;  %v4287_v60 = vmul.f32 %v3484_v53, %v2016_v58  ;;  %v3450_v53 = vld [vmem:[%s4402_s8 + $0x60] ss:$8 sps:$4 sm:$0xff]  }
 0x1b5   : > { %v4285_v61 = vmul.f32 %v3486_v57, %v2021_v56  ;;  %v3453_v56 = vld [vmem:[%s4402_s8 + $0x50] ss:$8 sps:$4 sm:$0xff]   ;;  %v3458_v57 = vld [vmem:[%s4402_s8 + $0x44] ss:$8 sps:$4 sm:$0xff]   ;;  %v3456_v58 = vld [vmem:[%s4402_s8 + $0x40] ss:$8 sps:$4 sm:$0xff]  }
 0x1b6   : > { %v2084_v63 = vpack.c.bf16 %v4281_v54, %v4287_v60 }
 0x1b7   : > { %v2085_v62 = vpack.c.bf16 %v4285_v61, %v4283_v59 }
 0x1b9   : > { %2221 = vmatprep.mubr.bf16.mxu0 %v2085_v62  ;;  %v3461_v62 = vld [vmem:[%s4402_s8 + $0x34] ss:$8 sps:$4 sm:$0xff]  }
 0x1ba   : > { %2222 = vmatmul.mubr.bf16.vlgmr.msra.gmra.mxu0 %v2084_v63  ;;  %v3459_v63 = vld [vmem:[%s4402_s8 + $0x30] ss:$8 sps:$4 sm:$0xff]  }
 0x1bb   : > { %3117 = vmatpush3.bf16.xpose.msra.mxu0 %v3445_v0  ;;  %3118 = vmatprep.mubr.msk.bf16.mxu0 %vm3506_vm4, %v3505_v1  ;;  %v3464_v0 = vld [vmem:[%s4402_s8 + $0x24] ss:$8 sps:$4 sm:$0xff]   ;;  %v3462_v1 = vld [vmem:[%s4402_s8 + $0x20] ss:$8 sps:$4 sm:$0xff]  }
 0x27a   : > { %v3106_v2 = vpop.f32.mrf.mxu0 }
 0x27c   : > { %v3107_v4 = vpop.f32.mrf.mxu0 }
 0x27d   : > { %v3108_v6 = vadd.f32 %v3107_v4, %v3106_v2  ;;  %v3467_v2 = vld [vmem:[%s4402_s8 + $0x14] ss:$8 sps:$4 sm:$0xff]   ;;  %v3470_v4 = vld [vmem:[%s4402_s8 + $0x4] ss:$8 sps:$4 sm:$0xff]  }
 0x27e   : > { %v3109_v7 = vpop.f32.mrf.mxu0 }
 0x27f   : > { %v2224_v8 = vadd.f32 %v3108_v6, %v3037_v3  ;;  %v3507_v6 = vmov 0  }
 0x280   : > { %v3110_v10 = vpop.f32.mrf.mxu0 }
 0x281   : > { %v3111_v11 = vadd.f32 %v3110_v10, %v3109_v7  ;;  %v2234_v14 = vadd.f32 %v3088_v9, %v2224_v8 }
 0x283   : > { %v2227_v15 = vadd.f32 %v3111_v11, %v3037_v3  ;;  %v2236_v17 = vmul.f32 0.088388346, %v2234_v14  ;;  %v3465_v3 = vld [vmem:[%s4402_s8 + $0x10] ss:$8 sps:$4 sm:$0xff]  }
 0x285   : > { %v2235_v16 = vadd.f32 %v3089_v12, %v2227_v15  ;;  %v2381_v12 = vld [vmem:[%s4403_s9] sm:$0x3] }
 0x286   : > { %v2386_v14 = vrot.slane %v2381_v12, %v1006_v30  ;;  %v2390_v15 = vrot.slane %v2381_v12, %v1010_v36 }
 0x287   : > { %v2237_v18 = vmul.f32 0.088388346, %v2235_v16 }
 0x289   : > { %v2242_v20 = vpack.c.bf16 %v2237_v18, %v2236_v17  ;;  %v3495_v17 = vld [vmem:[%s3726_s16] sm:$0xff] }
 0x28a   : > { %v510_v18 = vunpack.c.l.bf16 %v3495_v17 }
 0x28b   : > { %3119 = vmatmul.mubr.bf16.vlgmr.msra.gmra.mxu0 %v2242_v20 }
 0x34b   : > { %v2283_v21 = vpop.f32.mrf.mxu0 }
 0x34c   : > { %v2291_v22 = vsel %vm2290_vm5, %v2283_v21, -inf }
 0x34d   : > { %2292 = vmax.xlane.f32.xlu0 %v2291_v22  ;;  %v3120_v23 = vpop.f32.mrf.mxu0 }
 0x34e   : > { %v511_v23 = vunpack.c.h.bf16 %v3495_v17 }
 0x34f   : > { %v2286_v24 = vpop.f32.mrf.mxu0 }
 0x350   : > { %v2294_v25 = vsel %vm2290_vm5, %v2286_v24, -inf }
 0x351   : > { %2295 = vmax.xlane.f32.xlu0 %v2294_v25  ;;  %v3121_v19 = vpop.f32.mrf.mxu0 }
 0x3d6   : > { %v2293_v26 = vpop.xlane.xlu0 %2292 }
 0x3d7   : > { %v2297_v28 = vsub.f32 %v2283_v21, %v2293_v26 }
 0x3d9   : > { %v2299_v29 = vmul.f32 1.442695, %v2297_v28  ;;  %v3496_v28 = vld [vmem:[%s3726_s16 + $0x8] sm:$0xff] }
 0x3da   : > { %v2296_v13 = vpop.xlane.xlu0 %2295 }
 0x3db   : > { %3487 = vpow2.f32 %v2299_v29  ;;  %v2298_v31 = vsub.f32 %v2286_v24, %v2296_v13  ;;  %v512_v29 = vunpack.c.l.bf16 %v3496_v28 }
 0x3dd   : > { %v2301_v32 = vmul.f32 1.442695, %v2298_v31  ;;  %v513_v31 = vunpack.c.h.bf16 %v3496_v28 }
 0x3df   : > { %3489 = vpow2.f32 %v2301_v32 }
 0x3e8   : > { %v3488_v33 = vpop.eup %3487 }
 0x3e9   : > { %v2303_v34 = vsel %vm2290_vm5, %v3488_v33, 0.0 }
 0x3ea   : > { %2304 = vadd.xlane.f32.xlu1 %v2303_v34 }
 0x3ec   : > { %v3490_v35 = vpop.eup %3489 }
 0x3ed   : > { %v2306_v37 = vsel %vm2290_vm5, %v3490_v35, 0.0 }
 0x3ee   : > { %2307 = vadd.xlane.f32.xlu1 %v2306_v37 }
 0x473   : > { %v2305_v40 = vpop.xlane.xlu1 %2304 }
 0x474   : > { %3491 = vrcp.f32 %v2305_v40 }
 0x477   : > { %v2308_v41 = vpop.xlane.xlu1 %2307 }
 0x478   : > { %3493 = vrcp.f32 %v2308_v41 }
 0x481   : > { %v3492_v42 = vpop.eup %3491 }
 0x482   : > { %v2311_v44 = vmul.f32 %v3492_v42, %v3488_v33 }
 0x484   : > { %v2522_v27 = vadd.f32 %v2520_v43, %v2311_v44 }
 0x485   : > { %v3494_v46 = vpop.eup %3493 }
 0x486   : > { %v2312_v47 = vmul.f32 %v3494_v46, %v3490_v35  ;;  %2524 = vst.msk [vmem:[%s506_s14] sm:$0xff] %vm2290_vm5, %v2522_v27 }
 0x488   : > { %v2523_v49 = vadd.f32 %v2521_v45, %v2312_v47  ;;  %v2313_v50 = vpack.c.bf16 %v2312_v47, %v2311_v44 }
 0x48a   : > { %3125 = vmatmul.mubr.msk.bf16.vlgmr.msra.gmra.mxu1 %vm2290_vm5, %v2313_v50  ;;  %2525 = vst.msk [vmem:[%s506_s14 + $0x8] sm:$0xff] %vm2290_vm5, %v2523_v49 }
 0x48b   : > { %2474 = vmatpush1.bf16.msra.mxu1 %v3447_v48  ;;  %2505 = vmatprep.mubr.bf16.mxu1 %v3507_v6 }
 0x48c   : > { %2475 = vmatprep.subr.bf16.mxu1 %v3452_v52 }
 0x48f   : > { %2476 = vmatpush1.bf16.msra.mxu1 %v3450_v53 }
 0x490   : > { %2477 = vmatprep.subr.bf16.mxu1 %v3455_v55 }
 0x493   : > { %2478 = vmatpush1.bf16.msra.mxu1 %v3453_v56 }
 0x494   : > { %2479 = vmatprep.subr.bf16.mxu1 %v3458_v57 }
 0x497   : > { %2480 = vmatpush1.bf16.msra.mxu1 %v3456_v58 }
 0x498   : > { %2481 = vmatprep.subr.bf16.mxu1 %v3461_v62 }
 0x49b   : > { %2482 = vmatpush1.bf16.msra.mxu1 %v3459_v63 }
 0x49c   : > { %2483 = vmatprep.subr.bf16.mxu1 %v3464_v0 }
 0x49f   : > { %2484 = vmatpush1.bf16.msra.mxu1 %v3462_v1 }
 0x4a0   : > { %2485 = vmatprep.subr.bf16.mxu1 %v3467_v2 }
 0x4a3   : > { %2486 = vmatpush1.bf16.msra.mxu1 %v3465_v3 }
 0x4a4   : > { %2487 = vmatprep.subr.bf16.mxu1 %v3470_v4 }
 0x4a7   : > { %2488 = vmatpush1.bf16.msra.mxu1 %v3468_v5 }
 0x54a   : > { %v2357_v7 = vpop.f32.mrf.mxu1 }
 0x54c   : > { %v3126_v8 = vpop.f32.mrf.mxu1 }
 0x54e   : > { %v2360_v9 = vpop.f32.mrf.mxu1 }
 0x54f   : > { %v2380_v10 = vpack.c.bf16 %v2360_v9, %v2357_v7 }
 0x550   : > { %v3127_v11 = vpop.f32.mrf.mxu1 }
 0x551   : > { %2506 = vmatmul.mubr.bf16.vlgmr.msra.gmra.mxu1 %v2380_v10 }
 0x611   : > { %v2507_v16 = vpop.f32.mrf.mxu1 }
 0x612   : > { %v2508_v20 = vadd.f32 %v2507_v16, %v2386_v14 }
 0x613   : > { %v2509_v21 = vpop.f32.mrf.mxu1 }
 0x614   : > { %v2516_v22 = vadd.f32 %v2508_v20, %v4287_v60  ;;  %v2510_v24 = vadd.f32 %v2509_v21, %v2390_v15 }
 0x615   : > { %v2511_v25 = vpop.f32.mrf.mxu1 }
 0x616   : > { %v2526_v19 = vadd.f32 %v2516_v22, %v510_v18  ;;  %v2517_v26 = vadd.f32 %v2510_v24, %v4283_v59  ;;  %v2512_v30 = vadd.f32 %v2511_v25, %v2386_v14 }
 0x617   : > { %v2513_v13 = vpop.f32.mrf.mxu1 }
 0x618   : > { %v2527_v51 = vadd.f32 %v2517_v26, %v511_v23  ;;  %v2518_v36 = vadd.f32 %v2512_v30, %v4281_v54  ;;  %v2514_v32 = vadd.f32 %v2513_v13, %v2390_v15  ;;  %v2530_v33 = vmul.f32 0.70710677, %v2526_v19 }
 0x61a   : > { %v2531_v34 = vmul.f32 0.70710677, %v2527_v51  ;;  %v2528_v35 = vadd.f32 %v2518_v36, %v512_v29  ;;  %v2519_v60 = vadd.f32 %v2514_v32, %v4285_v61 }
 0x61c   : > { %v3084_v37 = vpack.c.bf16 %v2531_v34, %v2530_v33  ;;  %v2529_v59 = vadd.f32 %v2519_v60, %v513_v31  ;;  %v2532_v38 = vmul.f32 0.70710677, %v2528_v35 }
 0x61e   : > { %2546 = vst [vmem:[%s501_s19] sm:$0xff] %v3084_v37  ;;  %v2533_v39 = vmul.f32 0.70710677, %v2529_v59 }
 0x620   : > { %v3085_v40 = vpack.c.bf16 %v2533_v39, %v2532_v38 }
 0x622   : > { %2547 = vst [vmem:[%s501_s19 + $0x8] sm:$0xff] %v3085_v40 }
 0x623 PF: > { %s23_s21 = sadd.s32 1, %s3503_s21  }
 0x624   : > { %p20_p4 = scmp.ge.s32.totalorder %s23_s21, 4  }
 0x626   :  { %22 = sbr.rel (!%p20_p4) target bundleno = 1 (0x1), region = 120 }

// kernel: conv_decoder_forward.11
= control target key start
LH: loop header
LB: loop body
LE: loop exit
PB: predicated region body
PF: predicated region fallthrough
CT: control target
= control target key end

     0   :  { %v304_v2 = vmov 0   ;;  %s392_s0 = inlined_call_operand.vmem [shape: bf16[32,128], index: 0, kind: input, shape index: {}]   ;;  %s393_s1 = inlined_call_operand.vmem [shape: bf16[128,200], index: 1, kind: input, shape index: {}]   ;;  %s394_s2 = inlined_call_operand.vmem [shape: f32[1,200], index: 2, kind: input, shape index: {}]   ;;  %s395_s3 = inlined_call_operand.hbm [shape: f32[32,200], index: 3, kind: output, shape index: {}]  }
   0x1   :  { %v256_v0 = vld [vmem:[%s393_s1 + $0x74] ss:$8 sps:$4 sm:$0xff]   ;;  %v258_v1 = vld [vmem:[%s393_s1 + $0x70] ss:$8 sps:$4 sm:$0xff]   ;;  %172 = vmatprep.mubr.bf16.mxu0 %v304_v2  ;;  %182 = vmatprep.mubr.bf16.mxu1 %v304_v2  ;;  %v259_v3 = vld [vmem:[%s393_s1 + $0x64] ss:$8 sps:$4 sm:$0xff]  }
   0x2   :  { %140 = vmatprep.subr.bf16.mxu0 %v256_v0  ;;  %236 = vmatprep.subr.bf16.mxu1 %v256_v0  ;;  %v261_v4 = vld [vmem:[%s393_s1 + $0x60] ss:$8 sps:$4 sm:$0xff]   ;;  %v262_v5 = vld [vmem:[%s393_s1 + $0x54] ss:$8 sps:$4 sm:$0xff]   ;;  %v264_v6 = vld [vmem:[%s393_s1 + $0x50] ss:$8 sps:$4 sm:$0xff]  }
   0x3   :  { %141 = vmatpush1.bf16.msra.mxu0 %v258_v1  ;;  %244 = vmatpush1.bf16.msra.mxu1 %v258_v1  ;;  %v265_v7 = vld [vmem:[%s393_s1 + $0x44] ss:$8 sps:$4 sm:$0xff]   ;;  %v267_v8 = vld [vmem:[%s393_s1 + $0x40] ss:$8 sps:$4 sm:$0xff]   ;;  %v268_v9 = vld [vmem:[%s393_s1 + $0x34] ss:$8 sps:$4 sm:$0xff]  }
   0x4   :  { %142 = vmatprep.subr.bf16.mxu0 %v259_v3  ;;  %237 = vmatprep.subr.bf16.mxu1 %v259_v3 }
   0x7   :  { %143 = vmatpush1.bf16.msra.mxu0 %v261_v4  ;;  %245 = vmatpush1.bf16.msra.mxu1 %v261_v4 }
   0x8   :  { %144 = vmatprep.subr.bf16.mxu0 %v262_v5  ;;  %238 = vmatprep.subr.bf16.mxu1 %v262_v5 }
   0xb   :  { %145 = vmatpush1.bf16.msra.mxu0 %v264_v6  ;;  %246 = vmatpush1.bf16.msra.mxu1 %v264_v6 }
   0xc   :  { %146 = vmatprep.subr.bf16.mxu0 %v265_v7  ;;  %239 = vmatprep.subr.bf16.mxu1 %v265_v7 }
   0xd   :  { %8 = vsyncpa [#allocation3], 0  ;;  %v270_v10 = vld [vmem:[%s393_s1 + $0x30] ss:$8 sps:$4 sm:$0xff]   ;;  %v271_v11 = vld [vmem:[%s393_s1 + $0x24] ss:$8 sps:$4 sm:$0xff]   ;;  %v38_v19 = vlaneseq }
   0xe   :  { %v273_v12 = vld [vmem:[%s393_s1 + $0x20] ss:$8 sps:$4 sm:$0xff]   ;;  %v274_v13 = vld [vmem:[%s393_s1 + $0x14] ss:$8 sps:$4 sm:$0xff]   ;;  %v276_v14 = vld [vmem:[%s393_s1 + $0x10] ss:$8 sps:$4 sm:$0xff]  }
   0xf   :  { %147 = vmatpush1.bf16.msra.mxu0 %v267_v8  ;;  %247 = vmatpush1.bf16.msra.mxu1 %v267_v8  ;;  %v277_v15 = vld [vmem:[%s393_s1 + $0x4] ss:$8 sps:$4 sm:$0xff]   ;;  %v279_v16 = vld [vmem:[%s393_s1] ss:$8 sps:$4 sm:$0xff]   ;;  %v39_v20 = vshrl.u32 %v38_v19, 7  ;;  %vm194_vm0 = vcmask 588800  }
  0x10   :  { %148 = vmatprep.subr.bf16.mxu0 %v268_v9  ;;  %240 = vmatprep.subr.bf16.mxu1 %v268_v9  ;;  %v280_v17 = vld [vmem:[%s392_s0] sm:$0xff]   ;;  %v281_v18 = vld [vmem:[%s392_s0 + $0x8] sm:$0xff]   ;;  %s305_s0 = smov [#allocation2]  }
  0x11   :  { %v40_v21 = vsub.s32 0, %v39_v20  ;;  %v36_v22 = vld [vmem:[%s394_s2] sm:$0x3]  ;;  %v44_v23 = vsub.s32 1, %v39_v20  ;;  %s207_s1 = sshll.u32 %s305_s0, 4  ;;  %s208_s1 = int_to_ptr.vmem [resolvable:$true] %s207_s1 }
  0x12   :  { %s282_s2 = scalar_lea.vmem %s208_s1, 1024  ;;  %p287_p1 = scmp.lt.s32.totalorder %s208_s1, %s208_s1 }
  0x13   :  { %149 = vmatpush1.bf16.msra.mxu0 %v270_v10  ;;  %248 = vmatpush1.bf16.msra.mxu1 %v270_v10  ;;  %v41_v24 = vrot.slane %v36_v22, %v40_v21  ;;  %v45_v25 = vrot.slane %v36_v22, %v44_v23  ;;  %p283_p0 = scmp.ne.s32.totalorder %s208_s1, %s282_s2  ;;  %p288_p2 = scmp.lt.s32.totalorder %s282_s2, %s282_s2 }
  0x14   :  { %150 = vmatprep.subr.bf16.mxu0 %v271_v11  ;;  %241 = vmatprep.subr.bf16.mxu1 %v271_v11 }
  0x15   :  { %p289_p3 = por %p288_p2, %p287_p1 }
  0x17   :  { %151 = vmatpush1.bf16.msra.mxu0 %v273_v12  ;;  %249 = vmatpush1.bf16.msra.mxu1 %v273_v12  ;;  %p290_p4 = pnand %p289_p3, %p283_p0 }
  0x18   :  { %152 = vmatprep.subr.bf16.mxu0 %v274_v13  ;;  %242 = vmatprep.subr.bf16.mxu1 %v274_v13 }
  0x1b   :  { %153 = vmatpush1.bf16.msra.mxu0 %v276_v14  ;;  %250 = vmatpush1.bf16.msra.mxu1 %v276_v14 }
  0x1c   :  { %154 = vmatprep.subr.bf16.mxu0 %v277_v15  ;;  %243 = vmatprep.subr.bf16.mxu1 %v277_v15 }
  0x1f   :  { %155 = vmatpush1.bf16.msra.mxu0 %v279_v16  ;;  %251 = vmatpush1.bf16.msra.mxu1 %v279_v16 }
  0x22   :  { %173 = vmatmul.mubr.bf16.vlgmr.msra.gmra.mxu0 %v280_v17  ;;  %183 = vmatmul.mubr.bf16.vlgmr.msra.gmra.mxu1 %v281_v18 }
  0xe2   :  { %v174_v26 = vpop.f32.mrf.mxu0  ;;  %v184_v27 = vpop.f32.mrf.mxu1 }
  0xe3   :  { %v175_v28 = vadd.f32 %v174_v26, %v41_v24  ;;  %v185_v29 = vadd.f32 %v184_v27, %v41_v24 }
  0xe4   :  { %v176_v30 = vpop.f32.mrf.mxu0  ;;  %v186_v31 = vpop.f32.mrf.mxu1 }
  0xe5   :  { %193 = vst [vmem:[#allocation2] sm:$0xff] %v175_v28  ;;  %198 = vst [vmem:[#allocation2 + $0x20] sm:$0xff] %v185_v29  ;;  %v177_v32 = vadd.f32 %v176_v30, %v45_v25  ;;  %v187_v33 = vadd.f32 %v186_v31, %v45_v25 }
  0xe6   :  { %v178_v34 = vpop.f32.mrf.mxu0  ;;  %v188_v35 = vpop.f32.mrf.mxu1 }
  0xe7   :  { %195 = vst.msk [vmem:[#allocation2 + $0x8] sm:$0xff] %vm194_vm0, %v177_v32  ;;  %199 = vst.msk [vmem:[#allocation2 + $0x28] sm:$0xff] %vm194_vm0, %v187_v33  ;;  %v179_v36 = vadd.f32 %v178_v34, %v41_v24  ;;  %v189_v37 = vadd.f32 %v188_v35, %v41_v24 }
  0xe8   :  { %v180_v38 = vpop.f32.mrf.mxu0  ;;  %v190_v39 = vpop.f32.mrf.mxu1 }
  0xe9   :  { %196 = vst [vmem:[#allocation2 + $0x10] sm:$0xff] %v179_v36  ;;  %200 = vst [vmem:[#allocation2 + $0x30] sm:$0xff] %v189_v37  ;;  %v181_v40 = vadd.f32 %v180_v38, %v45_v25  ;;  %v191_v41 = vadd.f32 %v190_v39, %v45_v25 }
  0xeb   :  { %197 = vst.msk [vmem:[#allocation2 + $0x18] sm:$0xff] %vm194_vm0, %v181_v40  ;;  %201 = vst.msk [vmem:[#allocation2 + $0x38] sm:$0xff] %vm194_vm0, %v191_v41 }
  0xec   :  { %293 = shalt.err (!%p290_p4)
}
  0xed   :  { %s306_s23 = smov 256   ;;  %s307_s24 = smov 16  }
  0xee   :  { %213 = dma.vmem_to_hbm [thread:$0]  %s208_s1, 1024, %s395_s3, [#allocation3], %s306_s23, %s306_s23, %s307_s24  }
  0xef   :  { %302 = dma.done.wait [#allocation3], 1024  }
  0xf0   :  { %303 = vsyncadd [#allocation3], 4294966272 }
  0xf1   :  { %217 = vsyncpa [#allocation3], 1 }

</bundles_post_ra>
